<compile_context>
chip_gen: v6e
topology: v6e:2x2x1
jax: 0.10.0
libtpu: 0.0.40
codegen_flags: <defaults>
</compile_context>

<pallas_src>
import jax
import jax.numpy as jnp
from jax.experimental import pallas as pl
from jax.experimental.pallas import tpu as pltpu

EPS = 1e-5  # nn.InstanceNorm2d default eps


# ------------------------- fused MAM kernel -----------------------------

def _mam_kernel(x_ref, w1_ref, w2t_ref, o_ref):
    # x_ref  : (Nb, C, HW) block in the input's native dtype
    # w1_ref : (HID, C)  first 1x1 conv weight
    # w2t_ref: (HID, C)  second 1x1 conv weight, pre-transposed (lane-dense)
    x = x_ref[...].astype(jnp.float32)                      # per-tile upcast
    inv_hw = 1.0 / x.shape[-1]

    # --- single-pass per-(n, c) stats: global mean + instance-norm variance ---
    s1 = jnp.sum(x, axis=-1, keepdims=True)                 # (Nb, C, 1)
    s2 = jnp.sum(x * x, axis=-1, keepdims=True)             # (Nb, C, 1)
    mean = s1 * inv_hw
    var = jnp.maximum(s2 * inv_hw - mean * mean, 0.0)       # biased var, clamp>=0
    inv_std = jax.lax.rsqrt(var + EPS)                      # (Nb, C, 1)

    # --- channel-attention MLP on the pooled means, batched over Nb ---
    pooled = mean[..., 0]                                    # (Nb, C)
    h = jax.lax.dot_general(pooled, w1_ref[...],
                            (((1,), (1,)), ((), ())),
                            preferred_element_type=jnp.float32)          # (Nb, HID)
    h = jnp.maximum(h, 0.0)
    logits = jnp.dot(h, w2t_ref[...],
                     preferred_element_type=jnp.float32)                 # (Nb, C)
    # sigmoid (only Nb*C elements, negligible cost; keep exact form)
    mask = 1.0 / (1.0 + jnp.exp(-logits))
    mask = mask[..., None]                                   # (Nb, C, 1)

    # --- blend folded into per-channel affine: out = x * a + b ---
    one_m = 1.0 - mask
    a = mask + inv_std * one_m                               # (Nb, C, 1)
    b = -mean * inv_std * one_m                              # (Nb, C, 1)
    o_ref[...] = (x * a + b).astype(o_ref.dtype)


# ----------------------------- wrapper ----------------------------------

def _vmem_capacity_bytes():
    try:
        info = pltpu.get_tpu_info()
        return int(getattr(info, "vmem_capacity_bytes", 64 * 1024 * 1024))
    except Exception:
        return 64 * 1024 * 1024  # v7x per-TensorCore size: safe lower bound


def _pick_batch_block(n, bytes_per_batch, budget_bytes):
    """Largest divisor of n (capped at 16) whose block fits the per-buffer budget."""
    best = 1
    for nb in range(1, min(n, 16) + 1):
        if nb * bytes_per_batch > budget_bytes:
            break
        if n % nb == 0:
            best = nb
    return best


def mam_forward(x_nchw, w1, w2):
    """MAM forward.

    x_nchw: (N, C, H, W), any float dtype (streamed natively; f32 compute inside).
    w1    : (C // r, C)  — Conv2d(dim, dim//r, 1, bias=False).weight squeezed
    w2    : (C, C // r)  — Conv2d(dim//r, dim, 1, bias=False).weight squeezed
    """
    N, C, H, W = x_nchw.shape
    HW = H * W
    HID = w1.shape[0]

    x3 = x_nchw.reshape(N, C, HW)                   # free reshape, native dtype
    w1f = w1.astype(jnp.float32)                    # (HID, C), lane-dense
    w2t = jnp.transpose(w2).astype(jnp.float32)     # (HID, C), lane-dense, one-time

    itemsize = jnp.dtype(x3.dtype).itemsize
    vmem_cap = _vmem_capacity_bytes()

    bytes_per_batch = C * HW * itemsize
    nb = _pick_batch_block(N, bytes_per_batch,
                           budget_bytes=min(8 << 20, vmem_cap // 12))
    grid = (N // nb,)

    block_bytes = nb * bytes_per_batch
    f32_block = nb * C * HW * 4
    w_bytes = 2 * HID * C * 4
    # double-buffered in/out blocks + weights + in-kernel f32 temporaries + slack
    est = 4 * block_bytes + w_bytes + 3 * f32_block + (4 << 20)
    vmem_limit = int(min(int(0.8 * vmem_cap), max(est, 32 << 20)))

    out = pl.pallas_call(
        _mam_kernel,
        out_shape=jax.ShapeDtypeStruct((N, C, HW), x3.dtype),
        grid=grid,
        in_specs=[
            pl.BlockSpec((nb, C, HW), lambda n: (n, 0, 0)),   # batched x block
            pl.BlockSpec((HID, C), lambda n: (0, 0)),         # resident weights
            pl.BlockSpec((HID, C), lambda n: (0, 0)),
        ],
        out_specs=pl.BlockSpec((nb, C, HW), lambda n: (n, 0, 0)),
        compiler_params=pltpu.CompilerParams(
            dimension_semantics=("parallel",),
            vmem_limit_bytes=vmem_limit,
        ),
    )(x3, w1f, w2t)
    return out.reshape(N, C, H, W)


# -------------------------- pure-JAX reference ---------------------------

def mam_ref(x, w1, w2):
    xf = x.astype(jnp.float32)
    pooled = jnp.mean(xf, axis=(2, 3))                           # (N, C)
    h = jax.nn.relu(pooled @ w1.astype(jnp.float32).T)           # (N, HID)
    mask = jax.nn.sigmoid(h @ w2.astype(jnp.float32).T)[:, :, None, None]
    mean = jnp.mean(xf, axis=(2, 3), keepdims=True)
    var = jnp.mean((xf - mean) ** 2, axis=(2, 3), keepdims=True)  # biased, like IN
    xn = (xf - mean) / jnp.sqrt(var + EPS)
    return xf * mask + xn * (1.0 - mask)


if __name__ == "__main__":
    key = jax.random.PRNGKey(0)
    N, dim, H, W = 2, 256, 16, 16           # C on sublanes, HW=256 lane-dense
    r = 16
    hid = dim // r                           # 16

    kx, k1, k2 = jax.random.split(key, 3)
    x = jax.random.normal(kx, (N, dim, H, W), jnp.float32)
    # 1x1 conv weights (bias=False), stored as plain matrices:
    #   conv1: (dim//r, dim)    conv2: (dim, dim//r)
    w1 = jax.random.normal(k1, (hid, dim), jnp.float32) * 0.1
    w2 = jax.random.normal(k2, (dim, hid), jnp.float32) * 0.1

    out = mam_forward(x, w1, w2)
    out = jax.block_until_ready(out)

    ref = mam_ref(x, w1, w2)
    assert out.shape == (N, dim, H, W), out.shape
    err = float(jnp.max(jnp.abs(out.astype(jnp.float32) - ref)))
    assert err < 1e-3, err

    print("KERNEL_OK")
</pallas_src>

<mosaic_0001>
module attributes {stable_mosaic.version = 11 : i64} {
  func.func @_mam_kernel(%arg0: i32, %arg1: memref<2x256x256xf32, #tpu.memory_space<vmem>>, %arg2: memref<16x256xf32, #tpu.memory_space<vmem>>, %arg3: memref<16x256xf32, #tpu.memory_space<vmem>>, %arg4: memref<2x256x256xf32, #tpu.memory_space<vmem>>) attributes {dimension_semantics = [#tpu.dimension_semantics<parallel>], iteration_bounds = array<i64: 1>, scalar_prefetch = 0 : i64, scratch_operands = 0 : i64, tpu.core_type = #tpu.core_type<tc>, window_params = [{transform_indices = @transform_0, window_bounds = array<i64: 2, 256, 256>}, {pipeline_mode = #tpu.pipeline_mode<synchronous>, transform_indices = @transform_1, window_bounds = array<i64: 16, 256>}, {pipeline_mode = #tpu.pipeline_mode<synchronous>, transform_indices = @transform_2, window_bounds = array<i64: 16, 256>}, {transform_indices = @transform_3, window_bounds = array<i64: 2, 256, 256>}]} {
    %c0 = arith.constant 0 : index
    %c0_0 = arith.constant 0 : index
    %c0_1 = arith.constant 0 : index
    %0 = vector.load %arg1[%c0, %c0_0, %c0_1] : memref<2x256x256xf32, #tpu.memory_space<vmem>>, vector<2x256x256xf32>
    %cst = arith.constant dense<0.000000e+00> : vector<2x256xf32>
    %1 = vector.multi_reduction <add>, %0, %cst [2] : vector<2x256x256xf32> to vector<2x256xf32>
    %2 = vector.shape_cast %1 : vector<2x256xf32> to vector<2x256x1xf32>
    %3 = arith.mulf %0, %0 : vector<2x256x256xf32>
    %cst_2 = arith.constant dense<0.000000e+00> : vector<2x256xf32>
    %4 = vector.multi_reduction <add>, %3, %cst_2 [2] : vector<2x256x256xf32> to vector<2x256xf32>
    %5 = vector.shape_cast %4 : vector<2x256xf32> to vector<2x256x1xf32>
    %cst_3 = arith.constant 3.906250e-03 : f32
    %6 = vector.broadcast %cst_3 : f32 to vector<2x256x1xf32>
    %7 = arith.mulf %2, %6 : vector<2x256x1xf32>
    %cst_4 = arith.constant 3.906250e-03 : f32
    %8 = vector.broadcast %cst_4 : f32 to vector<2x256x1xf32>
    %9 = arith.mulf %5, %8 : vector<2x256x1xf32>
    %10 = arith.mulf %7, %7 : vector<2x256x1xf32>
    %11 = arith.subf %9, %10 : vector<2x256x1xf32>
    %cst_5 = arith.constant 0.000000e+00 : f32
    %12 = vector.broadcast %cst_5 : f32 to vector<2x256x1xf32>
    %13 = arith.maximumf %11, %12 : vector<2x256x1xf32>
    %cst_6 = arith.constant 9.99999974E-6 : f32
    %14 = vector.broadcast %cst_6 : f32 to vector<2x256x1xf32>
    %15 = arith.addf %13, %14 : vector<2x256x1xf32>
    %16 = math.rsqrt %15 : vector<2x256x1xf32>
    %17 = vector.shape_cast %7 : vector<2x256x1xf32> to vector<2x256xf32>
    %c0_7 = arith.constant 0 : index
    %c0_8 = arith.constant 0 : index
    %18 = vector.load %arg2[%c0_7, %c0_8] : memref<16x256xf32, #tpu.memory_space<vmem>>, vector<16x256xf32>
    %cst_9 = arith.constant dense<0.000000e+00> : vector<2x16xf32>
    %19 = tpu.matmul %17, %18, %cst_9 {dimension_numbers = #tpu.dot_dimension_numbers<[1], [1], [0], [0], [0, 0, 1, 0], [], []>} : vector<2x256xf32>, vector<16x256xf32>, vector<2x16xf32> -> vector<2x16xf32>
    %cst_10 = arith.constant 0.000000e+00 : f32
    %20 = vector.broadcast %cst_10 : f32 to vector<2x16xf32>
    %21 = arith.maximumf %19, %20 : vector<2x16xf32>
    %c0_11 = arith.constant 0 : index
    %c0_12 = arith.constant 0 : index
    %22 = vector.load %arg3[%c0_11, %c0_12] : memref<16x256xf32, #tpu.memory_space<vmem>>, vector<16x256xf32>
    %cst_13 = arith.constant dense<0.000000e+00> : vector<2x256xf32>
    %23 = tpu.matmul %21, %22, %cst_13 {dimension_numbers = #tpu.dot_dimension_numbers<[1], [0], [0], [1], [0, 0, 1, 1], [], []>} : vector<2x16xf32>, vector<16x256xf32>, vector<2x256xf32> -> vector<2x256xf32>
    %cst_14 = arith.constant 0.000000e+00 : f32
    %24 = vector.broadcast %cst_14 : f32 to vector<2x256xf32>
    %25 = arith.subf %24, %23 : vector<2x256xf32>
    %26 = math.exp %25 : vector<2x256xf32>
    %cst_15 = arith.constant 1.000000e+00 : f32
    %27 = vector.broadcast %cst_15 : f32 to vector<2x256xf32>
    %28 = arith.addf %27, %26 : vector<2x256xf32>
    %cst_16 = arith.constant 1.000000e+00 : f32
    %29 = vector.broadcast %cst_16 : f32 to vector<2x256xf32>
    %30 = arith.divf %29, %28 : vector<2x256xf32>
    %31 = vector.shape_cast %30 : vector<2x256xf32> to vector<2x256x1xf32>
    %cst_17 = arith.constant 1.000000e+00 : f32
    %32 = vector.broadcast %cst_17 : f32 to vector<2x256x1xf32>
    %33 = arith.subf %32, %31 : vector<2x256x1xf32>
    %34 = arith.mulf %16, %33 : vector<2x256x1xf32>
    %35 = arith.addf %31, %34 : vector<2x256x1xf32>
    %cst_18 = arith.constant 0.000000e+00 : f32
    %36 = vector.broadcast %cst_18 : f32 to vector<2x256x1xf32>
    %37 = arith.subf %36, %7 : vector<2x256x1xf32>
    %38 = arith.mulf %37, %16 : vector<2x256x1xf32>
    %39 = arith.mulf %38, %33 : vector<2x256x1xf32>
    %40 = vector.broadcast %35 : vector<2x256x1xf32> to vector<2x256x256xf32>
    %41 = arith.mulf %0, %40 : vector<2x256x256xf32>
    %42 = vector.broadcast %39 : vector<2x256x1xf32> to vector<2x256x256xf32>
    %43 = arith.addf %41, %42 : vector<2x256x256xf32>
    %c0_19 = arith.constant 0 : index
    %c0_20 = arith.constant 0 : index
    %c0_21 = arith.constant 0 : index
    %44 = vector.load %arg4[%c0_19, %c0_20, %c0_21] : memref<2x256x256xf32, #tpu.memory_space<vmem>>, vector<2x256x256xf32>
    tpu.vector_store %arg4[%c0_19, %c0_20, %c0_21], %43 {strides = array<i32>} : memref<2x256x256xf32, #tpu.memory_space<vmem>>, vector<2x256x256xf32>,
    return
  }
  func.func @transform_0(%arg0: i32) -> (i32, i32, i32) {
    %c0_i32 = arith.constant 0 : i32
    %c0_i32_0 = arith.constant 0 : i32
    %c0_i32_1 = arith.constant 0 : i32
    return %arg0, %c0_i32, %c0_i32_0 : i32, i32, i32
  }
  func.func @transform_1(%arg0: i32) -> (i32, i32) {
    %c0_i32 = arith.constant 0 : i32
    %c0_i32_0 = arith.constant 0 : i32
    %c0_i32_1 = arith.constant 0 : i32
    return %c0_i32, %c0_i32_0 : i32, i32
  }
  func.func @transform_2(%arg0: i32) -> (i32, i32) {
    %c0_i32 = arith.constant 0 : i32
    %c0_i32_0 = arith.constant 0 : i32
    %c0_i32_1 = arith.constant 0 : i32
    return %c0_i32, %c0_i32_0 : i32, i32
  }
  func.func @transform_3(%arg0: i32) -> (i32, i32, i32) {
    %c0_i32 = arith.constant 0 : i32
    %c0_i32_0 = arith.constant 0 : i32
    %c0_i32_1 = arith.constant 0 : i32
    return %arg0, %c0_i32, %c0_i32_0 : i32, i32, i32
  }
}

</mosaic_0001>

<bundles_post_ra>
// kernel: tpu_custom_call.1
= control target key start
LH: loop header
LB: loop body
LE: loop exit
PB: predicated region body
PF: predicated region fallthrough
CT: control target
= control target key end

     0   :  { %8 = vsyncpa [#allocation3], 0  ;;  %s5186_s0 = inlined_call_operand.hbm [shape: f32[2,256,256], index: 0, kind: input, shape index: {}]   ;;  %s5187_s1 = inlined_call_operand.hbm [shape: f32[16,256], index: 1, kind: input, shape index: {}]   ;;  %s5188_s2 = inlined_call_operand.hbm [shape: f32[16,256], index: 2, kind: input, shape index: {}]   ;;  %s5189_s3 = inlined_call_operand.hbm [shape: f32[2,256,256], index: 3, kind: output, shape index: {}]  }
   0x1   :  { %9 = vsyncpa [#allocation6], 0 }
   0x2   :  { %10 = vsyncpa [#allocation4], 0  ;;  %s3153_s12 = smov [#allocation5]   ;;  %s3154_s14 = smov [#allocation2]  }
   0x3   :  { %s28_s13 = sshll.u32 %s3153_s12, 4  ;;  %s16_s15 = sshll.u32 %s3154_s14, 4  ;;  %s29_s13 = int_to_ptr.vmem [resolvable:$true] %s28_s13  ;;  %s17_s15 = int_to_ptr.vmem [resolvable:$true] %s16_s15 }
   0x4   :  { %s3075_s16 = scalar_lea.vmem %s29_s13, 512  ;;  %p3080_p1 = scmp.lt.s32.totalorder %s29_s13, %s29_s13 }
   0x5   :  { %p3076_p0 = scmp.ne.s32.totalorder %s29_s13, %s3075_s16  ;;  %p3081_p2 = scmp.lt.s32.totalorder %s3075_s16, %s3075_s16 }
   0x7   :  { %p3082_p3 = por %p3081_p2, %p3080_p1 }
   0x9   :  { %p3083_p4 = pnand %p3082_p3, %p3076_p0 }
   0xb   :  { %3086 = shalt.err (!%p3083_p4)
}
   0xc   :  { %s3155_s17 = smov 256   ;;  %s3156_s18 = smov 16  }
   0xd   :  { %34 = dma.hbm_to_vmem [thread:$0]  %s5187_s1, 512, %s29_s13, [#allocation6], %s3155_s17, %s3155_s17, %s3156_s18  }
   0xe   :  { %s3095_s21 = scalar_lea.vmem %s17_s15, 16384  ;;  %p3100_p6 = scmp.lt.s32.totalorder %s17_s15, %s17_s15 }
   0xf   :  { %p3096_p5 = scmp.ne.s32.totalorder %s17_s15, %s3095_s21  ;;  %p3101_p7 = scmp.lt.s32.totalorder %s3095_s21, %s3095_s21 }
  0x11   :  { %p3102_p8 = por %p3101_p7, %p3100_p6 }
  0x13   :  { %p3103_p9 = pnand %p3102_p8, %p3096_p5 }
  0x15   :  { %3106 = shalt.err (!%p3103_p9)
}
  0x16   :  { %22 = dma.hbm_to_vmem [thread:$0]  %s5186_s0, 16384, %s17_s15, [#allocation3], %s3155_s17, %s3155_s17, %s3156_s18  }
  0x17   :  { %s3157_s24 = smov [#allocation7]  }
  0x18   :  { %s40_s25 = sshll.u32 %s3157_s24, 4  ;;  %s41_s25 = int_to_ptr.vmem [resolvable:$true] %s40_s25 }
  0x19   :  { %s3115_s26 = scalar_lea.vmem %s41_s25, 512  ;;  %p3120_p11 = scmp.lt.s32.totalorder %s41_s25, %s41_s25 }
  0x1a   :  { %p3116_p10 = scmp.ne.s32.totalorder %s41_s25, %s3115_s26  ;;  %p3121_p12 = scmp.lt.s32.totalorder %s3115_s26, %s3115_s26 }
  0x1c   :  { %p3122_p13 = por %p3121_p12, %p3120_p11 }
  0x1e   :  { %p3123_p0 = pnand %p3122_p13, %p3116_p10 }
  0x20   :  { %3126 = shalt.err (!%p3123_p0)
}
  0x21   :  { %46 = dma.hbm_to_vmem [thread:$0]  %s5188_s2, 512, %s41_s25, [#allocation6], %s3155_s17, %s3155_s17, %s3156_s18  }
  0x22   :  { %3147 = dma.done.wait [#allocation3], 16384  }
  0x23   :  { %3148 = vsyncadd [#allocation3], 4294950912 }
  0x24   :  { %3149 = dma.done.wait [#allocation6], 1024  }
  0x25   :  { %3150 = vsyncadd [#allocation6], 4294966272  ;;  %v152_v0 = vld [vmem:[#allocation2 + $0x300] sm:$0xff]  ;;  %v153_v1 = vld [vmem:[#allocation2 + $0x308] sm:$0xff]  ;;  %vm1223_vm0 = vcmask 130112   ;;  %vm1230_vm1 = vcmask 195712  }
  0x26   :  { %v3198_v2 = vld [vmem:[#allocation2 + $0x100] sm:$0xff]  ;;  %v328_v3 = vadd.f32 %v153_v1, %v152_v0  ;;  %v3200_v4 = vld [vmem:[#allocation2 + $0x108] sm:$0xff]  ;;  %v154_v5 = vld [vmem:[#allocation2 + $0x310] sm:$0xff]  ;;  %vm1237_vm2 = vcmask 261312   ;;  %vm1244_vm3 = vcmask 326912   ;;  %vm1251_vm4 = vcmask 392512  }
  0x27   :  { %v155_v6 = vld [vmem:[#allocation2 + $0x318] sm:$0xff]  ;;  %v232_v7 = vadd.f32 %v3200_v4, %v3198_v2  ;;  %v3204_v8 = vld [vmem:[#allocation2 + $0x110] sm:$0xff]  ;;  %v3214_v14 = vld [vmem:[#allocation2] sm:$0xff]  ;;  %vm1258_vm5 = vcmask 458112   ;;  %vm1265_vm6 = vcmask 523712   ;;  %vm1272_vm7 = vcmask 589312  }
  0x28   :  { %v3206_v9 = vld [vmem:[#allocation2 + $0x118] sm:$0xff]  ;;  %329 = vadd.xlane.f32.xlu1 %v328_v3  ;;  %v331_v10 = vadd.f32 %v155_v6, %v154_v5  ;;  %v3210_v12 = vld [vmem:[#allocation2 + $0x10] sm:$0xff]  ;;  %v3216_v15 = vld [vmem:[#allocation2 + $0x8] sm:$0xff]  ;;  %vm1279_vm8 = vcmask 654912   ;;  %vm1286_vm9 = vcmask 720512   ;;  %vm1293_vm10 = vcmask 786112  }
  0x29   :  { %233 = vadd.xlane.f32.xlu0 %v232_v7  ;;  %v235_v11 = vadd.f32 %v3206_v9, %v3204_v8  ;;  %v3212_v13 = vld [vmem:[#allocation2 + $0x18] sm:$0xff]  ;;  %v184_v17 = vadd.f32 %v3216_v15, %v3214_v14  ;;  %v3222_v18 = vld [vmem:[#allocation2 + $0x200] sm:$0xff]  ;;  %v3224_v19 = vld [vmem:[#allocation2 + $0x208] sm:$0xff]  ;;  %vm1300_vm11 = vcmask 851712   ;;  %vm1307_vm12 = vcmask 917312   ;;  %s3159_s0 = smov [#allocation8]  }
  0x2a   :  { %v187_v16 = vadd.f32 %v3212_v13, %v3210_v12  ;;  %5368 = vst [vmem:[#allocation12_spill] sm:$0xff] %v3222_v18  ;;  %5369 = vst [vmem:[#allocation13_spill] sm:$0xff] %v3224_v19  ;;  %v3226_v20 = vld [vmem:[#allocation2 + $0x120] sm:$0xff]  ;;  %v3228_v21 = vld [vmem:[#allocation2 + $0x128] sm:$0xff]  ;;  %v280_v22 = vadd.f32 %v3224_v19, %v3222_v18  ;;  %vm1314_vm13 = vcmask 982912   ;;  %vm1321_vm14 = vcmask 1048512  }
  0x2b   :  { %v238_v23 = vadd.f32 %v3228_v21, %v3226_v20  ;;  %v156_v24 = vld [vmem:[#allocation2 + $0x320] sm:$0xff]  ;;  %v157_v25 = vld [vmem:[#allocation2 + $0x328] sm:$0xff]  ;;  %v3234_v26 = vld [vmem:[#allocation2 + $0x210] sm:$0xff]  ;;  %vm1560_vm15 = vcmask 1041409   ;;  %s2768_s2 = sshll.u32 %s3159_s0, 4  ;;  %s2769_s2 = int_to_ptr.vmem [resolvable:$true] %s2768_s2 }
  0x2c   :  { %332 = vadd.xlane.f32.xlu1 %v331_v10  ;;  %5370 = vst [vmem:[#allocation14_spill] sm:$0xff] %v3234_v26  ;;  %v3236_v27 = vld [vmem:[#allocation2 + $0x218] sm:$0xff]  ;;  %v334_v28 = vadd.f32 %v157_v25, %v156_v24  ;;  %v3240_v30 = vld [vmem:[#allocation2 + $0x130] sm:$0xff]  ;;  %v3244_v32 = vld [vmem:[#allocation2 + $0x20] sm:$0xff]  ;;  %s3127_s28 = scalar_lea.vmem %s2769_s2, 16384  ;;  %p3132_p2 = scmp.lt.s32.totalorder %s2769_s2, %s2769_s2 }
  0x2d   :  { %236 = vadd.xlane.f32.xlu0 %v235_v11  ;;  %5371 = vst [vmem:[#allocation15_spill] sm:$0xff] %v3236_v27  ;;  %v283_v29 = vadd.f32 %v3236_v27, %v3234_v26  ;;  %v3242_v31 = vld [vmem:[#allocation2 + $0x138] sm:$0xff]  ;;  %v3246_v33 = vld [vmem:[#allocation2 + $0x28] sm:$0xff]  ;;  %v158_v36 = vld [vmem:[#allocation2 + $0x330] sm:$0xff]  ;;  %p3128_p1 = scmp.ne.s32.totalorder %s2769_s2, %s3127_s28  ;;  %p3133_p3 = scmp.lt.s32.totalorder %s3127_s28, %s3127_s28 }
  0x2e   :  { %v241_v34 = vadd.f32 %v3242_v31, %v3240_v30  ;;  %v190_v35 = vadd.f32 %v3246_v33, %v3244_v32  ;;  %v159_v37 = vld [vmem:[#allocation2 + $0x338] sm:$0xff]  ;;  %v3252_v38 = vld [vmem:[#allocation2 + $0x220] sm:$0xff]  ;;  %v3254_v39 = vld [vmem:[#allocation2 + $0x228] sm:$0xff] }
  0x2f   :  { %5372 = vst [vmem:[#allocation16_spill] sm:$0xff] %v3252_v38  ;;  %5373 = vst [vmem:[#allocation17_spill] sm:$0xff] %v3254_v39  ;;  %v337_v40 = vadd.f32 %v159_v37, %v158_v36  ;;  %v286_v41 = vadd.f32 %v3254_v39, %v3252_v38  ;;  %v3258_v42 = vld [vmem:[#allocation2 + $0x140] sm:$0xff]  ;;  %v3260_v43 = vld [vmem:[#allocation2 + $0x148] sm:$0xff]  ;;  %p3134_p4 = por %p3133_p3, %p3132_p2 }
  0x30   :  { %188 = vadd.xlane.f32.xlu1 %v187_v16  ;;  %v3262_v44 = vld [vmem:[#allocation2 + $0x30] sm:$0xff]  ;;  %v3264_v45 = vld [vmem:[#allocation2 + $0x38] sm:$0xff]  ;;  %v244_v46 = vadd.f32 %v3260_v43, %v3258_v42  ;;  %v160_v48 = vld [vmem:[#allocation2 + $0x340] sm:$0xff] }
  0x31   :  { %185 = vadd.xlane.f32.xlu0 %v184_v17  ;;  %v193_v47 = vadd.f32 %v3264_v45, %v3262_v44  ;;  %v161_v49 = vld [vmem:[#allocation2 + $0x348] sm:$0xff]  ;;  %v3270_v50 = vld [vmem:[#allocation2 + $0x230] sm:$0xff]  ;;  %v3272_v51 = vld [vmem:[#allocation2 + $0x238] sm:$0xff]  ;;  %p3135_p5 = pnand %p3134_p4, %p3128_p1 }
  0x32   :  { %5374 = vst [vmem:[#allocation18_spill] sm:$0xff] %v3270_v50  ;;  %5375 = vst [vmem:[#allocation19_spill] sm:$0xff] %v3272_v51  ;;  %v340_v52 = vadd.f32 %v161_v49, %v160_v48  ;;  %v289_v53 = vadd.f32 %v3272_v51, %v3270_v50  ;;  %v3276_v54 = vld [vmem:[#allocation2 + $0x150] sm:$0xff]  ;;  %v3278_v55 = vld [vmem:[#allocation2 + $0x158] sm:$0xff] }
  0x33   :  { %v3280_v56 = vld [vmem:[#allocation2 + $0x40] sm:$0xff]  ;;  %v3282_v57 = vld [vmem:[#allocation2 + $0x48] sm:$0xff]  ;;  %v247_v58 = vadd.f32 %v3278_v55, %v3276_v54  ;;  %v162_v60 = vld [vmem:[#allocation2 + $0x350] sm:$0xff] }
  0x34   :  { %281 = vadd.xlane.f32.xlu1 %v280_v22  ;;  %v196_v59 = vadd.f32 %v3282_v57, %v3280_v56  ;;  %v163_v61 = vld [vmem:[#allocation2 + $0x358] sm:$0xff]  ;;  %v3288_v62 = vld [vmem:[#allocation2 + $0x240] sm:$0xff]  ;;  %v3290_v63 = vld [vmem:[#allocation2 + $0x248] sm:$0xff] }
  0x35   :  { %239 = vadd.xlane.f32.xlu0 %v238_v23  ;;  %5376 = vst [vmem:[#allocation20_spill] sm:$0xff] %v3288_v62  ;;  %5377 = vst [vmem:[#allocation21_spill] sm:$0xff] %v3290_v63  ;;  %v343_v0 = vadd.f32 %v163_v61, %v162_v60  ;;  %v292_v1 = vadd.f32 %v3290_v63, %v3288_v62  ;;  %v3294_v3 = vld [vmem:[#allocation2 + $0x160] sm:$0xff]  ;;  %v3296_v5 = vld [vmem:[#allocation2 + $0x168] sm:$0xff] }
  0x36   :  { %v3298_v6 = vld [vmem:[#allocation2 + $0x50] sm:$0xff]  ;;  %v3300_v7 = vld [vmem:[#allocation2 + $0x58] sm:$0xff]  ;;  %v250_v10 = vadd.f32 %v3296_v5, %v3294_v3  ;;  %v164_v16 = vld [vmem:[#allocation2 + $0x360] sm:$0xff] }
  0x37   :  { %v199_v11 = vadd.f32 %v3300_v7, %v3298_v6  ;;  %v165_v17 = vld [vmem:[#allocation2 + $0x368] sm:$0xff]  ;;  %v3306_v22 = vld [vmem:[#allocation2 + $0x250] sm:$0xff]  ;;  %v3308_v23 = vld [vmem:[#allocation2 + $0x258] sm:$0xff] }
  0x38   :  { %335 = vadd.xlane.f32.xlu1 %v334_v28  ;;  %5378 = vst [vmem:[#allocation22_spill] sm:$0xff] %v3306_v22  ;;  %5379 = vst [vmem:[#allocation23_spill] sm:$0xff] %v3308_v23  ;;  %v346_v24 = vadd.f32 %v165_v17, %v164_v16  ;;  %v295_v25 = vadd.f32 %v3308_v23, %v3306_v22  ;;  %v3312_v28 = vld [vmem:[#allocation2 + $0x170] sm:$0xff]  ;;  %v3412_v63 = vld [vmem:[#allocation2 + $0xa0] sm:$0xff] }
  0x39   :  { %284 = vadd.xlane.f32.xlu0 %v283_v29  ;;  %v3314_v29 = vld [vmem:[#allocation2 + $0x178] sm:$0xff]  ;;  %v3414_v62 = vld [vmem:[#allocation2 + $0xa8] sm:$0xff]  ;;  %v3436_v39 = vld [vmem:[#allocation2 + $0xb0] sm:$0xff] }
  0x3a   :  { %v253_v36 = vadd.f32 %v3314_v29, %v3312_v28  ;;  %v3434_v22 = vld [vmem:[#allocation2 + $0x1c8] sm:$0xff]  ;;  %v3438_v38 = vld [vmem:[#allocation2 + $0xb8] sm:$0xff]  ;;  %v3460_v19 = vld [vmem:[#allocation2 + $0xc0] sm:$0xff] }
  0x3b   :  { %5404 = vst [vmem:[#allocation48_spill] sm:$0xff] %v3434_v22  ;;  %v3458_v50 = vld [vmem:[#allocation2 + $0x1d8] sm:$0xff]  ;;  %v3462_v18 = vld [vmem:[#allocation2 + $0xc8] sm:$0xff] }
  0x3c   :  { %242 = vadd.xlane.f32.xlu1 %v241_v34  ;;  %v3316_v34 = vld [vmem:[#allocation2 + $0x60] sm:$0xff]  ;;  %5410 = vst [vmem:[#allocation54_spill] sm:$0xff] %v3458_v50  ;;  %v3482_v26 = vld [vmem:[#allocation2 + $0x1e8] sm:$0xff] }
  0x3d   :  { %191 = vadd.xlane.f32.xlu0 %v190_v35  ;;  %v3318_v35 = vld [vmem:[#allocation2 + $0x68] sm:$0xff]  ;;  %5416 = vst [vmem:[#allocation60_spill] sm:$0xff] %v3482_v26 }
  0x3e   :  { %v202_v37 = vadd.f32 %v3318_v35, %v3316_v34 }
  0x40   :  { %338 = vadd.xlane.f32.xlu1 %v337_v40  ;;  %v3324_v40 = vld [vmem:[#allocation2 + $0x370] sm:$0xff] }
  0x41   :  { %287 = vadd.xlane.f32.xlu0 %v286_v41  ;;  %5380 = vst [vmem:[#allocation24_spill] sm:$0xff] %v3324_v40  ;;  %v3326_v41 = vld [vmem:[#allocation2 + $0x378] sm:$0xff] }
  0x42   :  { %5381 = vst [vmem:[#allocation25_spill] sm:$0xff] %v3326_v41  ;;  %v349_v48 = vadd.f32 %v3326_v41, %v3324_v40  ;;  %v3386_v40 = vld [vmem:[#allocation2 + $0x1a8] sm:$0xff] }
  0x43   :  { %5393 = vst [vmem:[#allocation37_spill] sm:$0xff] %v3386_v40 }
  0x44   :  { %245 = vadd.xlane.f32.xlu1 %v244_v46  ;;  %v3328_v46 = vld [vmem:[#allocation2 + $0x260] sm:$0xff] }
  0x45   :  { %194 = vadd.xlane.f32.xlu0 %v193_v47  ;;  %5382 = vst [vmem:[#allocation26_spill] sm:$0xff] %v3328_v46  ;;  %v3330_v47 = vld [vmem:[#allocation2 + $0x268] sm:$0xff] }
  0x46   :  { %5383 = vst [vmem:[#allocation27_spill] sm:$0xff] %v3330_v47  ;;  %v298_v49 = vadd.f32 %v3330_v47, %v3328_v46  ;;  %v3388_v47 = vld [vmem:[#allocation2 + $0x90] sm:$0xff]  ;;  %v3390_v46 = vld [vmem:[#allocation2 + $0x98] sm:$0xff] }
  0x48   :  { %341 = vadd.xlane.f32.xlu1 %v340_v52  ;;  %v3336_v52 = vld [vmem:[#allocation2 + $0x180] sm:$0xff] }
  0x49   :  { %290 = vadd.xlane.f32.xlu0 %v289_v53  ;;  %v3338_v53 = vld [vmem:[#allocation2 + $0x188] sm:$0xff] }
  0x4a   :  { %v256_v60 = vadd.f32 %v3338_v53, %v3336_v52 }
  0x4c   :  { %248 = vadd.xlane.f32.xlu1 %v247_v58  ;;  %v3340_v58 = vld [vmem:[#allocation2 + $0x70] sm:$0xff] }
  0x4d   :  { %197 = vadd.xlane.f32.xlu0 %v196_v59  ;;  %v3342_v59 = vld [vmem:[#allocation2 + $0x78] sm:$0xff] }
  0x4e   :  { %v205_v61 = vadd.f32 %v3342_v59, %v3340_v58 }
  0x50   :  { %344 = vadd.xlane.f32.xlu1 %v343_v0  ;;  %v3348_v0 = vld [vmem:[#allocation2 + $0x380] sm:$0xff] }
  0x51   :  { %293 = vadd.xlane.f32.xlu0 %v292_v1  ;;  %5384 = vst [vmem:[#allocation28_spill] sm:$0xff] %v3348_v0  ;;  %v3350_v1 = vld [vmem:[#allocation2 + $0x388] sm:$0xff] }
  0x52   :  { %5385 = vst [vmem:[#allocation29_spill] sm:$0xff] %v3350_v1  ;;  %v352_v16 = vadd.f32 %v3350_v1, %v3348_v0  ;;  %v3376_v1 = vld [vmem:[#allocation2 + $0x280] sm:$0xff]  ;;  %v3378_v0 = vld [vmem:[#allocation2 + $0x288] sm:$0xff] }
  0x53   :  { %5390 = vst [vmem:[#allocation34_spill] sm:$0xff] %v3376_v1  ;;  %5391 = vst [vmem:[#allocation35_spill] sm:$0xff] %v3378_v0 }
  0x54   :  { %251 = vadd.xlane.f32.xlu1 %v250_v10  ;;  %v3352_v10 = vld [vmem:[#allocation2 + $0x270] sm:$0xff] }
  0x55   :  { %200 = vadd.xlane.f32.xlu0 %v199_v11  ;;  %5386 = vst [vmem:[#allocation30_spill] sm:$0xff] %v3352_v10  ;;  %v3354_v11 = vld [vmem:[#allocation2 + $0x278] sm:$0xff] }
  0x56   :  { %5387 = vst [vmem:[#allocation31_spill] sm:$0xff] %v3354_v11  ;;  %v301_v17 = vadd.f32 %v3354_v11, %v3352_v10  ;;  %v3410_v10 = vld [vmem:[#allocation2 + $0x1b8] sm:$0xff] }
  0x57   :  { %5398 = vst [vmem:[#allocation42_spill] sm:$0xff] %v3410_v10 }
  0x58   :  { %347 = vadd.xlane.f32.xlu1 %v346_v24  ;;  %v3360_v24 = vld [vmem:[#allocation2 + $0x190] sm:$0xff] }
  0x59   :  { %296 = vadd.xlane.f32.xlu0 %v295_v25  ;;  %v3362_v25 = vld [vmem:[#allocation2 + $0x198] sm:$0xff] }
  0x5c   :  { %254 = vadd.xlane.f32.xlu1 %v253_v36  ;;  %v3364_v36 = vld [vmem:[#allocation2 + $0x80] sm:$0xff] }
  0x5d   :  { %203 = vadd.xlane.f32.xlu0 %v202_v37  ;;  %v3366_v37 = vld [vmem:[#allocation2 + $0x88] sm:$0xff] }
  0x60   :  { %350 = vadd.xlane.f32.xlu1 %v349_v48  ;;  %v259_v48 = vadd.f32 %v3362_v25, %v3360_v24 }
  0x61   :  { %299 = vadd.xlane.f32.xlu0 %v298_v49  ;;  %v208_v49 = vadd.f32 %v3366_v37, %v3364_v36 }
  0x64   :  { %257 = vadd.xlane.f32.xlu1 %v256_v60  ;;  %v3372_v60 = vld [vmem:[#allocation2 + $0x390] sm:$0xff] }
  0x65   :  { %206 = vadd.xlane.f32.xlu0 %v205_v61  ;;  %5388 = vst [vmem:[#allocation32_spill] sm:$0xff] %v3372_v60  ;;  %v3374_v61 = vld [vmem:[#allocation2 + $0x398] sm:$0xff] }
  0x66   :  { %5389 = vst [vmem:[#allocation33_spill] sm:$0xff] %v3374_v61  ;;  %v355_v41 = vadd.f32 %v3374_v61, %v3372_v60  ;;  %v3398_v61 = vld [vmem:[#allocation2 + $0x3a8] sm:$0xff]  ;;  %v3400_v60 = vld [vmem:[#allocation2 + $0x290] sm:$0xff] }
  0x67   :  { %5395 = vst [vmem:[#allocation39_spill] sm:$0xff] %v3398_v61  ;;  %5396 = vst [vmem:[#allocation40_spill] sm:$0xff] %v3400_v60 }
  0x68   :  { %353 = vadd.xlane.f32.xlu1 %v352_v16  ;;  %v304_v16 = vadd.f32 %v3378_v0, %v3376_v1  ;;  %v3402_v0 = vld [vmem:[#allocation2 + $0x298] sm:$0xff] }
  0x69   :  { %302 = vadd.xlane.f32.xlu0 %v301_v17  ;;  %v3384_v17 = vld [vmem:[#allocation2 + $0x1a0] sm:$0xff]  ;;  %5397 = vst [vmem:[#allocation41_spill] sm:$0xff] %v3402_v0 }
  0x6a   :  { %5392 = vst [vmem:[#allocation36_spill] sm:$0xff] %v3384_v17  ;;  %v262_v11 = vadd.f32 %v3386_v40, %v3384_v17  ;;  %v3534_v17 = vld [vmem:[#allocation2 + $0xf8] sm:$0xff] }
  0x6c   :  { %260 = vadd.xlane.f32.xlu1 %v259_v48  ;;  %v211_v48 = vadd.f32 %v3390_v46, %v3388_v47 }
  0x6d   :  { %209 = vadd.xlane.f32.xlu0 %v208_v49  ;;  %v3396_v49 = vld [vmem:[#allocation2 + $0x3a0] sm:$0xff] }
  0x6e   :  { %5394 = vst [vmem:[#allocation38_spill] sm:$0xff] %v3396_v49  ;;  %v358_v1 = vadd.f32 %v3398_v61, %v3396_v49  ;;  %v3422_v61 = vld [vmem:[#allocation2 + $0x3b8] sm:$0xff]  ;;  %v3424_v49 = vld [vmem:[#allocation2 + $0x2a0] sm:$0xff] }
  0x6f   :  { %5400 = vst [vmem:[#allocation44_spill] sm:$0xff] %v3422_v61  ;;  %5401 = vst [vmem:[#allocation45_spill] sm:$0xff] %v3424_v49 }
  0x70   :  { %356 = vadd.xlane.f32.xlu1 %v355_v41  ;;  %v307_v41 = vadd.f32 %v3402_v0, %v3400_v60  ;;  %v3426_v0 = vld [vmem:[#allocation2 + $0x2a8] sm:$0xff] }
  0x71   :  { %305 = vadd.xlane.f32.xlu0 %v304_v16  ;;  %v3408_v16 = vld [vmem:[#allocation2 + $0x1b0] sm:$0xff]  ;;  %5402 = vst [vmem:[#allocation46_spill] sm:$0xff] %v3426_v0 }
  0x72   :  { %v265_v23 = vadd.f32 %v3410_v10, %v3408_v16 }
  0x74   :  { %263 = vadd.xlane.f32.xlu1 %v262_v11  ;;  %v214_v11 = vadd.f32 %v3414_v62, %v3412_v63 }
  0x75   :  { %212 = vadd.xlane.f32.xlu0 %v211_v48  ;;  %v3420_v48 = vld [vmem:[#allocation2 + $0x3b0] sm:$0xff] }
  0x76   :  { %5399 = vst [vmem:[#allocation43_spill] sm:$0xff] %v3420_v48  ;;  %v361_v60 = vadd.f32 %v3422_v61, %v3420_v48  ;;  %v3446_v61 = vld [vmem:[#allocation2 + $0x3c8] sm:$0xff]  ;;  %v3448_v48 = vld [vmem:[#allocation2 + $0x2b0] sm:$0xff] }
  0x77   :  { %5406 = vst [vmem:[#allocation50_spill] sm:$0xff] %v3446_v61  ;;  %5407 = vst [vmem:[#allocation51_spill] sm:$0xff] %v3448_v48 }
  0x78   :  { %359 = vadd.xlane.f32.xlu1 %v358_v1  ;;  %v310_v1 = vadd.f32 %v3426_v0, %v3424_v49  ;;  %v3450_v0 = vld [vmem:[#allocation2 + $0x2b8] sm:$0xff] }
  0x79   :  { %308 = vadd.xlane.f32.xlu0 %v307_v41  ;;  %v3432_v41 = vld [vmem:[#allocation2 + $0x1c0] sm:$0xff]  ;;  %5408 = vst [vmem:[#allocation52_spill] sm:$0xff] %v3450_v0 }
  0x7a   :  { %5403 = vst [vmem:[#allocation47_spill] sm:$0xff] %v3432_v41  ;;  %v268_v51 = vadd.f32 %v3434_v22, %v3432_v41  ;;  %v3484_v22 = vld [vmem:[#allocation2 + $0xd0] sm:$0xff]  ;;  %v3486_v41 = vld [vmem:[#allocation2 + $0xd8] sm:$0xff] }
  0x7c   :  { %266 = vadd.xlane.f32.xlu1 %v265_v23  ;;  %v217_v23 = vadd.f32 %v3438_v38, %v3436_v39 }
  0x7d   :  { %215 = vadd.xlane.f32.xlu0 %v214_v11  ;;  %v3444_v11 = vld [vmem:[#allocation2 + $0x3c0] sm:$0xff] }
  0x7e   :  { %5405 = vst [vmem:[#allocation49_spill] sm:$0xff] %v3444_v11  ;;  %v364_v49 = vadd.f32 %v3446_v61, %v3444_v11  ;;  %v3470_v61 = vld [vmem:[#allocation2 + $0x3d8] sm:$0xff]  ;;  %v3472_v11 = vld [vmem:[#allocation2 + $0x2c0] sm:$0xff] }
  0x7f   :  { %5412 = vst [vmem:[#allocation56_spill] sm:$0xff] %v3470_v61  ;;  %5413 = vst [vmem:[#allocation57_spill] sm:$0xff] %v3472_v11 }
  0x80   :  { %362 = vadd.xlane.f32.xlu1 %v361_v60  ;;  %v313_v60 = vadd.f32 %v3450_v0, %v3448_v48  ;;  %v3474_v0 = vld [vmem:[#allocation2 + $0x2c8] sm:$0xff] }
  0x81   :  { %311 = vadd.xlane.f32.xlu0 %v310_v1  ;;  %v3456_v1 = vld [vmem:[#allocation2 + $0x1d0] sm:$0xff]  ;;  %5414 = vst [vmem:[#allocation58_spill] sm:$0xff] %v3474_v0 }
  0x82   :  { %5409 = vst [vmem:[#allocation53_spill] sm:$0xff] %v3456_v1  ;;  %v271_v27 = vadd.f32 %v3458_v50, %v3456_v1  ;;  %v3510_v1 = vld [vmem:[#allocation2 + $0xe8] sm:$0xff] }
  0x84   :  { %269 = vadd.xlane.f32.xlu1 %v268_v51  ;;  %v220_v51 = vadd.f32 %v3462_v18, %v3460_v19 }
  0x85   :  { %218 = vadd.xlane.f32.xlu0 %v217_v23  ;;  %v3468_v23 = vld [vmem:[#allocation2 + $0x3d0] sm:$0xff] }
  0x86   :  { %5411 = vst [vmem:[#allocation55_spill] sm:$0xff] %v3468_v23  ;;  %v367_v48 = vadd.f32 %v3470_v61, %v3468_v23  ;;  %v3494_v61 = vld [vmem:[#allocation2 + $0x3e8] sm:$0xff]  ;;  %v3496_v23 = vld [vmem:[#allocation2 + $0x2d0] sm:$0xff] }
  0x87   :  { %5418 = vst [vmem:[#allocation62_spill] sm:$0xff] %v3494_v61  ;;  %5419 = vst [vmem:[#allocation63_spill] sm:$0xff] %v3496_v23 }
  0x88   :  { %365 = vadd.xlane.f32.xlu1 %v364_v49  ;;  %v316_v49 = vadd.f32 %v3474_v0, %v3472_v11  ;;  %v3498_v0 = vld [vmem:[#allocation2 + $0x2d8] sm:$0xff] }
  0x89   :  { %314 = vadd.xlane.f32.xlu0 %v313_v60  ;;  %v3480_v60 = vld [vmem:[#allocation2 + $0x1e0] sm:$0xff]  ;;  %5420 = vst [vmem:[#allocation64_spill] sm:$0xff] %v3498_v0 }
  0x8a   :  { %5415 = vst [vmem:[#allocation59_spill] sm:$0xff] %v3480_v60  ;;  %v274_v50 = vadd.f32 %v3482_v26, %v3480_v60  ;;  %v3506_v26 = vld [vmem:[#allocation2 + $0x1f8] sm:$0xff]  ;;  %v3508_v60 = vld [vmem:[#allocation2 + $0xe0] sm:$0xff] }
  0x8b   :  { %5422 = vst [vmem:[#allocation66_spill] sm:$0xff] %v3506_v26 }
  0x8c   :  { %272 = vadd.xlane.f32.xlu1 %v271_v27  ;;  %v223_v27 = vadd.f32 %v3486_v41, %v3484_v22 }
  0x8d   :  { %221 = vadd.xlane.f32.xlu0 %v220_v51  ;;  %v3492_v51 = vld [vmem:[#allocation2 + $0x3e0] sm:$0xff] }
  0x8e   :  { %5417 = vst [vmem:[#allocation61_spill] sm:$0xff] %v3492_v51  ;;  %v370_v11 = vadd.f32 %v3494_v61, %v3492_v51  ;;  %v3518_v61 = vld [vmem:[#allocation2 + $0x3f8] sm:$0xff]  ;;  %v3520_v51 = vld [vmem:[#allocation2 + $0x2e0] sm:$0xff] }
  0x8f   :  { %5424 = vst [vmem:[#allocation68_spill] sm:$0xff] %v3518_v61  ;;  %5425 = vst [vmem:[#allocation69_spill] sm:$0xff] %v3520_v51 }
  0x90   :  { %368 = vadd.xlane.f32.xlu1 %v367_v48  ;;  %v319_v48 = vadd.f32 %v3498_v0, %v3496_v23  ;;  %v3522_v0 = vld [vmem:[#allocation2 + $0x2e8] sm:$0xff] }
  0x91   :  { %317 = vadd.xlane.f32.xlu0 %v316_v49  ;;  %v3504_v49 = vld [vmem:[#allocation2 + $0x1f0] sm:$0xff]  ;;  %5426 = vst [vmem:[#allocation70_spill] sm:$0xff] %v3522_v0 }
  0x92   :  { %5421 = vst [vmem:[#allocation65_spill] sm:$0xff] %v3504_v49  ;;  %v277_v40 = vadd.f32 %v3506_v26, %v3504_v49  ;;  %v3530_v26 = vld [vmem:[#allocation2 + $0x2f8] sm:$0xff]  ;;  %v3532_v49 = vld [vmem:[#allocation2 + $0xf0] sm:$0xff] }
  0x93   :  { %5427 = vst [vmem:[#allocation71_spill] sm:$0xff] %v3530_v26 }
  0x94   :  { %275 = vadd.xlane.f32.xlu1 %v274_v50  ;;  %v226_v50 = vadd.f32 %v3510_v1, %v3508_v60 }
  0x95   :  { %224 = vadd.xlane.f32.xlu0 %v223_v27  ;;  %v3516_v27 = vld [vmem:[#allocation2 + $0x3f0] sm:$0xff] }
  0x96   :  { %5423 = vst [vmem:[#allocation67_spill] sm:$0xff] %v3516_v27  ;;  %v373_v23 = vadd.f32 %v3518_v61, %v3516_v27  ;;  %v229_v61 = vadd.f32 %v3534_v17, %v3532_v49  ;;  %v376_v27 = vmul.f32 %v3214_v14, %v3214_v14 }
  0x98   :  { %371 = vadd.xlane.f32.xlu1 %v370_v11  ;;  %v322_v11 = vadd.f32 %v3522_v0, %v3520_v51  ;;  %v377_v0 = vmul.f32 %v3216_v15, %v3216_v15  ;;  %v382_v51 = vmul.f32 %v3262_v44, %v3262_v44  ;;  %v386_v15 = vmul.f32 %v3298_v6, %v3298_v6 }
  0x99   :  { %320 = vadd.xlane.f32.xlu0 %v319_v48  ;;  %v3528_v48 = vld [vmem:[#allocation2 + $0x2f0] sm:$0xff]  ;;  %v391_v6 = vmul.f32 %v3342_v59, %v3342_v59 }
  0x9a   :  { %v325_v10 = vadd.f32 %v3530_v26, %v3528_v48  ;;  %v381_v26 = vmul.f32 %v3246_v33, %v3246_v33  ;;  %v390_v33 = vmul.f32 %v3340_v58, %v3340_v58 }
  0x9c   :  { %278 = vadd.xlane.f32.xlu1 %v277_v40  ;;  %v378_v40 = vmul.f32 %v3210_v12, %v3210_v12  ;;  %v383_v12 = vmul.f32 %v3264_v45, %v3264_v45  ;;  %v384_v45 = vmul.f32 %v3280_v56, %v3280_v56  ;;  %v389_v56 = vmul.f32 %v3318_v35, %v3318_v35 }
  0x9d   :  { %227 = vadd.xlane.f32.xlu0 %v226_v50  ;;  %v379_v50 = vmul.f32 %v3212_v13, %v3212_v13  ;;  %v504_v13 = vadd.f32 %v377_v0, %v376_v27  ;;  %v385_v0 = vmul.f32 %v3282_v57, %v3282_v57  ;;  %v1146_v57 = vld [vmem:[#allocation5 + $0x10] sm:$0xff]  ;;  %v525_v58 = vadd.f32 %v391_v6, %v390_v33 }
  0x9e   :  { %v513_v14 = vadd.f32 %v383_v12, %v382_v51  ;;  %v1147_v51 = vld [vmem:[#allocation5 + $0x18] sm:$0xff] }
  0x9f   :  { %1593 = vmatprep.subr.mxu0 %v1147_v51 }
  0xa0   :  { %374 = vadd.xlane.f32.xlu1 %v373_v23  ;;  %v507_v23 = vadd.f32 %v379_v50, %v378_v40  ;;  %1594 = vmatpush1.xpose.msra.mxu0 %v1146_v57  ;;  %v394_v50 = vmul.f32 %v3388_v47, %v3388_v47  ;;  %v398_v47 = vmul.f32 %v3436_v39, %v3436_v39 }
  0xa1   :  { %323 = vadd.xlane.f32.xlu0 %v322_v11  ;;  %v380_v11 = vmul.f32 %v3244_v32, %v3244_v32  ;;  %v1212_v32 = vlaneseq  ;;  %v403_v57 = vmul.f32 %v3486_v41, %v3486_v41 }
  0xa3   :  { %v510_v44 = vadd.f32 %v381_v26, %v380_v11  ;;  %v388_v26 = vmul.f32 %v3316_v34, %v3316_v34  ;;  %v3572_v27 = vand.u32 127, %v1212_v32  ;;  %v3574_v40 = vshrl.u32 %v1212_v32, 7 }
  0xa4   :  { %326 = vadd.xlane.f32.xlu1 %v325_v10  ;;  %v387_v10 = vmul.f32 %v3300_v7, %v3300_v7  ;;  %v516_v7 = vadd.f32 %v385_v0, %v384_v45  ;;  %v395_v34 = vmul.f32 %v3390_v46, %v3390_v46  ;;  %v393_v11 = vmul.f32 %v3366_v37, %v3366_v37 }
  0xa5   :  { %230 = vadd.xlane.f32.xlu0 %v229_v61  ;;  %v1218_v59 = vadd.s32 4294967288, %v3572_v27  ;;  %v522_v12 = vadd.f32 %v389_v56, %v388_v26  ;;  %v399_v46 = vmul.f32 %v3438_v38, %v3438_v38  ;;  %v1225_v51 = vadd.s32 4294967280, %v3572_v27 }
  0xa6   :  { %v519_v61 = vadd.f32 %v387_v10, %v386_v15  ;;  %v396_v10 = vmul.f32 %v3412_v63, %v3412_v63  ;;  %v531_v39 = vadd.f32 %v395_v34, %v394_v50  ;;  %v402_v56 = vmul.f32 %v3484_v22, %v3484_v22 }
  0xa7   :  { %v3600_v45 = vsub.s32 %v1218_v59, %v3574_v40  ;;  %v537_v33 = vadd.f32 %v399_v46, %v398_v47  ;;  %v400_v34 = vmul.f32 %v3460_v19, %v3460_v19 }
  0xa8   :  { %508 = vadd.xlane.f32.xlu1 %v507_v23  ;;  %v1145_v23 = vld [vmem:[#allocation5 + $0x8] sm:$0xff]  ;;  %v543_v19 = vadd.f32 %v403_v57, %v402_v56 }
  0xa9   :  { %505 = vadd.xlane.f32.xlu0 %v504_v13  ;;  %v392_v13 = vmul.f32 %v3364_v36, %v3364_v36  ;;  %1595 = vmatprep.subr.mxu0 %v1145_v23  ;;  %v3595_v36 = vsub.s32 %v3572_v27, %v3574_v40  ;;  %v401_v23 = vmul.f32 %v3462_v18, %v3462_v18 }
  0xaa   :  { %v406_v18 = vmul.f32 %v3532_v49, %v3532_v49 }
  0xab   :  { %v528_v32 = vadd.f32 %v393_v11, %v392_v13  ;;  %v3632_v11 = vsub.s32 %v1225_v51, %v3574_v40 }
  0xac   :  { %514 = vadd.xlane.f32.xlu1 %v513_v14  ;;  %v1144_v14 = vld [vmem:[#allocation5] sm:$0xff] }
  0xad   :  { %511 = vadd.xlane.f32.xlu0 %v510_v44  ;;  %1596 = vmatpush1.xpose.msra.mxu0 %v1144_v14  ;;  %v397_v44 = vmul.f32 %v3414_v62, %v3414_v62 }
  0xaf   :  { %v534_v6 = vadd.f32 %v397_v44, %v396_v10  ;;  %v540_v10 = vadd.f32 %v401_v23, %v400_v34  ;;  %v404_v44 = vmul.f32 %v3508_v60, %v3508_v60  ;;  %v408_v60 = vmul.f32 %v3198_v2, %v3198_v2 }
  0xb0   :  { %520 = vadd.xlane.f32.xlu1 %v519_v61  ;;  %v414_v34 = vmul.f32 %v3240_v30, %v3240_v30  ;;  %v415_v23 = vmul.f32 %v3242_v31, %v3242_v31 }
  0xb1   :  { %517 = vadd.xlane.f32.xlu0 %v516_v7  ;;  %v330_v35 = vpop.xlane.xlu1 %329 }
  0xb2   :  { %v234_v15 = vpop.xlane.xlu0 %233  ;;  %v3597_v37 = vmul.f32 0.00390625, %v330_v35 }
  0xb3   :  { %v3602_v0 = vmul.f32 0.00390625, %v234_v15  ;;  %v407_v15 = vmul.f32 %v3534_v17, %v3534_v17  ;;  %v410_v17 = vmul.f32 %v3204_v8, %v3204_v8 }
  0xb4   :  { %5428 = vst [vmem:[#allocation72_spill] sm:$0xff] %v3597_v37  ;;  %526 = vadd.xlane.f32.xlu1 %v525_v58  ;;  %v1484_v7 = vrot.slane %v3597_v37, %v3595_v36 }
  0xb5   :  { %5429 = vst [vmem:[#allocation73_spill] sm:$0xff] %v3602_v0  ;;  %523 = vadd.xlane.f32.xlu0 %v522_v12  ;;  %v333_v38 = vpop.xlane.xlu1 %332  ;;  %v1326_v58 = vrot.slane %v3602_v0, %v3595_v36  ;;  %v5496_v0 = vld [vmem:[#allocation25_spill] sm:$0xff] }
  0xb6   :  { %v3604_v63 = vmul.f32 0.00390625, %v333_v38  ;;  %v237_v62 = vpop.xlane.xlu0 %236 }
  0xb7   :  { %v3606_v61 = vmul.f32 0.00390625, %v237_v62 }
  0xb8   :  { %5430 = vst [vmem:[#allocation74_spill] sm:$0xff] %v3604_v63  ;;  %v1488_v26 = vrot.slane %v3604_v63, %v3600_v45  ;;  %532 = vadd.xlane.f32.xlu1 %v531_v39  ;;  %v405_v39 = vmul.f32 %v3510_v1, %v3510_v1  ;;  %v409_v1 = vmul.f32 %v3200_v4, %v3200_v4 }
  0xb9   :  { %5431 = vst [vmem:[#allocation75_spill] sm:$0xff] %v3606_v61  ;;  %v1330_v59 = vrot.slane %v3606_v61, %v3600_v45  ;;  %529 = vadd.xlane.f32.xlu0 %v528_v32  ;;  %v189_v50 = vpop.xlane.xlu1 %188  ;;  %v1232_v32 = vadd.s32 4294967272, %v3572_v27 }
  0xba   :  { %v1489_v35 = vsel %vm1223_vm0, %v1488_v26, %v1484_v7  ;;  %v3626_v22 = vmul.f32 0.00390625, %v189_v50  ;;  %v186_v12 = vpop.xlane.xlu0 %185  ;;  %v546_v8 = vadd.f32 %v405_v39, %v404_v44  ;;  %v552_v50 = vadd.f32 %v409_v1, %v408_v60 }
  0xbb   :  { %v1331_v41 = vsel %vm1223_vm0, %v1330_v59, %v1326_v58  ;;  %v3629_v13 = vmul.f32 0.00390625, %v186_v12  ;;  %v3668_v2 = vsub.s32 %v1232_v32, %v3574_v40  ;;  %v417_v32 = vmul.f32 %v3260_v43, %v3260_v43 }
  0xbc   :  { %5432 = vst [vmem:[#allocation76_spill] sm:$0xff] %v3626_v22  ;;  %v1222_v14 = vrot.slane %v3626_v22, %v3600_v45  ;;  %538 = vadd.xlane.f32.xlu1 %v537_v33  ;;  %v411_v33 = vmul.f32 %v3206_v9, %v3206_v9  ;;  %v422_v43 = vmul.f32 %v3312_v28, %v3312_v28 }
  0xbd   :  { %5433 = vst [vmem:[#allocation77_spill] sm:$0xff] %v3629_v13  ;;  %v1217_v47 = vrot.slane %v3629_v13, %v3595_v36  ;;  %535 = vadd.xlane.f32.xlu0 %v534_v6  ;;  %v282_v46 = vpop.xlane.xlu1 %281  ;;  %v549_v6 = vadd.f32 %v407_v15, %v406_v18  ;;  %v413_v18 = vmul.f32 %v3228_v21, %v3228_v21  ;;  %v5495_v13 = vld [vmem:[#allocation24_spill] sm:$0xff] }
  0xbe   :  { %v240_v38 = vpop.xlane.xlu0 %239  ;;  %v3658_v51 = vmul.f32 0.00390625, %v282_v46  ;;  %v555_v59 = vadd.f32 %v411_v33, %v410_v17  ;;  %v418_v21 = vmul.f32 %v3276_v54, %v3276_v54  ;;  %v486_v22 = vmul.f32 %v5495_v13, %v5495_v13 }
  0xbf   :  { %v1224_v49 = vsel %vm1223_vm0, %v1222_v14, %v1217_v47  ;;  %v3648_v62 = vmul.f32 0.00390625, %v240_v38  ;;  %v416_v38 = vmul.f32 %v3258_v42, %v3258_v42 }
  0xc0   :  { %544 = vadd.xlane.f32.xlu1 %v543_v19  ;;  %5435 = vst [vmem:[#allocation79_spill] sm:$0xff] %v3658_v51  ;;  %v1405_v12 = vrot.slane %v3658_v51, %v3595_v36  ;;  %v412_v19 = vmul.f32 %v3226_v20, %v3226_v20  ;;  %v561_v20 = vadd.f32 %v415_v23, %v414_v34 }
  0xc1   :  { %5434 = vst [vmem:[#allocation78_spill] sm:$0xff] %v3648_v62  ;;  %v1335_v7 = vrot.slane %v3648_v62, %v3632_v11  ;;  %541 = vadd.xlane.f32.xlu0 %v540_v10  ;;  %v336_v26 = vpop.xlane.xlu1 %335  ;;  %v427_v23 = vmul.f32 %v3362_v25, %v3362_v25 }
  0xc2   :  { %v3662_v56 = vmul.f32 0.00390625, %v336_v26  ;;  %v285_v9 = vpop.xlane.xlu0 %284  ;;  %v558_v39 = vadd.f32 %v413_v18, %v412_v19  ;;  %v424_v19 = vmul.f32 %v3336_v52, %v3336_v52  ;;  %v425_v18 = vmul.f32 %v3338_v53, %v3338_v53 }
  0xc3   :  { %v1336_v57 = vsel %vm1230_vm1, %v1335_v7, %v1331_v41  ;;  %v3665_v58 = vmul.f32 0.00390625, %v285_v9  ;;  %v423_v7 = vmul.f32 %v3314_v29, %v3314_v29  ;;  %v420_v9 = vmul.f32 %v3294_v3, %v3294_v3 }
  0xc4   :  { %5436 = vst [vmem:[#allocation80_spill] sm:$0xff] %v3662_v56  ;;  %v1493_v4 = vrot.slane %v3662_v56, %v3632_v11  ;;  %550 = vadd.xlane.f32.xlu1 %v549_v6  ;;  %v430_v53 = vmul.f32 %v3408_v16, %v3408_v16 }
  0xc5   :  { %5437 = vst [vmem:[#allocation81_spill] sm:$0xff] %v3665_v58  ;;  %v1409_v41 = vrot.slane %v3665_v58, %v3600_v45  ;;  %547 = vadd.xlane.f32.xlu0 %v546_v8  ;;  %v243_v14 = vpop.xlane.xlu1 %242  ;;  %v1239_v45 = vadd.s32 4294967264, %v3572_v27  ;;  %v564_v8 = vadd.f32 %v417_v32, %v416_v38  ;;  %v573_v3 = vadd.f32 %v423_v7, %v422_v43  ;;  %v5448_v32 = vld [vmem:[#allocation37_spill] sm:$0xff] }
  0xc6   :  { %v1494_v15 = vsel %vm1230_vm1, %v1493_v4, %v1489_v35  ;;  %v3685_v30 = vmul.f32 0.00390625, %v243_v14  ;;  %v192_v47 = vpop.xlane.xlu0 %191  ;;  %v419_v35 = vmul.f32 %v3278_v55, %v3278_v55 }
  0xc7   :  { %v1410_v31 = vsel %vm1223_vm0, %v1409_v41, %v1405_v12  ;;  %v3688_v36 = vmul.f32 0.00390625, %v192_v47  ;;  %v3710_v60 = vsub.s32 %v1239_v45, %v3574_v40  ;;  %vm1640_vm0 = vcmask 130048  }
  0xc8   :  { %5438 = vst [vmem:[#allocation82_spill] sm:$0xff] %v3685_v30  ;;  %v1340_v46 = vrot.slane %v3685_v30, %v3668_v2  ;;  %556 = vadd.xlane.f32.xlu1 %v555_v59  ;;  %v567_v42 = vadd.f32 %v419_v35, %v418_v21 }
  0xc9   :  { %5439 = vst [vmem:[#allocation83_spill] sm:$0xff] %v3688_v36  ;;  %v1229_v10 = vrot.slane %v3688_v36, %v3632_v11  ;;  %553 = vadd.xlane.f32.xlu0 %v552_v50  ;;  %v339_v44 = vpop.xlane.xlu1 %338  ;;  %v2936_v36 = vld [vmem:[#allocation2 + $0x348] sm:$0xff] }
  0xca   :  { %v1341_v17 = vsel %vm1237_vm2, %v1340_v46, %v1336_v57  ;;  %v3704_v33 = vmul.f32 0.00390625, %v339_v44  ;;  %v288_v54 = vpop.xlane.xlu0 %287  ;;  %v421_v57 = vmul.f32 %v3296_v5, %v3296_v5  ;;  %v426_v5 = vmul.f32 %v3360_v24, %v3360_v24 }
  0xcb   :  { %v1231_v6 = vsel %vm1230_vm1, %v1229_v10, %v1224_v49  ;;  %v3707_v55 = vmul.f32 0.00390625, %v288_v54  ;;  %v576_v44 = vadd.f32 %v425_v18, %v424_v19  ;;  %v481_v61 = vmul.f32 %v2936_v36, %v2936_v36 }
  0xcc   :  { %5440 = vst [vmem:[#allocation84_spill] sm:$0xff] %v3704_v33  ;;  %v1498_v1 = vrot.slane %v3704_v33, %v3668_v2  ;;  %562 = vadd.xlane.f32.xlu1 %v561_v20  ;;  %v570_v14 = vadd.f32 %v421_v57, %v420_v9  ;;  %v579_v52 = vadd.f32 %v427_v23, %v426_v5  ;;  %v5446_v20 = vld [vmem:[#allocation42_spill] sm:$0xff]  ;;  %v5500_v33 = vld [vmem:[#allocation29_spill] sm:$0xff] }
  0xcd   :  { %5441 = vst [vmem:[#allocation85_spill] sm:$0xff] %v3707_v55  ;;  %v1414_v26 = vrot.slane %v3707_v55, %v3632_v11  ;;  %559 = vadd.xlane.f32.xlu0 %v558_v39  ;;  %v246_v49 = vpop.xlane.xlu1 %245  ;;  %v1246_v11 = vadd.s32 4294967256, %v3572_v27  ;;  %v431_v21 = vmul.f32 %v5446_v20, %v5446_v20  ;;  %v5447_v39 = vld [vmem:[#allocation36_spill] sm:$0xff]  ;;  %v5512_v55 = vld [vmem:[#allocation61_spill] sm:$0xff] }
  0xce   :  { %v1499_v59 = vsel %vm1237_vm2, %v1498_v1, %v1494_v15  ;;  %v3725_v4 = vmul.f32 0.00390625, %v246_v49  ;;  %v195_v28 = vpop.xlane.xlu0 %194  ;;  %v428_v38 = vmul.f32 %v5447_v39, %v5447_v39 }
  0xcf   :  { %v1415_v50 = vsel %vm1230_vm1, %v1414_v26, %v1410_v31  ;;  %v3728_v29 = vmul.f32 0.00390625, %v195_v28  ;;  %v3750_v45 = vsub.s32 %v1246_v11, %v3574_v40  ;;  %v585_v7 = vadd.f32 %v431_v21, %v430_v53  ;;  %v5451_v26 = vld [vmem:[#allocation53_spill] sm:$0xff]  ;;  %v5458_v53 = vld [vmem:[#allocation66_spill] sm:$0xff] }
  0xd0   :  { %5442 = vst [vmem:[#allocation86_spill] sm:$0xff] %v3725_v4  ;;  %v1345_v34 = vrot.slane %v3725_v4, %v3710_v60  ;;  %568 = vadd.xlane.f32.xlu1 %v567_v42  ;;  %v434_v49 = vmul.f32 %v5451_v26, %v5451_v26  ;;  %v2930_v4 = vld [vmem:[#allocation2 + $0x338] sm:$0xff] }
  0xd1   :  { %5443 = vst [vmem:[#allocation87_spill] sm:$0xff] %v3728_v29  ;;  %v1236_v12 = vrot.slane %v3728_v29, %v3668_v2  ;;  %565 = vadd.xlane.f32.xlu0 %v564_v8  ;;  %v342_v41 = vpop.xlane.xlu1 %341  ;;  %v5452_v8 = vld [vmem:[#allocation54_spill] sm:$0xff] }
  0xd2   :  { %v1346_v15 = vsel %vm1244_vm3, %v1345_v34, %v1341_v17  ;;  %v3744_v47 = vmul.f32 0.00390625, %v342_v41  ;;  %v291_v24 = vpop.xlane.xlu0 %290  ;;  %v429_v17 = vmul.f32 %v5448_v32, %v5448_v32  ;;  %v435_v9 = vmul.f32 %v5452_v8, %v5452_v8  ;;  %v5454_v34 = vld [vmem:[#allocation48_spill] sm:$0xff] }
  0xd3   :  { %v1238_v31 = vsel %vm1237_vm2, %v1236_v12, %v1231_v6  ;;  %v3747_v25 = vmul.f32 0.00390625, %v291_v24 }
  0xd4   :  { %5444 = vst [vmem:[#allocation88_spill] sm:$0xff] %v3744_v47  ;;  %v1503_v46 = vrot.slane %v3744_v47, %v3710_v60  ;;  %574 = vadd.xlane.f32.xlu1 %v573_v3  ;;  %v582_v28 = vadd.f32 %v429_v17, %v428_v38  ;;  %v433_v3 = vmul.f32 %v5454_v34, %v5454_v34  ;;  %v5499_v47 = vld [vmem:[#allocation28_spill] sm:$0xff] }
  0xd5   :  { %5445 = vst [vmem:[#allocation89_spill] sm:$0xff] %v3747_v25  ;;  %v1419_v35 = vrot.slane %v3747_v25, %v3668_v2  ;;  %571 = vadd.xlane.f32.xlu0 %v570_v14  ;;  %v249_v10 = vpop.xlane.xlu1 %248  ;;  %v1253_v2 = vadd.s32 4294967248, %v3572_v27  ;;  %v591_v24 = vadd.f32 %v435_v9, %v434_v49  ;;  %v5464_v49 = vld [vmem:[#allocation15_spill] sm:$0xff]  ;;  %v488_v13 = vmul.f32 %v5499_v47, %v5499_v47 }
  0xd6   :  { %v1504_v54 = vsel %vm1244_vm3, %v1503_v46, %v1499_v59  ;;  %v3765_v6 = vmul.f32 0.00390625, %v249_v10  ;;  %v198_v16 = vpop.xlane.xlu0 %197  ;;  %v5457_v46 = vld [vmem:[#allocation65_spill] sm:$0xff] }
  0xd7   :  { %v1420_v1 = vsel %vm1237_vm2, %v1419_v35, %v1415_v50  ;;  %v3768_v42 = vmul.f32 0.00390625, %v198_v16  ;;  %v5453_v50 = vld [vmem:[#allocation47_spill] sm:$0xff]  ;;  %v3790_v19 = vsub.s32 %v1253_v2, %v3574_v40 }
  0xd8   :  { %5449 = vst [vmem:[#allocation42_spill] sm:$0xff] %v3765_v6  ;;  %v1350_v43 = vrot.slane %v3765_v6, %v3750_v45  ;;  %580 = vadd.xlane.f32.xlu1 %v579_v52  ;;  %v432_v11 = vmul.f32 %v5453_v50, %v5453_v50  ;;  %v438_v52 = vmul.f32 %v5457_v46, %v5457_v46  ;;  %v5459_v35 = vld [vmem:[#allocation59_spill] sm:$0xff] }
  0xd9   :  { %5450 = vst [vmem:[#allocation36_spill] sm:$0xff] %v3768_v42  ;;  %v1243_v57 = vrot.slane %v3768_v42, %v3710_v60  ;;  %577 = vadd.xlane.f32.xlu0 %v576_v44  ;;  %v345_v59 = vpop.xlane.xlu1 %344  ;;  %v436_v10 = vmul.f32 %v5459_v35, %v5459_v35  ;;  %v5460_v44 = vld [vmem:[#allocation60_spill] sm:$0xff]  ;;  %v2929_v42 = vld [vmem:[#allocation2 + $0x330] sm:$0xff]  ;;  %v479_v6 = vmul.f32 %v2930_v4, %v2930_v4  ;;  %v1281_v4 = vadd.s32 4294967216, %v3572_v27 }
  0xda   :  { %v1351_v5 = vsel %vm1251_vm4, %v1350_v43, %v1346_v15  ;;  %v3784_v23 = vmul.f32 0.00390625, %v345_v59  ;;  %v294_v12 = vpop.xlane.xlu0 %293  ;;  %v439_v15 = vmul.f32 %v5458_v53, %v5458_v53  ;;  %v588_v21 = vadd.f32 %v433_v3, %v432_v11 }
  0xdb   :  { %v1245_v41 = vsel %vm1244_vm3, %v1243_v57, %v1238_v31  ;;  %v3787_v14 = vmul.f32 0.00390625, %v294_v12  ;;  %v437_v39 = vmul.f32 %v5460_v44, %v5460_v44  ;;  %v5465_v57 = vld [vmem:[#allocation12_spill] sm:$0xff]  ;;  %v3964_v63 = vsub.s32 %v1281_v4, %v3574_v40 }
  0xdc   :  { %5455 = vst [vmem:[#allocation37_spill] sm:$0xff] %v3784_v23  ;;  %v1508_v18 = vrot.slane %v3784_v23, %v3750_v45  ;;  %586 = vadd.xlane.f32.xlu1 %v585_v7  ;;  %v597_v43 = vadd.f32 %v439_v15, %v438_v52  ;;  %v5463_v7 = vld [vmem:[#allocation14_spill] sm:$0xff]  ;;  %v440_v59 = vmul.f32 %v5465_v57, %v5465_v57  ;;  %v5469_v52 = vld [vmem:[#allocation19_spill] sm:$0xff]  ;;  %v5498_v23 = vld [vmem:[#allocation33_spill] sm:$0xff] }
  0xdd   :  { %5456 = vst [vmem:[#allocation53_spill] sm:$0xff] %v3787_v14  ;;  %v1424_v20 = vrot.slane %v3787_v14, %v3710_v60  ;;  %583 = vadd.xlane.f32.xlu0 %v582_v28  ;;  %v252_v31 = vpop.xlane.xlu1 %251  ;;  %v442_v26 = vmul.f32 %v5463_v7, %v5463_v7  ;;  %v5466_v28 = vld [vmem:[#allocation13_spill] sm:$0xff]  ;;  %v447_v53 = vmul.f32 %v5469_v52, %v5469_v52  ;;  %v5504_v14 = vld [vmem:[#allocation38_spill] sm:$0xff] }
  0xde   :  { %v3805_v38 = vsel %vm1251_vm4, %v1508_v18, %v1504_v54  ;;  %v3807_v32 = vmul.f32 0.00390625, %v252_v31  ;;  %v201_v17 = vpop.xlane.xlu0 %200  ;;  %v443_v54 = vmul.f32 %v5464_v49, %v5464_v49  ;;  %v441_v50 = vmul.f32 %v5466_v28, %v5466_v28  ;;  %v5470_v31 = vld [vmem:[#allocation16_spill] sm:$0xff] }
  0xdf   :  { %v1425_v16 = vsel %vm1244_vm3, %v1424_v20, %v1420_v1  ;;  %v3810_v2 = vmul.f32 0.00390625, %v201_v17  ;;  %v594_v1 = vadd.f32 %v437_v39, %v436_v10  ;;  %v5472_v17 = vld [vmem:[#allocation22_spill] sm:$0xff]  ;;  %v5474_v49 = vld [vmem:[#allocation20_spill] sm:$0xff]  ;;  %v491_v36 = vmul.f32 %v5498_v23, %v5498_v23 }
  0xe0   :  { %5461 = vst [vmem:[#allocation54_spill] sm:$0xff] %v3807_v32  ;;  %v1355_v60 = vrot.slane %v3807_v32, %v3790_v19  ;;  %592 = vadd.xlane.f32.xlu1 %v591_v24  ;;  %v603_v18 = vadd.f32 %v443_v54, %v442_v26  ;;  %v5468_v24 = vld [vmem:[#allocation18_spill] sm:$0xff]  ;;  %v600_v20 = vadd.f32 %v441_v50, %v440_v59  ;;  %v5477_v50 = vld [vmem:[#allocation31_spill] sm:$0xff] }
  0xe1   :  { %5462 = vst [vmem:[#allocation47_spill] sm:$0xff] %v3810_v2  ;;  %v1250_v8 = vrot.slane %v3810_v2, %v3750_v45  ;;  %589 = vadd.xlane.f32.xlu0 %v588_v21  ;;  %v3820_v9 = vpop.xlane.xlu1 %347  ;;  %v446_v46 = vmul.f32 %v5468_v24, %v5468_v24  ;;  %v5471_v21 = vld [vmem:[#allocation17_spill] sm:$0xff]  ;;  %v448_v54 = vmul.f32 %v5474_v49, %v5474_v49  ;;  %v5476_v59 = vld [vmem:[#allocation30_spill] sm:$0xff]  ;;  %v2927_v2 = vld [vmem:[#allocation2 + $0x300] sm:$0xff] }
  0xe2   :  { %v3827_v11 = vsel %vm1258_vm5, %v1355_v60, %v1351_v5  ;;  %v297_v34 = vpop.xlane.xlu0 %296  ;;  %v445_v35 = vmul.f32 %v5471_v21, %v5471_v21  ;;  %v5473_v60 = vld [vmem:[#allocation23_spill] sm:$0xff]  ;;  %v454_v28 = vmul.f32 %v5476_v59, %v5476_v59  ;;  %v5485_v59 = vld [vmem:[#allocation52_spill] sm:$0xff] }
  0xe3   :  { %v3830_v3 = vsel %vm1251_vm4, %v1250_v8, %v1245_v41  ;;  %v3832_v12 = vmul.f32 0.00390625, %v297_v34  ;;  %v444_v41 = vmul.f32 %v5470_v31, %v5470_v31  ;;  %v609_v39 = vadd.f32 %v447_v53, %v446_v46  ;;  %v5475_v8 = vld [vmem:[#allocation21_spill] sm:$0xff]  ;;  %v5478_v46 = vld [vmem:[#allocation26_spill] sm:$0xff]  ;;  %v5479_v53 = vld [vmem:[#allocation27_spill] sm:$0xff] }
  0xe4   :  { %598 = vadd.xlane.f32.xlu1 %v597_v43  ;;  %v451_v43 = vmul.f32 %v5473_v60, %v5473_v60  ;;  %v455_v34 = vmul.f32 %v5477_v50, %v5477_v50  ;;  %v452_v52 = vmul.f32 %v5478_v46, %v5478_v46  ;;  %v5482_v60 = vld [vmem:[#allocation34_spill] sm:$0xff] }
  0xe5   :  { %5467 = vst [vmem:[#allocation48_spill] sm:$0xff] %v3832_v12  ;;  %v1429_v15 = vrot.slane %v3832_v12, %v3750_v45  ;;  %595 = vadd.xlane.f32.xlu0 %v594_v1  ;;  %v3840_v5 = vpop.xlane.xlu1 %254  ;;  %v450_v45 = vmul.f32 %v5472_v17, %v5472_v17  ;;  %v606_v26 = vadd.f32 %v445_v35, %v444_v41  ;;  %v5480_v41 = vld [vmem:[#allocation40_spill] sm:$0xff]  ;;  %v5481_v35 = vld [vmem:[#allocation41_spill] sm:$0xff] }
  0xe6   :  { %v3846_v10 = vpop.xlane.xlu0 %203  ;;  %v449_v1 = vmul.f32 %v5475_v8, %v5475_v8  ;;  %v621_v31 = vadd.f32 %v455_v34, %v454_v28  ;;  %v458_v21 = vmul.f32 %v5480_v41, %v5480_v41  ;;  %v463_v28 = vmul.f32 %v5485_v59, %v5485_v59  ;;  %v5488_v41 = vld [vmem:[#allocation63_spill] sm:$0xff] }
  0xe7   :  { %v3849_v44 = vsel %vm1251_vm4, %v1429_v15, %v1425_v16  ;;  %v615_v57 = vadd.f32 %v451_v43, %v450_v45  ;;  %v453_v15 = vmul.f32 %v5479_v53, %v5479_v53  ;;  %v456_v43 = vmul.f32 %v5482_v60, %v5482_v60 }
  0xe8   :  { %604 = vadd.xlane.f32.xlu1 %v603_v18  ;;  %v612_v24 = vadd.f32 %v449_v1, %v448_v54  ;;  %v5484_v1 = vld [vmem:[#allocation51_spill] sm:$0xff]  ;;  %v492_v12 = vmul.f32 %v5504_v14, %v5504_v14 }
  0xe9   :  { %601 = vadd.xlane.f32.xlu0 %v600_v20  ;;  %v3855_v7 = vpop.xlane.xlu1 %350  ;;  %v618_v45 = vadd.f32 %v453_v15, %v452_v52  ;;  %v5487_v52 = vld [vmem:[#allocation46_spill] sm:$0xff] }
  0xea   :  { %v3861_v16 = vpop.xlane.xlu0 %299  ;;  %v461_v53 = vmul.f32 %v5487_v52, %v5487_v52  ;;  %v5493_v52 = vld [vmem:[#allocation69_spill] sm:$0xff] }
  0xec   :  { %610 = vadd.xlane.f32.xlu1 %v609_v39  ;;  %v459_v39 = vmul.f32 %v5481_v35, %v5481_v35  ;;  %v5489_v35 = vld [vmem:[#allocation64_spill] sm:$0xff] }
  0xed   :  { %607 = vadd.xlane.f32.xlu0 %v606_v26  ;;  %v3867_v18 = vpop.xlane.xlu1 %257  ;;  %v5483_v26 = vld [vmem:[#allocation35_spill] sm:$0xff] }
  0xee   :  { %v3873_v20 = vpop.xlane.xlu0 %206  ;;  %v457_v49 = vmul.f32 %v5483_v26, %v5483_v26  ;;  %v627_v8 = vadd.f32 %v459_v39, %v458_v21  ;;  %v466_v21 = vmul.f32 %v5488_v41, %v5488_v41  ;;  %v467_v39 = vmul.f32 %v5489_v35, %v5489_v35  ;;  %v5494_v41 = vld [vmem:[#allocation70_spill] sm:$0xff] }
  0xef   :  { %v469_v35 = vmul.f32 %v5494_v41, %v5494_v41  ;;  %v478_v41 = vmul.f32 %v2929_v42, %v2929_v42  ;;  %v1288_v42 = vadd.s32 4294967208, %v3572_v27 }
  0xf0   :  { %616 = vadd.xlane.f32.xlu1 %v615_v57  ;;  %v462_v57 = vmul.f32 %v5484_v1, %v5484_v1  ;;  %v624_v34 = vadd.f32 %v457_v49, %v456_v43  ;;  %v5490_v43 = vld [vmem:[#allocation57_spill] sm:$0xff]  ;;  %v5491_v49 = vld [vmem:[#allocation58_spill] sm:$0xff] }
  0xf1   :  { %613 = vadd.xlane.f32.xlu0 %v612_v24  ;;  %v3879_v17 = vpop.xlane.xlu1 %353  ;;  %v5486_v24 = vld [vmem:[#allocation45_spill] sm:$0xff]  ;;  %v464_v26 = vmul.f32 %v5490_v43, %v5490_v43  ;;  %v465_v1 = vmul.f32 %v5491_v49, %v5491_v49  ;;  %v3967_v23 = vsub.s32 %v1288_v42, %v3574_v40 }
  0xf2   :  { %v3885_v54 = vpop.xlane.xlu0 %302  ;;  %v460_v46 = vmul.f32 %v5486_v24, %v5486_v24 }
  0xf4   :  { %622 = vadd.xlane.f32.xlu1 %v621_v31  ;;  %v633_v31 = vadd.f32 %v463_v28, %v462_v57  ;;  %v630_v60 = vadd.f32 %v461_v53, %v460_v46  ;;  %v470_v57 = vmul.f32 %v3528_v48, %v3528_v48  ;;  %v5492_v28 = vld [vmem:[#allocation71_spill] sm:$0xff]  ;;  %v636_v46 = vadd.f32 %v465_v1, %v464_v26 }
  0xf5   :  { %619 = vadd.xlane.f32.xlu0 %v618_v45  ;;  %v3891_v50 = vpop.xlane.xlu1 %260  ;;  %v471_v24 = vmul.f32 %v5492_v28, %v5492_v28  ;;  %v468_v53 = vmul.f32 %v5493_v52, %v5493_v52  ;;  %v2926_v48 = vld [vmem:[#allocation2 + $0x318] sm:$0xff]  ;;  %v472_v28 = vmul.f32 %v2927_v2, %v2927_v2 }
  0xf6   :  { %v3897_v15 = vpop.xlane.xlu0 %209  ;;  %v475_v49 = vmul.f32 %v2926_v48, %v2926_v48 }
  0xf7   :  { %v642_v1 = vadd.f32 %v469_v35, %v468_v53  ;;  %v1267_v53 = vadd.s32 4294967232, %v3572_v27  ;;  %v1274_v35 = vadd.s32 4294967224, %v3572_v27 }
  0xf8   :  { %628 = vadd.xlane.f32.xlu1 %v627_v8  ;;  %v639_v8 = vadd.f32 %v467_v39, %v466_v21  ;;  %v2925_v21 = vld [vmem:[#allocation2 + $0x310] sm:$0xff] }
  0xf9   :  { %625 = vadd.xlane.f32.xlu0 %v624_v34  ;;  %v3903_v45 = vpop.xlane.xlu1 %356  ;;  %v474_v39 = vmul.f32 %v2925_v21, %v2925_v21  ;;  %v3958_v56 = vsub.s32 %v1267_v53, %v3574_v40 }
  0xfa   :  { %v3909_v59 = vpop.xlane.xlu0 %305 }
  0xfb   :  { %v651_v48 = vadd.f32 %v475_v49, %v474_v39  ;;  %v2933_v39 = vld [vmem:[#allocation2 + $0x350] sm:$0xff] }
  0xfc   :  { %634 = vadd.xlane.f32.xlu1 %v633_v31  ;;  %v645_v31 = vadd.f32 %v471_v24, %v470_v57  ;;  %v2932_v24 = vld [vmem:[#allocation2 + $0x328] sm:$0xff]  ;;  %v482_v49 = vmul.f32 %v2933_v39, %v2933_v39 }
  0xfd   :  { %631 = vadd.xlane.f32.xlu0 %v630_v60  ;;  %v3915_v34 = vpop.xlane.xlu1 %263  ;;  %v2928_v60 = vld [vmem:[#allocation2 + $0x308] sm:$0xff]  ;;  %v477_v21 = vmul.f32 %v2932_v24, %v2932_v24 }
  0xfe   :  { %v3921_v43 = vpop.xlane.xlu0 %212  ;;  %v473_v32 = vmul.f32 %v2928_v60, %v2928_v60 }
 0x100   :  { %640 = vadd.xlane.f32.xlu1 %v639_v8  ;;  %v2931_v8 = vld [vmem:[#allocation2 + $0x320] sm:$0xff]  ;;  %v648_v60 = vadd.f32 %v473_v32, %v472_v28  ;;  %v2934_v32 = vld [vmem:[#allocation2 + $0x358] sm:$0xff] }
 0x101   :  { %637 = vadd.xlane.f32.xlu0 %v636_v46  ;;  %v3923_v26 = vpop.xlane.xlu1 %359  ;;  %v476_v57 = vmul.f32 %v2931_v8, %v2931_v8  ;;  %v1260_v46 = vadd.s32 4294967240, %v3572_v27  ;;  %v657_v8 = vadd.f32 %v479_v6, %v478_v41  ;;  %v483_v28 = vmul.f32 %v2934_v32, %v2934_v32  ;;  %v2937_v41 = vld [vmem:[#allocation2 + $0x360] sm:$0xff] }
 0x102   :  { %v3925_v52 = vpop.xlane.xlu0 %308  ;;  %v487_v6 = vmul.f32 %v5496_v0, %v5496_v0  ;;  %v1302_v32 = vadd.s32 4294967192, %v3572_v27  ;;  %v489_v0 = vmul.f32 %v5500_v33, %v5500_v33 }
 0x103   :  { %v654_v24 = vadd.f32 %v477_v21, %v476_v57  ;;  %v484_v57 = vmul.f32 %v2937_v41, %v2937_v41  ;;  %v3955_v41 = vsub.s32 %v1260_v46, %v3574_v40 }
 0x104   :  { %646 = vadd.xlane.f32.xlu1 %v645_v31  ;;  %v1295_v31 = vadd.s32 4294967200, %v3572_v27 }
 0x105   :  { %643 = vadd.xlane.f32.xlu0 %v642_v1  ;;  %v3927_v2 = vpop.xlane.xlu1 %266  ;;  %v2935_v1 = vld [vmem:[#allocation2 + $0x340] sm:$0xff] }
 0x106   :  { %v3932_v29 = vpop.xlane.xlu0 %215  ;;  %v480_v62 = vmul.f32 %v2935_v1, %v2935_v1  ;;  %v5497_v1 = vld [vmem:[#allocation32_spill] sm:$0xff]  ;;  %v3970_v33 = vsub.s32 %v1295_v31, %v3574_v40 }
 0x108   :  { %652 = vadd.xlane.f32.xlu1 %v651_v48  ;;  %v2938_v48 = vld [vmem:[#allocation2 + $0x368] sm:$0xff]  ;;  %v660_v46 = vadd.f32 %v481_v61, %v480_v62  ;;  %v3986_v61 = vmul.f32 0.00390625, %v3820_v9 }
 0x109   :  { %649 = vadd.xlane.f32.xlu0 %v648_v60  ;;  %v3937_v30 = vpop.xlane.xlu1 %362  ;;  %v485_v39 = vmul.f32 %v2938_v48, %v2938_v48  ;;  %v490_v60 = vmul.f32 %v5497_v1, %v5497_v1  ;;  %v3961_v48 = vsub.s32 %v1274_v35, %v3574_v40  ;;  %v663_v1 = vadd.f32 %v483_v28, %v482_v49  ;;  %v5502_v28 = vld [vmem:[#allocation43_spill] sm:$0xff]  ;;  %v5508_v9 = vld [vmem:[#allocation49_spill] sm:$0xff] }
 0x10a   :  { %v3943_v21 = vpop.xlane.xlu0 %311  ;;  %v669_v35 = vadd.f32 %v487_v6, %v486_v22  ;;  %v672_v49 = vadd.f32 %v489_v0, %v488_v13  ;;  %v494_v42 = vmul.f32 %v5502_v28, %v5502_v28  ;;  %v5505_v22 = vld [vmem:[#allocation39_spill] sm:$0xff]  ;;  %v1309_v6 = vadd.s32 4294967184, %v3572_v27  ;;  %v5509_v0 = vld [vmem:[#allocation50_spill] sm:$0xff] }
 0x10b   :  { %v666_v37 = vadd.f32 %v485_v39, %v484_v57  ;;  %v675_v4 = vadd.f32 %v491_v36, %v490_v60  ;;  %v493_v62 = vmul.f32 %v5505_v22, %v5505_v22  ;;  %v5506_v57 = vld [vmem:[#allocation55_spill] sm:$0xff]  ;;  %v5507_v36 = vld [vmem:[#allocation56_spill] sm:$0xff]  ;;  %v496_v13 = vmul.f32 %v5508_v9, %v5508_v9 }
 0x10c   :  { %658 = vadd.xlane.f32.xlu1 %v657_v8  ;;  %v3977_v8 = vsub.s32 %v1302_v32, %v3574_v40  ;;  %v498_v39 = vmul.f32 %v5506_v57, %v5506_v57  ;;  %v3994_v32 = vmul.f32 0.00390625, %v3840_v5  ;;  %v499_v14 = vmul.f32 %v5507_v36, %v5507_v36  ;;  %v5511_v57 = vld [vmem:[#allocation68_spill] sm:$0xff] }
 0x10d   :  { %655 = vadd.xlane.f32.xlu0 %v654_v24  ;;  %v3972_v47 = vpop.xlane.xlu1 %269  ;;  %v5503_v24 = vld [vmem:[#allocation44_spill] sm:$0xff]  ;;  %v4005_v28 = vmul.f32 0.00390625, %v3846_v10  ;;  %v503_v36 = vmul.f32 %v5511_v57, %v5511_v57  ;;  %v4017_v9 = vmul.f32 0.00390625, %v3861_v16  ;;  %v5513_v10 = vld [vmem:[#allocation62_spill] sm:$0xff]  ;;  %v1513_v51 = vrot.slane %v3986_v61, %v3790_v19 }
 0x10e   :  { %v3974_v53 = vpop.xlane.xlu0 %218  ;;  %5501 = vst [vmem:[#allocation65_spill] sm:$0xff] %v3977_v8  ;;  %v495_v31 = vmul.f32 %v5503_v24, %v5503_v24  ;;  %v4008_v24 = vmul.f32 0.00390625, %v3855_v7  ;;  %v501_v25 = vmul.f32 %v5513_v10, %v5513_v10  ;;  %v1316_v7 = vadd.s32 4294967176, %v3572_v27 }
 0x10f   :  { %v4027_v8 = vsub.s32 %v1309_v6, %v3574_v40  ;;  %v1360_v16 = vrot.slane %v3994_v32, %v3955_v41  ;;  %v4032_v57 = vmul.f32 0.00390625, %v3867_v18  ;;  %v687_v27 = vadd.f32 %v499_v14, %v498_v39 }
 0x110   :  { %664 = vadd.xlane.f32.xlu1 %v663_v1  ;;  %v497_v1 = vmul.f32 %v5509_v0, %v5509_v0  ;;  %v500_v0 = vmul.f32 %v5512_v55, %v5512_v55  ;;  %v681_v58 = vadd.f32 %v495_v31, %v494_v42  ;;  %v4041_v42 = vmul.f32 0.00390625, %v3873_v20 }
 0x111   :  { %661 = vadd.xlane.f32.xlu0 %v660_v46  ;;  %v3996_v60 = vpop.xlane.xlu1 %365  ;;  %v5510_v46 = vld [vmem:[#allocation67_spill] sm:$0xff]  ;;  %v4050_v18 = vmul.f32 0.00390625, %v3879_v17  ;;  %v4055_v39 = vsub.s32 %v1316_v7, %v3574_v40  ;;  %v1514_v20 = vsel %vm1258_vm5, %v1513_v51, %v3805_v38  ;;  %v4060_v14 = vmul.f32 0.00390625, %v3885_v54 }
 0x112   :  { %v4010_v5 = vpop.xlane.xlu0 %314  ;;  %v502_v22 = vmul.f32 %v5510_v46, %v5510_v46  ;;  %v678_v46 = vadd.f32 %v493_v62, %v492_v12  ;;  %v684_v10 = vadd.f32 %v497_v1, %v496_v13  ;;  %v1518_v12 = vrot.slane %v4008_v24, %v3955_v41 }
 0x113   :  { %v4052_v6 = vadd.f32 %v501_v25, %v500_v0  ;;  %v4063_v13 = vmul.f32 0.00390625, %v3891_v50  ;;  %v1361_v25 = vsel %vm1265_vm6, %v1360_v16, %v3827_v11  ;;  %v1365_v17 = vrot.slane %v4032_v57, %v3958_v56 }
 0x114   :  { %670 = vadd.xlane.f32.xlu1 %v669_v35  ;;  %v1257_v35 = vrot.slane %v4005_v28, %v3790_v19  ;;  %v4045_v62 = vadd.f32 %v503_v36, %v502_v22  ;;  %v4073_v1 = vmul.f32 0.00390625, %v3903_v45  ;;  %v4076_v51 = vmul.f32 0.00390625, %v3909_v59 }
 0x115   :  { %667 = vadd.xlane.f32.xlu0 %v666_v37  ;;  %v4034_v55 = vpop.xlane.xlu1 %272  ;;  %v1434_v37 = vrot.slane %v4017_v9, %v3790_v19  ;;  %v4066_v19 = vmul.f32 0.00390625, %v3897_v15  ;;  %v1519_v50 = vsel %vm1265_vm6, %v1518_v12, %v1514_v20  ;;  %v1264_v15 = vrot.slane %v4041_v42, %v3955_v41 }
 0x116   :  { %v4043_v31 = vpop.xlane.xlu0 %221  ;;  %v1259_v54 = vsel %vm1258_vm5, %v1257_v35, %v3830_v3  ;;  %v4084_v11 = vmul.f32 0.00390625, %v3915_v34  ;;  %v1523_v59 = vrot.slane %v4050_v18, %v3958_v56  ;;  %v4096_v3 = vmul.f32 0.00390625, %v3923_v26 }
 0x117   :  { %5514 = vst [vmem:[#allocation66_spill] sm:$0xff] %v4066_v19  ;;  %v1435_v45 = vsel %vm1258_vm5, %v1434_v37, %v3849_v44  ;;  %v1439_v22 = vrot.slane %v4060_v14, %v3955_v41  ;;  %v1370_v34 = vrot.slane %v4063_v13, %v3961_v48  ;;  %v1271_v36 = vrot.slane %v4066_v19, %v3958_v56 }
 0x118   :  { %676 = vadd.xlane.f32.xlu1 %v675_v4  ;;  %5515 = vst [vmem:[#allocation59_spill] sm:$0xff] %v4084_v11  ;;  %v4105_v44 = vmul.f32 0.00390625, %v3925_v52  ;;  %v1366_v0 = vsel %vm1272_vm7, %v1365_v17, %v1361_v25  ;;  %v1444_v26 = vrot.slane %v4076_v51, %v3958_v56  ;;  %v4113_v41 = vmul.f32 0.00390625, %v3927_v2 }
 0x119   :  { %673 = vadd.xlane.f32.xlu0 %v672_v49  ;;  %v369_v38 = vpop.xlane.xlu1 %368  ;;  %v4093_v49 = vmul.f32 0.00390625, %v3921_v43  ;;  %v1528_v43 = vrot.slane %v4073_v1, %v3961_v48  ;;  %v1266_v16 = vsel %vm1265_vm6, %v1264_v15, %v1259_v54  ;;  %v1375_v52 = vrot.slane %v4084_v11, %v3964_v63 }
 0x11a   :  { %v4086_v4 = vpop.xlane.xlu0 %317  ;;  %5517 = vst [vmem:[#allocation14_spill] sm:$0xff] %v4113_v41  ;;  %v4122_v35 = vmul.f32 0.00390625, %v3937_v30  ;;  %v1524_v56 = vsel %vm1272_vm7, %v1523_v59, %v1519_v50  ;;  %v4130_v37 = vmul.f32 0.00390625, %v3943_v21  ;;  %v1440_v20 = vsel %vm1265_vm6, %v1439_v22, %v1435_v45 }
 0x11b   :  { %5516 = vst [vmem:[#allocation60_spill] sm:$0xff] %v4093_v49  ;;  %v1278_v2 = vrot.slane %v4093_v49, %v3961_v48  ;;  %v1273_v30 = vsel %vm1272_vm7, %v1271_v36, %v1266_v16  ;;  %v1449_v25 = vrot.slane %v4105_v44, %v3961_v48  ;;  %v1529_v17 = vsel %vm1279_vm8, %v1528_v43, %v1524_v56 }
 0x11c   :  { %682 = vadd.xlane.f32.xlu1 %v681_v58  ;;  %v4119_v58 = vmul.f32 0.00390625, %v3932_v29  ;;  %v1371_v29 = vsel %vm1279_vm8, %v1370_v34, %v1366_v0  ;;  %v1445_v54 = vsel %vm1272_vm7, %v1444_v26, %v1440_v20  ;;  %v1380_v50 = vrot.slane %v4113_v41, %v3967_v23 }
 0x11d   :  { %679 = vadd.xlane.f32.xlu0 %v678_v46  ;;  %v276_v7 = vpop.xlane.xlu1 %275  ;;  %v1533_v46 = vrot.slane %v4096_v3, %v3964_v63  ;;  %v4142_v21 = vmul.f32 0.00390625, %v3972_v47  ;;  %v1376_v45 = vsel %vm1286_vm9, %v1375_v52, %v1371_v29  ;;  %v1538_v48 = vrot.slane %v4122_v35, %v3967_v23 }
 0x11e   :  { %5518 = vst [vmem:[#allocation15_spill] sm:$0xff] %v4119_v58  ;;  %v225_v12 = vpop.xlane.xlu0 %224  ;;  %v1285_v59 = vrot.slane %v4119_v58, %v3964_v63  ;;  %v1280_v34 = vsel %vm1279_vm8, %v1278_v2, %v1273_v30  ;;  %v4157_v36 = vmul.f32 0.00390625, %v4010_v5  ;;  %v1450_v0 = vsel %vm1279_vm8, %v1449_v25, %v1445_v54  ;;  %v5524_v30 = vld [vmem:[#allocation65_spill] sm:$0xff] }
 0x11f   :  { %v1534_v47 = vsel %vm1286_vm9, %v1533_v46, %v1529_v17  ;;  %v4161_v43 = vmul.f32 0.00390625, %v3974_v53  ;;  %v4166_v26 = vmul.f32 0.00390625, %v369_v38  ;;  %v1381_v16 = vsel %vm1293_vm10, %v1380_v50, %v1376_v45 }
 0x120   :  { %688 = vadd.xlane.f32.xlu1 %v687_v27  ;;  %v4150_v27 = vmul.f32 0.00390625, %v3996_v60  ;;  %v4164_v60 = vmul.f32 0.00390625, %v4034_v55  ;;  %v4172_v5 = vmul.f32 0.00390625, %v276_v7  ;;  %v1287_v55 = vsel %vm1286_vm9, %v1285_v59, %v1280_v34 }
 0x121   :  { %685 = vadd.xlane.f32.xlu0 %v684_v10  ;;  %v372_v15 = vpop.xlane.xlu1 %371  ;;  %v1454_v10 = vrot.slane %v4130_v37, %v3964_v63  ;;  %5519 = vst [vmem:[#allocation12_spill] sm:$0xff] %v4161_v43  ;;  %v1385_v63 = vrot.slane %v4142_v21, %v3970_v33  ;;  %v1539_v38 = vsel %vm1293_vm10, %v1538_v48, %v1534_v47  ;;  %v4187_v20 = vmul.f32 0.00390625, %v4043_v31 }
 0x122   :  { %v321_v22 = vpop.xlane.xlu0 %320  ;;  %5520 = vst [vmem:[#allocation13_spill] sm:$0xff] %v4164_v60  ;;  %v4174_v52 = vmul.f32 0.00390625, %v372_v15  ;;  %v1459_v7 = vrot.slane %v4157_v36, %v3967_v23  ;;  %v1292_v29 = vrot.slane %v4161_v43, %v3967_v23  ;;  %v1390_v25 = vrot.slane %v4164_v60, %v5524_v30  ;;  %v5555_v43 = vld [vmem:[#allocation53_spill] sm:$0xff] }
 0x123   :  { %v1455_v46 = vsel %vm1286_vm9, %v1454_v10, %v1450_v0  ;;  %5523 = vst [vmem:[#allocation16_spill] sm:$0xff] %v4187_v20  ;;  %v1548_v17 = vrot.slane %v4166_v26, %v5524_v30  ;;  %v4198_v54 = vmul.f32 0.00390625, %v321_v22  ;;  %v1395_v50 = vrot.slane %v4172_v5, %v4027_v8 }
 0x124   :  { %694 = vadd.xlane.f32.xlu1 %v4045_v62  ;;  %5521 = vst [vmem:[#allocation18_spill] sm:$0xff] %v4174_v52  ;;  %v1543_v62 = vrot.slane %v4150_v27, %v3970_v33  ;;  %v4202_v15 = vmul.f32 0.00390625, %v225_v12  ;;  %v1553_v31 = vrot.slane %v4174_v52, %v4027_v8  ;;  %v1386_v45 = vsel %vm1300_vm11, %v1385_v63, %v1381_v16 }
 0x125   :  { %691 = vadd.xlane.f32.xlu0 %v4052_v6  ;;  %v279_v53 = vpop.xlane.xlu1 %278  ;;  %v4190_v6 = vmul.f32 0.00390625, %v4086_v4  ;;  %v1460_v47 = vsel %vm1293_vm10, %v1459_v7, %v1455_v46  ;;  %v1299_v12 = vrot.slane %v4187_v20, %v3970_v33  ;;  %v1469_v16 = vrot.slane %v4198_v54, %v5524_v30 }
 0x126   :  { %v4181_v56 = vmul.f32 0.00390625, %v279_v53  ;;  %v228_v2 = vpop.xlane.xlu0 %227  ;;  %5525 = vst [vmem:[#allocation17_spill] sm:$0xff] %v4202_v15  ;;  %v1544_v34 = vsel %vm1300_vm11, %v1543_v62, %v1539_v38  ;;  %v1391_v53 = vsel %vm1307_vm12, %v1390_v25, %v1386_v45  ;;  %v1306_v62 = vrot.slane %v4202_v15, %v5524_v30  ;;  %v5554_v15 = vld [vmem:[#allocation48_spill] sm:$0xff] }
 0x127   :  { %v4209_v59 = vmul.f32 0.00390625, %v228_v2  ;;  %v1464_v10 = vrot.slane %v4190_v6, %v3970_v33  ;;  %v1549_v38 = vsel %vm1307_vm12, %v1548_v17, %v1544_v34  ;;  %v1396_v33 = vsel %vm1314_vm13, %v1395_v50, %v1391_v53 }
 0x128   :  { %5522 = vst [vmem:[#allocation19_spill] sm:$0xff] %v4181_v56  ;;  %v1400_v23 = vrot.slane %v4181_v56, %v4055_v39  ;;  %v1554_v7 = vsel %vm1314_vm13, %v1553_v31, %v1549_v38  ;;  %v1294_v30 = vsel %vm1293_vm10, %v1292_v29, %v1287_v55 }
 0x129   :  { %v375_v4 = vpop.xlane.xlu1 %374  ;;  %5526 = vst [vmem:[#allocation22_spill] sm:$0xff] %v4209_v59  ;;  %v1465_v50 = vsel %vm1300_vm11, %v1464_v10, %v1460_v47 }
 0x12a   :  { %v4211_v48 = vmul.f32 0.00390625, %v375_v4  ;;  %v324_v22 = vpop.xlane.xlu0 %323  ;;  %v1313_v4 = vrot.slane %v4209_v59, %v4027_v8  ;;  %v1401_v25 = vsel %vm1321_vm14, %v1400_v23, %v1396_v33  ;;  %v1470_v53 = vsel %vm1307_vm12, %v1469_v16, %v1465_v50 }
 0x12b   :  { %v4219_v0 = vmul.f32 0.00390625, %v324_v22 }
 0x12c   :  { %5527 = vst [vmem:[#allocation23_spill] sm:$0xff] %v4211_v48  ;;  %v1558_v63 = vrot.slane %v4211_v48, %v4055_v39 }
 0x12d   :  { %v1474_v2 = vrot.slane %v4219_v0, %v4027_v8  ;;  %v327_v46 = vpop.xlane.xlu1 %326  ;;  %v1301_v8 = vsel %vm1300_vm11, %v1299_v12, %v1294_v30 }
 0x12e   :  { %v4235_v22 = vmul.f32 0.00390625, %v327_v46  ;;  %v231_v48 = vpop.xlane.xlu0 %230  ;;  %v1559_v17 = vsel %vm1321_vm14, %v1558_v63, %v1554_v7  ;;  %v1308_v55 = vsel %vm1307_vm12, %v1306_v62, %v1301_v8  ;;  %v1639_v46 = vld [vmem:[#allocation7 + $0x18] sm:$0xff] }
 0x12f   :  { %v4240_v45 = vmul.f32 0.00390625, %v231_v48  ;;  %v1562_v34 = vsel %vm1560_vm15, %v1559_v17, %v1401_v25  ;;  %v1475_v29 = vsel %vm1314_vm13, %v1474_v2, %v1470_v53  ;;  %v1315_v47 = vsel %vm1314_vm13, %v1313_v4, %v1308_v55  ;;  %1672 = vmatprep.subr.mxu1 %v1639_v46 }
 0x130   :  { %v1479_v31 = vrot.slane %v4235_v22, %v4055_v39  ;;  %1629 = vmatprep.mubr.f32.mxu0 %v1562_v34 }
 0x131   :  { %5528 = vst [vmem:[#allocation20_spill] sm:$0xff] %v4240_v45  ;;  %v1320_v23 = vrot.slane %v4240_v45, %v4055_v39  ;;  %v4250_v63 = vpop.xlane.xlu1 %508 }
 0x132   :  { %v4254_v48 = vpop.xlane.xlu0 %505  ;;  %v1480_v10 = vsel %vm1321_vm14, %v1479_v31, %v1475_v29 }
 0x133   :  { %v1322_v38 = vsel %vm1321_vm14, %v1320_v23, %v1315_v47 }
 0x134   :  { %v1561_v12 = vsel %vm1560_vm15, %v1480_v10, %v1322_v38 }
 0x135   :  { %1630 = vmatmul.mubr.f32.vlgmr.msra.gmra.mxu0 %v1561_v12  ;;  %v4260_v16 = vpop.xlane.xlu1 %514 }
 0x136   :  { %v4262_v39 = vpop.xlane.xlu0 %511 }
 0x139   :  { %v4264_v62 = vpop.xlane.xlu1 %520 }
 0x13a   :  { %v4266_v2 = vpop.xlane.xlu0 %517 }
 0x13d   :  { %v4268_v33 = vpop.xlane.xlu1 %526 }
 0x13e   :  { %v4270_v7 = vpop.xlane.xlu0 %523 }
 0x141   :  { %v4272_v4 = vpop.xlane.xlu1 %532 }
 0x142   :  { %v4274_v25 = vpop.xlane.xlu0 %529 }
 0x143   :  { %5529 = vst [vmem:[#allocation21_spill] sm:$0xff] %v4274_v25 }
 0x145   :  { %v4276_v17 = vpop.xlane.xlu1 %538 }
 0x146   :  { %5530 = vst [vmem:[#allocation30_spill] sm:$0xff] %v4276_v17  ;;  %v4278_v30 = vpop.xlane.xlu0 %535  ;;  %v5553_v17 = vld [vmem:[#allocation85_spill] sm:$0xff] }
 0x147   :  { %5531 = vst [vmem:[#allocation31_spill] sm:$0xff] %v4278_v30 }
 0x149   :  { %v4280_v34 = vpop.xlane.xlu1 %544 }
 0x14a   :  { %5532 = vst [vmem:[#allocation26_spill] sm:$0xff] %v4280_v34  ;;  %v4282_v50 = vpop.xlane.xlu0 %541 }
 0x14b   :  { %5533 = vst [vmem:[#allocation27_spill] sm:$0xff] %v4282_v50 }
 0x14d   :  { %v4284_v31 = vpop.xlane.xlu1 %550 }
 0x14e   :  { %5534 = vst [vmem:[#allocation40_spill] sm:$0xff] %v4284_v31  ;;  %v4286_v8 = vpop.xlane.xlu0 %547 }
 0x14f   :  { %5535 = vst [vmem:[#allocation41_spill] sm:$0xff] %v4286_v8  ;;  %v5550_v8 = vld [vmem:[#allocation81_spill] sm:$0xff] }
 0x151   :  { %v4288_v53 = vpop.xlane.xlu1 %556 }
 0x152   :  { %5536 = vst [vmem:[#allocation34_spill] sm:$0xff] %v4288_v53  ;;  %v4290_v23 = vpop.xlane.xlu0 %553 }
 0x153   :  { %5537 = vst [vmem:[#allocation35_spill] sm:$0xff] %v4290_v23 }
 0x155   :  { %v4292_v55 = vpop.xlane.xlu1 %562 }
 0x156   :  { %5538 = vst [vmem:[#allocation51_spill] sm:$0xff] %v4292_v55  ;;  %v4294_v29 = vpop.xlane.xlu0 %559 }
 0x157   :  { %5539 = vst [vmem:[#allocation52_spill] sm:$0xff] %v4294_v29 }
 0x159   :  { %v4296_v47 = vpop.xlane.xlu1 %568 }
 0x15a   :  { %5540 = vst [vmem:[#allocation45_spill] sm:$0xff] %v4296_v47  ;;  %v4298_v10 = vpop.xlane.xlu0 %565  ;;  %v852_v47 = vmul.f32 %v4142_v21, %v4142_v21 }
 0x15b   :  { %5541 = vst [vmem:[#allocation46_spill] sm:$0xff] %v4298_v10 }
 0x15d   :  { %v4300_v38 = vpop.xlane.xlu1 %574 }
 0x15e   :  { %5542 = vst [vmem:[#allocation63_spill] sm:$0xff] %v4300_v38  ;;  %v4302_v12 = vpop.xlane.xlu0 %571 }
 0x15f   :  { %5543 = vst [vmem:[#allocation64_spill] sm:$0xff] %v4302_v12 }
 0x161   :  { %v4304_v46 = vpop.xlane.xlu1 %580 }
 0x162   :  { %5544 = vst [vmem:[#allocation57_spill] sm:$0xff] %v4304_v46  ;;  %v4306_v52 = vpop.xlane.xlu0 %577  ;;  %v854_v46 = vmul.f32 %v4172_v5, %v4172_v5 }
 0x163   :  { %5545 = vst [vmem:[#allocation58_spill] sm:$0xff] %v4306_v52 }
 0x165   :  { %v4308_v56 = vpop.xlane.xlu1 %586 }
 0x166   :  { %5546 = vst [vmem:[#allocation71_spill] sm:$0xff] %v4308_v56  ;;  %v4310_v60 = vpop.xlane.xlu0 %583 }
 0x167   :  { %5547 = vst [vmem:[#allocation69_spill] sm:$0xff] %v4310_v60 }
 0x169   :  { %v4312_v11 = vpop.xlane.xlu1 %592 }
 0x16a   :  { %5548 = vst [vmem:[#allocation70_spill] sm:$0xff] %v4312_v11  ;;  %v590_v41 = vpop.xlane.xlu0 %589  ;;  %v857_v11 = vmul.f32 %v5550_v8, %v5550_v8 }
 0x16b   :  { %v788_v29 = vmul.f32 0.00390625, %v590_v41  ;;  %v5551_v41 = vld [vmem:[#allocation79_spill] sm:$0xff] }
 0x16d   :  { %v916_v10 = vsub.f32 %v788_v29, %v852_v47  ;;  %v4316_v55 = vpop.xlane.xlu1 %598  ;;  %v856_v29 = vmul.f32 %v5551_v41, %v5551_v41 }
 0x16e   :  { %5549 = vst [vmem:[#allocation24_spill] sm:$0xff] %v4316_v55  ;;  %v596_v38 = vpop.xlane.xlu0 %595 }
 0x16f   :  { %v980_v12 = vmax.f32 %v916_v10, 0.0  ;;  %v790_v52 = vmul.f32 0.00390625, %v596_v38  ;;  %v1638_v10 = vld [vmem:[#allocation7 + $0x10] sm:$0xff]  ;;  %v1637_v38 = vld [vmem:[#allocation7 + $0x8] sm:$0xff] }
 0x170   :  { %1673 = vmatpush1.msra.mxu1 %v1638_v10 }
 0x171   :  { %v1044_v23 = vadd.f32 1e-05, %v980_v12  ;;  %v918_v56 = vsub.f32 %v790_v52, %v854_v46  ;;  %v605_v53 = vpop.xlane.xlu1 %604  ;;  %1674 = vmatprep.subr.mxu1 %v1637_v38  ;;  %v861_v38 = vmul.f32 %v5554_v15, %v5554_v15 }
 0x172   :  { %v793_v60 = vmul.f32 0.00390625, %v605_v53  ;;  %v602_v31 = vpop.xlane.xlu0 %601  ;;  %v5552_v53 = vld [vmem:[#allocation89_spill] sm:$0xff] }
 0x173   :  { %2789 = vrsqrt.f32 %v1044_v23  ;;  %v982_v45 = vmax.f32 %v918_v56, 0.0  ;;  %v792_v47 = vmul.f32 0.00390625, %v602_v31  ;;  %v859_v46 = vmul.f32 %v5552_v53, %v5552_v53  ;;  %v1636_v23 = vld [vmem:[#allocation7] sm:$0xff] }
 0x174   :  { %v921_v55 = vsub.f32 %v793_v60, %v857_v11  ;;  %v858_v31 = vmul.f32 %v5553_v17, %v5553_v17  ;;  %1675 = vmatpush1.msra.mxu1 %v1636_v23  ;;  %v3158_v60 = vmov 0.0  }
 0x175   :  { %v1046_v50 = vadd.f32 1e-05, %v982_v45  ;;  %v920_v34 = vsub.f32 %v792_v47, %v856_v29  ;;  %v611_v59 = vpop.xlane.xlu1 %610  ;;  %1708 = vmatprep.mubr.f32.mxu1 %v3158_v60 }
 0x176   :  { %v985_v52 = vmax.f32 %v921_v55, 0.0  ;;  %v795_v12 = vmul.f32 0.00390625, %v611_v59  ;;  %v608_v30 = vpop.xlane.xlu0 %607 }
 0x177   :  { %2791 = vrsqrt.f32 %v1046_v50  ;;  %v984_v56 = vmax.f32 %v920_v34, 0.0  ;;  %v794_v11 = vmul.f32 0.00390625, %v608_v30  ;;  %v860_v30 = vmul.f32 %v5555_v43, %v5555_v43 }
 0x178   :  { %v1049_v45 = vadd.f32 1e-05, %v985_v52  ;;  %v923_v29 = vsub.f32 %v795_v12, %v859_v46 }
 0x179   :  { %v1048_v47 = vadd.f32 1e-05, %v984_v56  ;;  %v922_v55 = vsub.f32 %v794_v11, %v858_v31  ;;  %v617_v59 = vpop.xlane.xlu1 %616  ;;  %v862_v56 = vmul.f32 %v4017_v9, %v4017_v9 }
 0x17a   :  { %2793 = vrsqrt.f32 %v1049_v45  ;;  %v987_v10 = vmax.f32 %v923_v29, 0.0  ;;  %v797_v20 = vmul.f32 0.00390625, %v617_v59  ;;  %v614_v50 = vpop.xlane.xlu0 %613  ;;  %v863_v45 = vmul.f32 %v4060_v14, %v4060_v14 }
 0x17b   :  { %2795 = vrsqrt.f32 %v1048_v47  ;;  %v986_v34 = vmax.f32 %v922_v55, 0.0  ;;  %v796_v23 = vmul.f32 0.00390625, %v614_v50  ;;  %v2215_v47 = vsub.f32 0.0, %v4142_v21 }
 0x17c   :  { %v1051_v25 = vadd.f32 1e-05, %v987_v10  ;;  %v925_v60 = vsub.f32 %v797_v20, %v861_v38  ;;  %v865_v21 = vmul.f32 %v4105_v44, %v4105_v44 }
 0x17d   :  { %v1050_v52 = vadd.f32 1e-05, %v986_v34  ;;  %v924_v12 = vsub.f32 %v796_v23, %v860_v30  ;;  %v623_v46 = vpop.xlane.xlu1 %622 }
 0x17e   :  { %2797 = vrsqrt.f32 %v1051_v25  ;;  %v989_v31 = vmax.f32 %v925_v60, 0.0  ;;  %v799_v11 = vmul.f32 0.00390625, %v623_v46  ;;  %v620_v29 = vpop.xlane.xlu0 %619  ;;  %v864_v25 = vmul.f32 %v4076_v51, %v4076_v51 }
 0x17f   :  { %2799 = vrsqrt.f32 %v1050_v52  ;;  %v988_v55 = vmax.f32 %v924_v12, 0.0  ;;  %v798_v59 = vmul.f32 0.00390625, %v620_v29  ;;  %v2217_v12 = vsub.f32 0.0, %v4172_v5 }
 0x180   :  { %v4337_v10 = vpop.eup %2789  ;;  %v1053_v20 = vadd.f32 1e-05, %v989_v31  ;;  %v927_v38 = vsub.f32 %v799_v11, %v863_v45  ;;  %v2219_v45 = vsub.f32 0.0, %v5551_v41 }
 0x181   :  { %5556 = vst [vmem:[#allocation25_spill] sm:$0xff] %v4337_v10  ;;  %v1052_v50 = vadd.f32 1e-05, %v988_v55  ;;  %v926_v34 = vsub.f32 %v798_v59, %v862_v56  ;;  %v629_v30 = vpop.xlane.xlu1 %628  ;;  %v4342_v23 = vmul.f32 %v4337_v10, %v2215_v47  ;;  %v2220_v47 = vsub.f32 0.0, %v5550_v8 }
 0x182   :  { %2801 = vrsqrt.f32 %v1053_v20  ;;  %v991_v60 = vmax.f32 %v927_v38, 0.0  ;;  %v801_v46 = vmul.f32 0.00390625, %v629_v30  ;;  %v626_v52 = vpop.xlane.xlu0 %625  ;;  %v866_v8 = vmul.f32 %v4130_v37, %v4130_v37 }
 0x183   :  { %5557 = vst [vmem:[#allocation32_spill] sm:$0xff] %v4342_v23  ;;  %2803 = vrsqrt.f32 %v1052_v50  ;;  %v990_v31 = vmax.f32 %v926_v34, 0.0  ;;  %v800_v11 = vmul.f32 0.00390625, %v626_v52  ;;  %v867_v50 = vmul.f32 %v4157_v36, %v4157_v36 }
 0x184   :  { %v4347_v56 = vpop.eup %2791  ;;  %v1055_v29 = vadd.f32 1e-05, %v991_v60  ;;  %v929_v55 = vsub.f32 %v801_v46, %v865_v21  ;;  %v2221_v46 = vsub.f32 0.0, %v5553_v17 }
 0x185   :  { %5558 = vst [vmem:[#allocation33_spill] sm:$0xff] %v4347_v56  ;;  %v1054_v59 = vadd.f32 1e-05, %v990_v31  ;;  %v928_v20 = vsub.f32 %v800_v11, %v864_v25  ;;  %v635_v38 = vpop.xlane.xlu1 %634  ;;  %v4352_v30 = vmul.f32 %v4347_v56, %v2217_v12  ;;  %v2222_v11 = vsub.f32 0.0, %v5552_v53 }
 0x186   :  { %2805 = vrsqrt.f32 %v1055_v29  ;;  %v993_v23 = vmax.f32 %v929_v55, 0.0  ;;  %v803_v5 = vmul.f32 0.00390625, %v635_v38  ;;  %v632_v34 = vpop.xlane.xlu0 %631  ;;  %v868_v53 = vmul.f32 %v4190_v6, %v4190_v6 }
 0x187   :  { %5559 = vst [vmem:[#allocation28_spill] sm:$0xff] %v4352_v30  ;;  %v4356_v52 = vpop.eup %2793  ;;  %2807 = vrsqrt.f32 %v1054_v59  ;;  %v992_v41 = vmax.f32 %v928_v20, 0.0  ;;  %v802_v60 = vmul.f32 0.00390625, %v632_v34  ;;  %v869_v30 = vmul.f32 %v4198_v54, %v4198_v54 }
 0x188   :  { %5560 = vst [vmem:[#allocation29_spill] sm:$0xff] %v4356_v52  ;;  %v4360_v25 = vpop.eup %2795  ;;  %v1057_v21 = vadd.f32 1e-05, %v993_v23  ;;  %v931_v12 = vsub.f32 %v803_v5, %v867_v50  ;;  %v4364_v31 = vmul.f32 %v4356_v52, %v2220_v47  ;;  %v5576_v52 = vld [vmem:[#allocation80_spill] sm:$0xff] }
 0x189   :  { %5561 = vst [vmem:[#allocation43_spill] sm:$0xff] %v4360_v25  ;;  %v1056_v29 = vadd.f32 1e-05, %v992_v41  ;;  %v930_v55 = vsub.f32 %v802_v60, %v866_v8  ;;  %v641_v38 = vpop.xlane.xlu1 %640  ;;  %v4368_v59 = vmul.f32 %v4360_v25, %v2219_v45  ;;  %v2223_v45 = vsub.f32 0.0, %v5555_v43  ;;  %v5644_v25 = vld [vmem:[#allocation31_spill] sm:$0xff] }
 0x18a   :  { %5562 = vst [vmem:[#allocation44_spill] sm:$0xff] %v4364_v31  ;;  %2809 = vrsqrt.f32 %v1057_v21  ;;  %v995_v20 = vmax.f32 %v931_v12, 0.0  ;;  %v805_v34 = vmul.f32 0.00390625, %v641_v38  ;;  %v638_v17 = vpop.xlane.xlu0 %637  ;;  %v2224_v21 = vsub.f32 0.0, %v5554_v15 }
 0x18b   :  { %5563 = vst [vmem:[#allocation38_spill] sm:$0xff] %v4368_v59  ;;  %v4372_v23 = vpop.eup %2797  ;;  %2811 = vrsqrt.f32 %v1056_v29  ;;  %v994_v47 = vmax.f32 %v930_v55, 0.0  ;;  %v804_v5 = vmul.f32 0.00390625, %v638_v17  ;;  %v871_v17 = vmul.f32 %v4235_v22, %v4235_v22 }
 0x18c   :  { %5564 = vst [vmem:[#allocation39_spill] sm:$0xff] %v4372_v23  ;;  %v4376_v50 = vpop.eup %2799  ;;  %v1059_v41 = vadd.f32 1e-05, %v995_v20  ;;  %v933_v8 = vsub.f32 %v805_v34, %v869_v30  ;;  %v4380_v60 = vmul.f32 %v4372_v23, %v2222_v11  ;;  %v870_v15 = vmul.f32 %v4219_v0, %v4219_v0 }
 0x18d   :  { %5565 = vst [vmem:[#allocation55_spill] sm:$0xff] %v4376_v50  ;;  %v1058_v12 = vadd.f32 1e-05, %v994_v47  ;;  %v932_v38 = vsub.f32 %v804_v5, %v868_v53  ;;  %v647_v56 = vpop.xlane.xlu1 %646  ;;  %v4384_v29 = vmul.f32 %v4376_v50, %v2221_v46  ;;  %v5570_v53 = vld [vmem:[#allocation72_spill] sm:$0xff] }
 0x18e   :  { %5566 = vst [vmem:[#allocation56_spill] sm:$0xff] %v4380_v60  ;;  %2813 = vrsqrt.f32 %v1059_v41  ;;  %v997_v55 = vmax.f32 %v933_v8, 0.0  ;;  %v807_v10 = vmul.f32 0.00390625, %v647_v56  ;;  %v644_v43 = vpop.xlane.xlu0 %643  ;;  %v872_v5 = vmul.f32 %v5570_v53, %v5570_v53  ;;  %v5572_v60 = vld [vmem:[#allocation74_spill] sm:$0xff] }
 0x18f   :  { %5567 = vst [vmem:[#allocation49_spill] sm:$0xff] %v4384_v29  ;;  %v4388_v20 = vpop.eup %2801  ;;  %2815 = vrsqrt.f32 %v1058_v12  ;;  %v996_v30 = vmax.f32 %v932_v38, 0.0  ;;  %v806_v11 = vmul.f32 0.00390625, %v644_v43  ;;  %v873_v12 = vmul.f32 %v5572_v60, %v5572_v60 }
 0x190   :  { %5568 = vst [vmem:[#allocation50_spill] sm:$0xff] %v4388_v20  ;;  %v4392_v34 = vpop.eup %2803  ;;  %v1061_v47 = vadd.f32 1e-05, %v997_v55  ;;  %v935_v46 = vsub.f32 %v807_v10, %v871_v17  ;;  %v4397_v41 = vmul.f32 %v4388_v20, %v2224_v21  ;;  %v2226_v43 = vsub.f32 0.0, %v4060_v14 }
 0x191   :  { %5569 = vst [vmem:[#allocation67_spill] sm:$0xff] %v4392_v34  ;;  %v1060_v56 = vadd.f32 1e-05, %v996_v30  ;;  %v934_v8 = vsub.f32 %v806_v11, %v870_v15  ;;  %v653_v38 = vpop.xlane.xlu1 %652  ;;  %v4402_v23 = vmul.f32 %v4392_v34, %v2223_v45  ;;  %v2225_v21 = vsub.f32 0.0, %v4017_v9 }
 0x192   :  { %5571 = vst [vmem:[#allocation68_spill] sm:$0xff] %v4397_v41  ;;  %2817 = vrsqrt.f32 %v1061_v47  ;;  %v999_v55 = vmax.f32 %v935_v46, 0.0  ;;  %v809_v10 = vmul.f32 0.00390625, %v653_v38  ;;  %v650_v17 = vpop.xlane.xlu0 %649  ;;  %v874_v45 = vmul.f32 %v5576_v52, %v5576_v52  ;;  %v5578_v38 = vld [vmem:[#allocation84_spill] sm:$0xff] }
 0x193   :  { %5573 = vst [vmem:[#allocation61_spill] sm:$0xff] %v4402_v23  ;;  %v4405_v31 = vpop.eup %2805  ;;  %2819 = vrsqrt.f32 %v1060_v56  ;;  %v998_v30 = vmax.f32 %v934_v8, 0.0  ;;  %v808_v15 = vmul.f32 0.00390625, %v650_v17  ;;  %v875_v23 = vmul.f32 %v5578_v38, %v5578_v38 }
 0x194   :  { %5574 = vst [vmem:[#allocation62_spill] sm:$0xff] %v4405_v31  ;;  %v4408_v11 = vpop.eup %2807  ;;  %v1063_v41 = vadd.f32 1e-05, %v999_v55  ;;  %v937_v20 = vsub.f32 %v809_v10, %v873_v12  ;;  %v4413_v14 = vmul.f32 %v4405_v31, %v2226_v43  ;;  %v2228_v56 = vsub.f32 0.0, %v4105_v44  ;;  %v5582_v31 = vld [vmem:[#allocation88_spill] sm:$0xff] }
 0x195   :  { %5575 = vst [vmem:[#allocation65_spill] sm:$0xff] %v4408_v11  ;;  %v1062_v47 = vadd.f32 1e-05, %v998_v30  ;;  %v936_v46 = vsub.f32 %v808_v15, %v872_v5  ;;  %v659_v34 = vpop.xlane.xlu1 %658  ;;  %v4418_v9 = vmul.f32 %v4408_v11, %v2225_v21  ;;  %v2227_v43 = vsub.f32 0.0, %v4076_v51 }
 0x196   :  { %5577 = vst [vmem:[#allocation81_spill] sm:$0xff] %v4413_v14  ;;  %2821 = vrsqrt.f32 %v1063_v41  ;;  %v1001_v8 = vmax.f32 %v937_v20, 0.0  ;;  %v811_v12 = vmul.f32 0.00390625, %v659_v34  ;;  %v656_v55 = vpop.xlane.xlu0 %655  ;;  %v876_v21 = vmul.f32 %v5582_v31, %v5582_v31  ;;  %v5584_v41 = vld [vmem:[#allocation37_spill] sm:$0xff] }
 0x197   :  { %5579 = vst [vmem:[#allocation79_spill] sm:$0xff] %v4418_v9  ;;  %v4421_v10 = vpop.eup %2809  ;;  %2823 = vrsqrt.f32 %v1062_v47  ;;  %v1000_v17 = vmax.f32 %v936_v46, 0.0  ;;  %v810_v5 = vmul.f32 0.00390625, %v656_v55  ;;  %v877_v9 = vmul.f32 %v5584_v41, %v5584_v41 }
 0x198   :  { %5580 = vst [vmem:[#allocation89_spill] sm:$0xff] %v4421_v10  ;;  %v4424_v30 = vpop.eup %2811  ;;  %v1065_v15 = vadd.f32 1e-05, %v1001_v8  ;;  %v939_v14 = vsub.f32 %v811_v12, %v875_v23  ;;  %v4429_v44 = vmul.f32 %v4421_v10, %v2228_v56  ;;  %v2230_v47 = vsub.f32 0.0, %v4157_v36 }
 0x199   :  { %5581 = vst [vmem:[#allocation85_spill] sm:$0xff] %v4424_v30  ;;  %v1064_v20 = vadd.f32 1e-05, %v1000_v17  ;;  %v938_v34 = vsub.f32 %v810_v5, %v874_v45  ;;  %v665_v11 = vpop.xlane.xlu1 %664  ;;  %v4434_v51 = vmul.f32 %v4424_v30, %v2227_v43  ;;  %v2229_v56 = vsub.f32 0.0, %v4130_v37  ;;  %v5640_v30 = vld [vmem:[#allocation12_spill] sm:$0xff] }
 0x19a   :  { %5583 = vst [vmem:[#allocation48_spill] sm:$0xff] %v4429_v44  ;;  %2825 = vrsqrt.f32 %v1065_v15  ;;  %v1003_v46 = vmax.f32 %v939_v14, 0.0  ;;  %v813_v23 = vmul.f32 0.00390625, %v665_v11  ;;  %v662_v8 = vpop.xlane.xlu0 %661  ;;  %v878_v43 = vmul.f32 %v3986_v61, %v3986_v61 }
 0x19b   :  { %5585 = vst [vmem:[#allocation53_spill] sm:$0xff] %v4434_v51  ;;  %v4437_v12 = vpop.eup %2813  ;;  %2827 = vrsqrt.f32 %v1064_v20  ;;  %v1002_v55 = vmax.f32 %v938_v34, 0.0  ;;  %v812_v45 = vmul.f32 0.00390625, %v662_v8  ;;  %v879_v15 = vmul.f32 %v4008_v24, %v4008_v24 }
 0x19c   :  { %5586 = vst [vmem:[#allocation72_spill] sm:$0xff] %v4437_v12  ;;  %v4440_v17 = vpop.eup %2815  ;;  %v1067_v5 = vadd.f32 1e-05, %v1003_v46  ;;  %v941_v44 = vsub.f32 %v813_v23, %v877_v9  ;;  %v4445_v36 = vmul.f32 %v4437_v12, %v2230_v47  ;;  %v2232_v20 = vsub.f32 0.0, %v4198_v54 }
 0x19d   :  { %5587 = vst [vmem:[#allocation74_spill] sm:$0xff] %v4440_v17  ;;  %v1066_v14 = vadd.f32 1e-05, %v1002_v55  ;;  %v940_v11 = vsub.f32 %v812_v45, %v876_v21  ;;  %v671_v10 = vpop.xlane.xlu1 %670  ;;  %v4450_v37 = vmul.f32 %v4440_v17, %v2229_v56  ;;  %v2231_v47 = vsub.f32 0.0, %v4190_v6  ;;  %v5639_v17 = vld [vmem:[#allocation21_spill] sm:$0xff] }
 0x19e   :  { %5588 = vst [vmem:[#allocation80_spill] sm:$0xff] %v4445_v36  ;;  %2829 = vrsqrt.f32 %v1067_v5  ;;  %v1005_v34 = vmax.f32 %v941_v44, 0.0  ;;  %v815_v9 = vmul.f32 0.00390625, %v671_v10  ;;  %v668_v46 = vpop.xlane.xlu0 %667  ;;  %v880_v56 = vmul.f32 %v4050_v18, %v4050_v18 }
 0x19f   :  { %5589 = vst [vmem:[#allocation84_spill] sm:$0xff] %v4450_v37  ;;  %v4453_v23 = vpop.eup %2817  ;;  %2831 = vrsqrt.f32 %v1066_v14  ;;  %v1004_v8 = vmax.f32 %v940_v11, 0.0  ;;  %v814_v21 = vmul.f32 0.00390625, %v668_v46  ;;  %v881_v5 = vmul.f32 %v4073_v1, %v4073_v1 }
 0x1a0   :  { %5590 = vst [vmem:[#allocation88_spill] sm:$0xff] %v4453_v23  ;;  %v4456_v55 = vpop.eup %2819  ;;  %v1069_v45 = vadd.f32 1e-05, %v1005_v34  ;;  %v943_v36 = vsub.f32 %v815_v9, %v879_v15  ;;  %v4461_v54 = vmul.f32 %v4453_v23, %v2232_v20  ;;  %v2234_v14 = vsub.f32 0.0, %v4235_v22 }
 0x1a1   :  { %5591 = vst [vmem:[#allocation37_spill] sm:$0xff] %v4456_v55  ;;  %v1068_v44 = vadd.f32 1e-05, %v1004_v8  ;;  %v942_v10 = vsub.f32 %v814_v21, %v878_v43  ;;  %v677_v12 = vpop.xlane.xlu1 %676  ;;  %v4466_v6 = vmul.f32 %v4456_v55, %v2231_v47  ;;  %v2233_v20 = vsub.f32 0.0, %v4219_v0 }
 0x1a2   :  { %5592 = vst [vmem:[#allocation90_spill] sm:$0xff] %v4461_v54  ;;  %2833 = vrsqrt.f32 %v1069_v45  ;;  %v1007_v11 = vmax.f32 %v943_v36, 0.0  ;;  %v817_v15 = vmul.f32 0.00390625, %v677_v12  ;;  %v674_v34 = vpop.xlane.xlu0 %673  ;;  %v2235_v21 = vsub.f32 0.0, %v5570_v53 }
 0x1a3   :  { %5593 = vst [vmem:[#allocation91_spill] sm:$0xff] %v4466_v6  ;;  %v4469_v9 = vpop.eup %2821  ;;  %2835 = vrsqrt.f32 %v1068_v44  ;;  %v1006_v46 = vmax.f32 %v942_v10, 0.0  ;;  %v816_v43 = vmul.f32 0.00390625, %v674_v34  ;;  %v2236_v22 = vsub.f32 0.0, %v5572_v60 }
 0x1a4   :  { %5594 = vst [vmem:[#allocation92_spill] sm:$0xff] %v4469_v9  ;;  %v4472_v8 = vpop.eup %2823  ;;  %v1071_v54 = vadd.f32 1e-05, %v1007_v11  ;;  %v945_v47 = vsub.f32 %v817_v15, %v881_v5  ;;  %v4476_v23 = vmul.f32 %v4469_v9, %v2234_v14  ;;  %v883_v44 = vmul.f32 %v4122_v35, %v4122_v35 }
 0x1a5   :  { %5595 = vst [vmem:[#allocation93_spill] sm:$0xff] %v4472_v8  ;;  %v1070_v12 = vadd.f32 1e-05, %v1006_v46  ;;  %v944_v36 = vsub.f32 %v816_v43, %v880_v56  ;;  %v683_v45 = vpop.xlane.xlu1 %682  ;;  %v4480_v6 = vmul.f32 %v4472_v8, %v2233_v20  ;;  %v882_v60 = vmul.f32 %v4096_v3, %v4096_v3 }
 0x1a6   :  { %5596 = vst [vmem:[#allocation94_spill] sm:$0xff] %v4476_v23  ;;  %2837 = vrsqrt.f32 %v1071_v54  ;;  %v1009_v0 = vmax.f32 %v945_v47, 0.0  ;;  %v819_v10 = vmul.f32 0.00390625, %v683_v45  ;;  %v680_v53 = vpop.xlane.xlu0 %679  ;;  %v2237_v15 = vsub.f32 0.0, %v5576_v52 }
 0x1a7   :  { %5597 = vst [vmem:[#allocation95_spill] sm:$0xff] %v4480_v6  ;;  %v4484_v11 = vpop.eup %2825  ;;  %2839 = vrsqrt.f32 %v1070_v12  ;;  %v1008_v5 = vmax.f32 %v944_v36, 0.0  ;;  %v818_v14 = vmul.f32 0.00390625, %v680_v53  ;;  %v2238_v46 = vsub.f32 0.0, %v5578_v38 }
 0x1a8   :  { %5598 = vst [vmem:[#allocation96_spill] sm:$0xff] %v4484_v11  ;;  %v4488_v56 = vpop.eup %2827  ;;  %v1073_v34 = vadd.f32 1e-05, %v1009_v0  ;;  %v947_v54 = vsub.f32 %v819_v10, %v883_v44  ;;  %v4492_v20 = vmul.f32 %v4484_v11, %v2236_v22  ;;  %v885_v53 = vmul.f32 %v4166_v26, %v4166_v26 }
 0x1a9   :  { %5599 = vst [vmem:[#allocation97_spill] sm:$0xff] %v4488_v56  ;;  %v1072_v43 = vadd.f32 1e-05, %v1008_v5  ;;  %v946_v47 = vsub.f32 %v818_v14, %v882_v60  ;;  %v689_v45 = vpop.xlane.xlu1 %688  ;;  %v4496_v12 = vmul.f32 %v4488_v56, %v2235_v21  ;;  %v884_v38 = vmul.f32 %v4150_v27, %v4150_v27 }
 0x1aa   :  { %5600 = vst [vmem:[#allocation98_spill] sm:$0xff] %v4492_v20  ;;  %2841 = vrsqrt.f32 %v1073_v34  ;;  %v1011_v36 = vmax.f32 %v947_v54, 0.0  ;;  %v821_v23 = vmul.f32 0.00390625, %v689_v45  ;;  %v686_v52 = vpop.xlane.xlu0 %685  ;;  %v2240_v45 = vsub.f32 0.0, %v5584_v41 }
 0x1ab   :  { %5601 = vst [vmem:[#allocation99_spill] sm:$0xff] %v4496_v12  ;;  %v4500_v0 = vpop.eup %2829  ;;  %2843 = vrsqrt.f32 %v1072_v43  ;;  %v1010_v22 = vmax.f32 %v946_v47, 0.0  ;;  %v820_v44 = vmul.f32 0.00390625, %v686_v52  ;;  %v2239_v52 = vsub.f32 0.0, %v5582_v31 }
 0x1ac   :  { %5602 = vst [vmem:[#allocation100_spill] sm:$0xff] %v4500_v0  ;;  %v4504_v10 = vpop.eup %2831  ;;  %v1075_v5 = vadd.f32 1e-05, %v1011_v36  ;;  %v949_v21 = vsub.f32 %v821_v23, %v885_v53  ;;  %v4507_v60 = vmul.f32 %v4500_v0, %v2238_v46  ;;  %v2242_v41 = vsub.f32 0.0, %v4008_v24 }
 0x1ad   :  { %5603 = vst [vmem:[#allocation101_spill] sm:$0xff] %v4504_v10  ;;  %v1074_v14 = vadd.f32 1e-05, %v1010_v22  ;;  %v948_v34 = vsub.f32 %v820_v44, %v884_v38  ;;  %v4510_v54 = vmul.f32 %v4504_v10, %v2237_v15  ;;  %v2241_v38 = vsub.f32 0.0, %v3986_v61 }
 0x1ae   :  { %5604 = vst [vmem:[#allocation102_spill] sm:$0xff] %v4507_v60  ;;  %2845 = vrsqrt.f32 %v1075_v5  ;;  %v1013_v43 = vmax.f32 %v949_v21, 0.0  ;;  %v2243_v24 = vsub.f32 0.0, %v4050_v18  ;;  %v765_v60 = vmul.f32 0.00390625, %v4264_v62 }
 0x1af   :  { %5605 = vst [vmem:[#allocation103_spill] sm:$0xff] %v4510_v54  ;;  %v4513_v47 = vpop.eup %2833  ;;  %2847 = vrsqrt.f32 %v1074_v14  ;;  %v1012_v20 = vmax.f32 %v948_v34, 0.0  ;;  %v764_v12 = vmul.f32 0.00390625, %v4266_v2  ;;  %v4631_v56 = vmul.f32 %v3994_v32, %v3994_v32 }
 0x1b0   :  { %5606 = vst [vmem:[#allocation104_spill] sm:$0xff] %v4513_v47  ;;  %v4516_v36 = vpop.eup %2835  ;;  %v1077_v23 = vadd.f32 1e-05, %v1013_v43  ;;  %v4519_v46 = vmul.f32 %v4513_v47, %v2240_v45  ;;  %v2246_v45 = vsub.f32 0.0, %v4122_v35  ;;  %v5635_v47 = vld [vmem:[#allocation86_spill] sm:$0xff]  ;;  %v767_v62 = vmul.f32 0.00390625, %v4268_v33 }
 0x1b1   :  { %5607 = vst [vmem:[#allocation105_spill] sm:$0xff] %v4516_v36  ;;  %v1076_v53 = vadd.f32 1e-05, %v1012_v20  ;;  %v4522_v15 = vmul.f32 %v4516_v36, %v2239_v52  ;;  %v2244_v20 = vsub.f32 0.0, %v4073_v1  ;;  %v2245_v52 = vsub.f32 0.0, %v4096_v3  ;;  %v5637_v36 = vld [vmem:[#allocation54_spill] sm:$0xff] }
 0x1b2   :  { %5608 = vst [vmem:[#allocation106_spill] sm:$0xff] %v4519_v46  ;;  %2849 = vrsqrt.f32 %v1077_v23  ;;  %v762_v46 = vmul.f32 0.00390625, %v4262_v39  ;;  %v4624_v11 = vmul.f32 %v5637_v36, %v5637_v36  ;;  %v5638_v39 = vld [vmem:[#allocation47_spill] sm:$0xff]  ;;  %v4638_v9 = vmul.f32 %v4032_v57, %v4032_v57 }
 0x1b3   :  { %5609 = vst [vmem:[#allocation107_spill] sm:$0xff] %v4522_v15  ;;  %v4525_v22 = vpop.eup %2837  ;;  %2851 = vrsqrt.f32 %v1076_v53  ;;  %v2248_v53 = vsub.f32 0.0, %v4166_v26  ;;  %v5636_v15 = vld [vmem:[#allocation36_spill] sm:$0xff]  ;;  %v829_v10 = vmul.f32 %v5638_v39, %v5638_v39  ;;  %v831_v2 = vmul.f32 %v4041_v42, %v4041_v42 }
 0x1b4   :  { %5610 = vst [vmem:[#allocation108_spill] sm:$0xff] %v4525_v22  ;;  %v4528_v31 = vpop.eup %2839  ;;  %v4531_v44 = vmul.f32 %v4525_v22, %v2242_v41  ;;  %v828_v0 = vmul.f32 %v5636_v15, %v5636_v15  ;;  %v769_v6 = vmul.f32 0.00390625, %v4272_v4  ;;  %v832_v8 = vmul.f32 %v4066_v19, %v4066_v19 }
 0x1b5   :  { %5611 = vst [vmem:[#allocation109_spill] sm:$0xff] %v4528_v31  ;;  %v4534_v5 = vmul.f32 %v4528_v31, %v2241_v38  ;;  %v2247_v38 = vsub.f32 0.0, %v4150_v27  ;;  %v1729_v27 = vsub.s32 0, %v3574_v40  ;;  %v895_v37 = vsub.f32 %v767_v62, %v831_v2  ;;  %v5643_v2 = vld [vmem:[#allocation30_spill] sm:$0xff] }
 0x1b6   :  { %5612 = vst [vmem:[#allocation110_spill] sm:$0xff] %v4531_v44  ;;  %v5631_v44 = vld [vmem:[#allocation82_spill] sm:$0xff]  ;;  %v892_v55 = vsub.f32 %v764_v12, %v828_v0  ;;  %v768_v51 = vmul.f32 0.00390625, %v5639_v17  ;;  %v5641_v12 = vld [vmem:[#allocation17_spill] sm:$0xff]  ;;  %v771_v17 = vmul.f32 0.00390625, %v5643_v2 }
 0x1b7   :  { %5613 = vst [vmem:[#allocation111_spill] sm:$0xff] %v4534_v5  ;;  %v4537_v21 = vpop.eup %2841  ;;  %v4617_v5 = vmul.f32 %v5635_v47, %v5635_v47  ;;  %v837_v0 = vmul.f32 %v5641_v12, %v5641_v12 }
 0x1b8   :  { %5614 = vst [vmem:[#allocation112_spill] sm:$0xff] %v4537_v21  ;;  %v4540_v14 = vpop.eup %2843  ;;  %v4543_v34 = vmul.f32 %v4537_v21, %v2244_v20  ;;  %v956_v59 = vmax.f32 %v892_v55, 0.0 }
 0x1b9   :  { %5615 = vst [vmem:[#allocation113_spill] sm:$0xff] %v4540_v14  ;;  %v4546_v61 = vmul.f32 %v4540_v14, %v2243_v24 }
 0x1ba   :  { %5616 = vst [vmem:[#allocation114_spill] sm:$0xff] %v4543_v34 }
 0x1bb   :  { %5617 = vst [vmem:[#allocation115_spill] sm:$0xff] %v4546_v61  ;;  %v4549_v43 = vpop.eup %2845 }
 0x1bc   :  { %5618 = vst [vmem:[#allocation116_spill] sm:$0xff] %v4549_v43  ;;  %v4552_v23 = vpop.eup %2847  ;;  %v4555_v1 = vmul.f32 %v4549_v43, %v2246_v45 }
 0x1bd   :  { %5619 = vst [vmem:[#allocation117_spill] sm:$0xff] %v4552_v23  ;;  %v4558_v18 = vmul.f32 %v4552_v23, %v2245_v52  ;;  %v5632_v23 = vld [vmem:[#allocation78_spill] sm:$0xff] }
 0x1be   :  { %5620 = vst [vmem:[#allocation118_spill] sm:$0xff] %v4555_v1  ;;  %v4605_v22 = vmul.f32 %v5632_v23, %v5632_v23 }
 0x1bf   :  { %5621 = vst [vmem:[#allocation119_spill] sm:$0xff] %v4558_v18  ;;  %v4561_v41 = vpop.eup %2849 }
 0x1c0   :  { %5622 = vst [vmem:[#allocation120_spill] sm:$0xff] %v4561_v41  ;;  %v4564_v20 = vpop.eup %2851  ;;  %v4567_v35 = vmul.f32 %v4561_v41, %v2248_v53  ;;  %v5629_v41 = vld [vmem:[#allocation75_spill] sm:$0xff] }
 0x1c1   :  { %5623 = vst [vmem:[#allocation121_spill] sm:$0xff] %v4564_v20  ;;  %v4570_v3 = vmul.f32 %v4564_v20, %v2247_v38 }
 0x1c2   :  { %5624 = vst [vmem:[#allocation122_spill] sm:$0xff] %v4567_v35  ;;  %v760_v35 = vmul.f32 0.00390625, %v4254_v48  ;;  %v5633_v48 = vld [vmem:[#allocation87_spill] sm:$0xff] }
 0x1c3   :  { %5625 = vst [vmem:[#allocation123_spill] sm:$0xff] %v4570_v3  ;;  %v5630_v3 = vld [vmem:[#allocation83_spill] sm:$0xff]  ;;  %v827_v61 = vmul.f32 %v5633_v48, %v5633_v48 }
 0x1c4   :  { %v826_v20 = vmul.f32 %v5630_v3, %v5630_v3 }
 0x1f5   :  { %v1631_v24 = vpop.f32.mrf.mxu0 }
 0x1f6   :  { %v1635_v45 = vmax.f32 %v1631_v24, 0.0 }
 0x1f7   :  { %v1633_v1 = vpop.f32.mrf.mxu0 }
 0x1f8   :  { %2781 = vmatmul.mubr.msk.f32.vlgmr.msra.gmra.mxu1 %vm1640_vm0, %v1635_v45 }
 0x2b8   :  { %v1710_v52 = vpop.f32.mrf.mxu1 }
 0x2b9   :  { %v1715_v43 = vsub.f32 0.0, %v1710_v52 }
 0x2ba   :  { %v1712_v38 = vpop.f32.mrf.mxu1 }
 0x2bb   :  { %v1717_v26 = vmul.f32 1.442695, %v1715_v43  ;;  %v1716_v1 = vsub.f32 0.0, %v1712_v38 }
 0x2bd   :  { %2853 = vpow2.f32 %v1717_v26  ;;  %v1719_v43 = vmul.f32 1.442695, %v1716_v1  ;;  %v4594_v26 = vmul.f32 %v5629_v41, %v5629_v41 }
 0x2ca   :  { %v2854_v34 = vpop.eup %2853 }
 0x2cb   :  { %v1721_v18 = vadd.f32 1.0, %v2854_v34  ;;  %v5336_v34 = vsub.s32 1, %v3574_v40 }
 0x2cd   :  { %2855 = vrcp.f32 %v1721_v18 }
 0x2ce   :  { %2857 = vpow2.f32 %v1719_v43  ;;  %v5627_v43 = vld [vmem:[#allocation76_spill] sm:$0xff] }
 0x2da   :  { %v2856_v21 = vpop.eup %2855 }
 0x2db   :  { %v1730_v53 = vrot.slane %v2856_v21, %v1729_v27  ;;  %v1864_v18 = vrot.slane %v2856_v21, %v5336_v34  ;;  %v2858_v24 = vpop.eup %2857  ;;  %v5626_v21 = vld [vmem:[#allocation73_spill] sm:$0xff] }
 0x2dc   :  { %v1722_v45 = vadd.f32 1.0, %v2858_v24  ;;  %v4582_v38 = vmul.f32 %v5626_v21, %v5626_v21  ;;  %v825_v24 = vmul.f32 %v5627_v43, %v5627_v43  ;;  %v770_v21 = vmul.f32 0.00390625, %v5644_v25 }
 0x2dd   :  { %1736 = vbcast.lane.b32.xlu1 %v1730_v53, 264  ;;  %1732 = vbcast.lane.b32.xlu0 %v1730_v53, 256 }
 0x2de   :  { %2859 = vrcp.f32 %v1722_v45  ;;  %v5628_v45 = vld [vmem:[#allocation77_spill] sm:$0xff] }
 0x2df   :  { %v824_v34 = vmul.f32 %v5628_v45, %v5628_v45 }
 0x2e1   :  { %1740 = vbcast.lane.b32.xlu1 %v1730_v53, 272  ;;  %1748 = vbcast.lane.b32.xlu0 %v1730_v53, 288  ;;  %v888_v54 = vsub.f32 %v760_v35, %v824_v34  ;;  %v890_v35 = vsub.f32 %v762_v46, %v826_v20  ;;  %v766_v34 = vmul.f32 0.00390625, %v4270_v7  ;;  %v833_v46 = vmul.f32 %v4093_v49, %v4093_v49  ;;  %v5646_v49 = vld [vmem:[#allocation26_spill] sm:$0xff] }
 0x2e2   :  { %v834_v20 = vmul.f32 %v4119_v58, %v4119_v58  ;;  %v773_v12 = vmul.f32 0.00390625, %v5646_v49 }
 0x2e3   :  { %v954_v4 = vmax.f32 %v890_v35, 0.0  ;;  %v897_v62 = vsub.f32 %v769_v6, %v833_v46 }
 0x2e4   :  { %v901_v19 = vsub.f32 %v773_v12, %v837_v0 }
 0x2e5   :  { %1744 = vbcast.lane.b32.xlu1 %v1730_v53, 280  ;;  %1756 = vbcast.lane.b32.xlu0 %v1730_v53, 304  ;;  %v961_v2 = vmax.f32 %v897_v62, 0.0 }
 0x2e6   :  { %v965_v0 = vmax.f32 %v901_v19, 0.0 }
 0x2e9   :  { %1752 = vbcast.lane.b32.xlu1 %v1730_v53, 296  ;;  %1764 = vbcast.lane.b32.xlu0 %v1730_v53, 320 }
 0x2eb   :  { %v4576_v52 = vpop.eup %2859 }
 0x2ec   :  { %v4585_v1 = vrot.slane %v4576_v52, %v1729_v27  ;;  %v4601_v27 = vmul.f32 %v5631_v44, %v5631_v44 }
 0x2ed   :  { %1760 = vbcast.lane.b32.xlu1 %v1730_v53, 312  ;;  %1772 = vbcast.lane.b32.xlu0 %v1730_v53, 336 }
 0x2f1   :  { %1768 = vbcast.lane.b32.xlu1 %v1730_v53, 328  ;;  %1780 = vbcast.lane.b32.xlu0 %v1730_v53, 352 }
 0x2f5   :  { %1776 = vbcast.lane.b32.xlu1 %v1730_v53, 344  ;;  %1788 = vbcast.lane.b32.xlu0 %v1730_v53, 368 }
 0x2f9   :  { %1784 = vbcast.lane.b32.xlu1 %v1730_v53, 360  ;;  %1866 = vbcast.lane.b32.xlu0 %v1864_v18, 256 }
 0x2fd   :  { %1792 = vbcast.lane.b32.xlu1 %v1730_v53, 376  ;;  %1874 = vbcast.lane.b32.xlu0 %v1864_v18, 272  ;;  %v761_v53 = vmul.f32 0.00390625, %v4250_v63  ;;  %v763_v63 = vmul.f32 0.00390625, %v4260_v16  ;;  %v5634_v16 = vld [vmem:[#allocation42_spill] sm:$0xff] }
 0x2fe   :  { %v4613_v14 = vmul.f32 %v5634_v16, %v5634_v16 }
 0x2ff   :  { %v889_v31 = vsub.f32 %v761_v53, %v825_v24  ;;  %v891_v53 = vsub.f32 %v763_v63, %v827_v61  ;;  %v830_v24 = vmul.f32 %v4005_v28, %v4005_v28  ;;  %v4646_v61 = vmul.f32 %v4063_v13, %v4063_v13 }
 0x300   :  { %v893_v63 = vsub.f32 %v765_v60, %v829_v10  ;;  %v835_v10 = vmul.f32 %v5640_v30, %v5640_v30  ;;  %v5645_v30 = vld [vmem:[#allocation22_spill] sm:$0xff] }
 0x301   :  { %1870 = vbcast.lane.b32.xlu1 %v1864_v18, 264  ;;  %1882 = vbcast.lane.b32.xlu0 %v1864_v18, 288  ;;  %v953_v33 = vmax.f32 %v889_v31, 0.0  ;;  %v955_v7 = vmax.f32 %v891_v53, 0.0  ;;  %v894_v60 = vsub.f32 %v766_v34, %v830_v24  ;;  %v838_v58 = vmul.f32 %v5645_v30, %v5645_v30 }
 0x302   :  { %v957_v53 = vmax.f32 %v893_v63, 0.0  ;;  %v959_v24 = vmax.f32 %v895_v37, 0.0  ;;  %v896_v34 = vsub.f32 %v768_v51, %v832_v8  ;;  %v5647_v63 = vld [vmem:[#allocation27_spill] sm:$0xff]  ;;  %v899_v30 = vsub.f32 %v771_v17, %v835_v10  ;;  %v5649_v8 = vld [vmem:[#allocation40_spill] sm:$0xff] }
 0x303   :  { %v1017_v29 = vadd.f32 1e-05, %v953_v33  ;;  %v1019_v35 = vadd.f32 1e-05, %v955_v7  ;;  %v1018_v33 = vadd.f32 1e-05, %v954_v4  ;;  %v898_v51 = vsub.f32 %v770_v21, %v834_v20 }
 0x304   :  { %v958_v6 = vmax.f32 %v894_v60, 0.0  ;;  %v772_v46 = vmul.f32 0.00390625, %v5647_v63  ;;  %v1021_v25 = vadd.f32 1e-05, %v957_v53  ;;  %v1020_v37 = vadd.f32 1e-05, %v956_v59 }
 0x305   :  { %1878 = vbcast.lane.b32.xlu1 %v1864_v18, 280  ;;  %1890 = vbcast.lane.b32.xlu0 %v1864_v18, 304  ;;  %2861 = vrsqrt.f32 %v1017_v29  ;;  %v775_v49 = vmul.f32 0.00390625, %v5649_v8  ;;  %v1023_v7 = vadd.f32 1e-05, %v959_v24  ;;  %v5650_v29 = vld [vmem:[#allocation41_spill] sm:$0xff] }
 0x306   :  { %v1022_v4 = vadd.f32 1e-05, %v958_v6  ;;  %v774_v53 = vmul.f32 0.00390625, %v5650_v29  ;;  %v1025_v10 = vadd.f32 1e-05, %v961_v2  ;;  %v5651_v59 = vld [vmem:[#allocation34_spill] sm:$0xff] }
 0x307   :  { %v777_v21 = vmul.f32 0.00390625, %v5651_v59  ;;  %v962_v20 = vmax.f32 %v898_v51, 0.0  ;;  %v5652_v17 = vld [vmem:[#allocation35_spill] sm:$0xff]  ;;  %v1029_v8 = vadd.f32 1e-05, %v965_v0  ;;  %v5658_v29 = vld [vmem:[#allocation64_spill] sm:$0xff] }
 0x308   :  { %v5653_v24 = vld [vmem:[#allocation51_spill] sm:$0xff] }
 0x309   :  { %1886 = vbcast.lane.b32.xlu1 %v1864_v18, 296  ;;  %1898 = vbcast.lane.b32.xlu0 %v1864_v18, 320  ;;  %v1026_v2 = vadd.f32 1e-05, %v962_v20 }
 0x30d   :  { %1894 = vbcast.lane.b32.xlu1 %v1864_v18, 312  ;;  %1906 = vbcast.lane.b32.xlu0 %v1864_v18, 336 }
 0x311   :  { %1902 = vbcast.lane.b32.xlu1 %v1864_v18, 328  ;;  %1914 = vbcast.lane.b32.xlu0 %v1864_v18, 352 }
 0x315   :  { %1910 = vbcast.lane.b32.xlu1 %v1864_v18, 344  ;;  %1922 = vbcast.lane.b32.xlu0 %v1864_v18, 368 }
 0x319   :  { %1918 = vbcast.lane.b32.xlu1 %v1864_v18, 360  ;;  %1799 = vbcast.lane.b32.xlu0 %v4585_v1, 256 }
 0x31d   :  { %1926 = vbcast.lane.b32.xlu1 %v1864_v18, 376  ;;  %1807 = vbcast.lane.b32.xlu0 %v4585_v1, 272  ;;  %v952_v18 = vmax.f32 %v888_v54, 0.0  ;;  %v5642_v54 = vld [vmem:[#allocation16_spill] sm:$0xff] }
 0x31e   :  { %v836_v31 = vmul.f32 %v5642_v54, %v5642_v54  ;;  %v960_v54 = vmax.f32 %v896_v34, 0.0  ;;  %v779_v34 = vmul.f32 0.00390625, %v5653_v24 }
 0x31f   :  { %v1016_v50 = vadd.f32 1e-05, %v952_v18  ;;  %v5648_v18 = vld [vmem:[#allocation20_spill] sm:$0xff] }
 0x320   :  { %v839_v55 = vmul.f32 %v5648_v18, %v5648_v18  ;;  %v900_v60 = vsub.f32 %v772_v46, %v836_v31  ;;  %v1024_v12 = vadd.f32 1e-05, %v960_v54  ;;  %v905_v46 = vsub.f32 %v777_v21, %v4594_v26  ;;  %v4696_v21 = vpop.eup %2861 }
 0x321   :  { %1803 = vbcast.lane.b32.xlu1 %v4585_v1, 264  ;;  %1815 = vbcast.lane.b32.xlu0 %v4585_v1, 288  ;;  %2863 = vrsqrt.f32 %v1016_v50  ;;  %v963_v50 = vmax.f32 %v899_v30, 0.0  ;;  %v5654_v30 = vld [vmem:[#allocation52_spill] sm:$0xff] }
 0x322   :  { %2865 = vrsqrt.f32 %v1019_v35  ;;  %v903_v62 = vsub.f32 %v775_v49, %v839_v55  ;;  %v776_v35 = vmul.f32 0.00390625, %v5652_v17  ;;  %v964_v31 = vmax.f32 %v900_v60, 0.0  ;;  %v5655_v55 = vld [vmem:[#allocation45_spill] sm:$0xff] }
 0x323   :  { %2867 = vrsqrt.f32 %v1018_v33  ;;  %v902_v33 = vsub.f32 %v774_v53, %v838_v58  ;;  %v778_v6 = vmul.f32 0.00390625, %v5654_v30  ;;  %v1027_v63 = vadd.f32 1e-05, %v963_v50  ;;  %v5659_v50 = vld [vmem:[#allocation57_spill] sm:$0xff] }
 0x324   :  { %2869 = vrsqrt.f32 %v1021_v25  ;;  %v781_v25 = vmul.f32 0.00390625, %v5655_v55  ;;  %v967_v54 = vmax.f32 %v903_v62, 0.0  ;;  %v904_v19 = vsub.f32 %v776_v35, %v4582_v38  ;;  %v4807_v55 = vpop.xlane.xlu1 %694 }
 0x325   :  { %1811 = vbcast.lane.b32.xlu1 %v4585_v1, 280  ;;  %1823 = vbcast.lane.b32.xlu0 %v4585_v1, 304  ;;  %2871 = vrsqrt.f32 %v1020_v37  ;;  %v5656_v37 = vld [vmem:[#allocation46_spill] sm:$0xff]  ;;  %v907_v49 = vsub.f32 %v779_v34, %v4601_v27  ;;  %v966_v26 = vmax.f32 %v902_v33, 0.0  ;;  %v906_v60 = vsub.f32 %v778_v6, %v4605_v22 }
 0x326   :  { %2873 = vrsqrt.f32 %v1023_v7  ;;  %v780_v51 = vmul.f32 0.00390625, %v5656_v37  ;;  %v5657_v7 = vld [vmem:[#allocation63_spill] sm:$0xff]  ;;  %v782_v53 = vmul.f32 0.00390625, %v5658_v29  ;;  %v969_v38 = vmax.f32 %v905_v46, 0.0 }
 0x327   :  { %2875 = vrsqrt.f32 %v1022_v4  ;;  %v783_v58 = vmul.f32 0.00390625, %v5657_v7  ;;  %v1028_v4 = vadd.f32 1e-05, %v964_v31  ;;  %v785_v59 = vmul.f32 0.00390625, %v5659_v50 }
 0x328   :  { %2877 = vrsqrt.f32 %v1025_v10  ;;  %v909_v10 = vsub.f32 %v781_v25, %v4613_v14  ;;  %v1031_v27 = vadd.f32 1e-05, %v967_v54  ;;  %v968_v20 = vmax.f32 %v904_v19, 0.0 }
 0x329   :  { %1819 = vbcast.lane.b32.xlu1 %v4585_v1, 296  ;;  %1831 = vbcast.lane.b32.xlu0 %v4585_v1, 320  ;;  %2879 = vrsqrt.f32 %v1024_v12  ;;  %v908_v62 = vsub.f32 %v780_v51, %v4617_v5  ;;  %v971_v35 = vmax.f32 %v907_v49, 0.0  ;;  %v911_v22 = vsub.f32 %v783_v58, %v4631_v56  ;;  %v5660_v12 = vld [vmem:[#allocation58_spill] sm:$0xff]  ;;  %v5662_v51 = vld [vmem:[#allocation71_spill] sm:$0xff]  ;;  %v5663_v49 = vld [vmem:[#allocation69_spill] sm:$0xff] }
 0x32a   :  { %2881 = vrsqrt.f32 %v1027_v63  ;;  %v784_v0 = vmul.f32 0.00390625, %v5660_v12  ;;  %v1030_v24 = vadd.f32 1e-05, %v966_v26  ;;  %v970_v34 = vmax.f32 %v906_v60, 0.0  ;;  %v5664_v60 = vld [vmem:[#allocation14_spill] sm:$0xff] }
 0x32b   :  { %2883 = vrsqrt.f32 %v1026_v2  ;;  %v910_v31 = vsub.f32 %v782_v53, %v4624_v11  ;;  %v1033_v33 = vadd.f32 1e-05, %v969_v38  ;;  %v973_v30 = vmax.f32 %v909_v10, 0.0  ;;  %v5665_v10 = vld [vmem:[#allocation59_spill] sm:$0xff]  ;;  %v5666_v12 = vld [vmem:[#allocation70_spill] sm:$0xff] }
 0x32c   :  { %2885 = vrsqrt.f32 %v1029_v8  ;;  %v913_v6 = vsub.f32 %v785_v59, %v4646_v61  ;;  %v5661_v56 = vsub.s32 1, %v3574_v40  ;;  %v1032_v25 = vadd.f32 1e-05, %v968_v20 }
 0x32d   :  { %1827 = vbcast.lane.b32.xlu1 %v4585_v1, 312  ;;  %1839 = vbcast.lane.b32.xlu0 %v4585_v1, 336  ;;  %2887 = vrsqrt.f32 %v1028_v4  ;;  %v972_v2 = vmax.f32 %v908_v62, 0.0  ;;  %v1035_v11 = vadd.f32 1e-05, %v971_v35  ;;  %v975_v19 = vmax.f32 %v911_v22, 0.0 }
 0x32e   :  { %v4699_v17 = vpop.eup %2863  ;;  %v4714_v63 = vrot.slane %v4576_v52, %v5661_v56  ;;  %2889 = vrsqrt.f32 %v1031_v27  ;;  %v912_v37 = vsub.f32 %v784_v0, %v4638_v9  ;;  %v787_v61 = vmul.f32 0.00390625, %v5662_v51  ;;  %v5668_v56 = vld [vmem:[#allocation13_spill] sm:$0xff] }
 0x32f   :  { %v4705_v14 = vpop.eup %2865  ;;  %2891 = vrsqrt.f32 %v1030_v24  ;;  %v1034_v52 = vadd.f32 1e-05, %v970_v34  ;;  %v974_v8 = vmax.f32 %v910_v31, 0.0  ;;  %v786_v7 = vmul.f32 0.00390625, %v5663_v49  ;;  %v5667_v31 = vld [vmem:[#allocation24_spill] sm:$0xff]  ;;  %v4809_v24 = vpop.xlane.xlu0 %691 }
 0x330   :  { %v4708_v5 = vpop.eup %2867  ;;  %2893 = vrsqrt.f32 %v1033_v33  ;;  %v1037_v4 = vadd.f32 1e-05, %v973_v30  ;;  %v977_v26 = vmax.f32 %v913_v6, 0.0  ;;  %v851_v9 = vmul.f32 %v5664_v60, %v5664_v60 }
 0x331   :  { %1835 = vbcast.lane.b32.xlu1 %v4585_v1, 328  ;;  %1847 = vbcast.lane.b32.xlu0 %v4585_v1, 352  ;;  %v4716_v46 = vpop.eup %2869  ;;  %v2188_v53 = vsub.f32 0.0, %v5627_v43  ;;  %2895 = vrsqrt.f32 %v1032_v25  ;;  %v1036_v38 = vadd.f32 1e-05, %v972_v2  ;;  %v850_v50 = vmul.f32 %v5665_v10, %v5665_v10 }
 0x332   :  { %v4719_v54 = vpop.eup %2871  ;;  %2897 = vrsqrt.f32 %v1035_v11  ;;  %v1039_v59 = vadd.f32 1e-05, %v975_v19  ;;  %v976_v27 = vmax.f32 %v912_v37, 0.0  ;;  %v915_v20 = vsub.f32 %v787_v61, %v851_v9  ;;  %v5669_v37 = vld [vmem:[#allocation19_spill] sm:$0xff] }
 0x333   :  { %v4725_v40 = vpop.eup %2873  ;;  %2899 = vrsqrt.f32 %v1034_v52  ;;  %v1038_v35 = vadd.f32 1e-05, %v974_v8  ;;  %v914_v22 = vsub.f32 %v786_v7, %v850_v50  ;;  %v789_v0 = vmul.f32 0.00390625, %v5666_v12 }
 0x334   :  { %v4728_v58 = vpop.eup %2875  ;;  %2901 = vrsqrt.f32 %v1037_v4  ;;  %v1041_v34 = vadd.f32 1e-05, %v977_v26  ;;  %v791_v33 = vmul.f32 0.00390625, %v5667_v31  ;;  %v853_v25 = vmul.f32 %v5668_v56, %v5668_v56  ;;  %v5672_v31 = vld [vmem:[#allocation66_spill] sm:$0xff] }
 0x335   :  { %1843 = vbcast.lane.b32.xlu1 %v4585_v1, 344  ;;  %1855 = vbcast.lane.b32.xlu0 %v4585_v1, 368  ;;  %v4732_v29 = vpop.eup %2877  ;;  %2903 = vrsqrt.f32 %v1036_v38  ;;  %v1040_v11 = vadd.f32 1e-05, %v976_v27  ;;  %v979_v19 = vmax.f32 %v915_v20, 0.0  ;;  %v855_v51 = vmul.f32 %v5669_v37, %v5669_v37 }
 0x336   :  { %v4739_v62 = vpop.eup %2879  ;;  %2905 = vrsqrt.f32 %v1039_v59  ;;  %v2189_v52 = vsub.f32 0.0, %v5630_v3  ;;  %v978_v8 = vmax.f32 %v914_v22, 0.0  ;;  %v917_v49 = vsub.f32 %v789_v0, %v853_v25 }
 0x337   :  { %v4744_v30 = vpop.eup %2881  ;;  %2907 = vrsqrt.f32 %v1038_v35  ;;  %v2190_v26 = vsub.f32 0.0, %v5633_v48  ;;  %v919_v9 = vsub.f32 %v791_v33, %v855_v51  ;;  %v2191_v50 = vsub.f32 0.0, %v5636_v15  ;;  %v5674_v48 = vld [vmem:[#allocation15_spill] sm:$0xff] }
 0x338   :  { %v4750_v2 = vpop.eup %2883  ;;  %2909 = vrsqrt.f32 %v1041_v34  ;;  %v2192_v27 = vsub.f32 0.0, %v5638_v39  ;;  %v2193_v35 = vsub.f32 0.0, %v4005_v28  ;;  %v1043_v22 = vadd.f32 1e-05, %v979_v19  ;;  %v5673_v19 = vld [vmem:[#allocation60_spill] sm:$0xff] }
 0x339   :  { %1851 = vbcast.lane.b32.xlu1 %v4585_v1, 360  ;;  %1933 = vbcast.lane.b32.xlu0 %v4714_v63, 256  ;;  %v4756_v61 = vpop.eup %2885  ;;  %2911 = vrsqrt.f32 %v1040_v11  ;;  %v2194_v15 = vsub.f32 0.0, %v4041_v42  ;;  %v1042_v12 = vadd.f32 1e-05, %v978_v8  ;;  %v981_v0 = vmax.f32 %v917_v49, 0.0 }
 0x33a   :  { %5670 = vst [vmem:[#allocation76_spill] sm:$0xff] %v4756_v61  ;;  %v4759_v7 = vpop.eup %2887  ;;  %v2195_v33 = vsub.f32 0.0, %v5672_v31  ;;  %v983_v25 = vmax.f32 %v919_v9, 0.0  ;;  %v2196_v51 = vsub.f32 0.0, %v5673_v19  ;;  %v2197_v59 = vsub.f32 0.0, %v5674_v48  ;;  %v5675_v42 = vld [vmem:[#allocation12_spill] sm:$0xff] }
 0x33b   :  { %v4767_v3 = vpop.eup %2889  ;;  %v2198_v8 = vsub.f32 0.0, %v5675_v42  ;;  %v5676_v39 = vld [vmem:[#allocation16_spill] sm:$0xff]  ;;  %v5677_v31 = vld [vmem:[#allocation17_spill] sm:$0xff]  ;;  %2913 = vrsqrt.f32 %v1043_v22  ;;  %v5679_v19 = vld [vmem:[#allocation18_spill] sm:$0xff]  ;;  %v1045_v48 = vadd.f32 1e-05, %v981_v0  ;;  %v4826_v56 = vmul.f32 %v4716_v46, %v2192_v27 }
 0x33c   :  { %5671 = vst [vmem:[#allocation77_spill] sm:$0xff] %v4767_v3  ;;  %v4775_v34 = vpop.eup %2891  ;;  %v2199_v38 = vsub.f32 0.0, %v5676_v39  ;;  %v2200_v6 = vsub.f32 0.0, %v5677_v31  ;;  %2915 = vrsqrt.f32 %v1042_v12  ;;  %v4798_v42 = vmul.f32 %v5679_v19, %v5679_v19  ;;  %v5681_v39 = vld [vmem:[#allocation22_spill] sm:$0xff]  ;;  %v5682_v22 = vld [vmem:[#allocation23_spill] sm:$0xff] }
 0x33d   :  { %1859 = vbcast.lane.b32.xlu1 %v4585_v1, 376  ;;  %1941 = vbcast.lane.b32.xlu0 %v4714_v63, 272  ;;  %v4780_v11 = vpop.eup %2893  ;;  %v2201_v28 = vsub.f32 0.0, %v5681_v39  ;;  %v1047_v31 = vadd.f32 1e-05, %v983_v25  ;;  %v4805_v1 = vmul.f32 %v5682_v22, %v5682_v22  ;;  %v2252_v12 = vmul.f32 %v4696_v21, %v2188_v53  ;;  %5685 = vst [vmem:[#allocation78_spill] sm:$0xff] %v4826_v56 }
 0x33e   :  { %v4786_v49 = vpop.eup %2895  ;;  %5680 = vst [vmem:[#allocation83_spill] sm:$0xff] %v4798_v42  ;;  %v5684_v20 = vsub.f32 0.0, %v5628_v45  ;;  %v4820_v25 = vmul.f32 %v4708_v5, %v2189_v52  ;;  %v4823_v39 = vmul.f32 %v4705_v14, %v2190_v26  ;;  %v2202_v43 = vsub.f32 0.0, %v5648_v18 }
 0x33f   :  { %v4793_v9 = vpop.eup %2897  ;;  %v4834_v45 = vmul.f32 %v4719_v54, %v2191_v50  ;;  %v4837_v53 = vmul.f32 %v4728_v58, %v2193_v35  ;;  %v4840_v52 = vmul.f32 %v4725_v40, %v2194_v15  ;;  %2917 = vrsqrt.f32 %v1045_v48 }
 0x340   :  { %5678 = vst [vmem:[#allocation75_spill] sm:$0xff] %v4793_v9  ;;  %v4800_v4 = vpop.eup %2899  ;;  %v2251_v19 = vmul.f32 %v4699_v17, %v5684_v20  ;;  %v4845_v27 = vmul.f32 %v4739_v62, %v2195_v33  ;;  %v4848_v18 = vmul.f32 %v4732_v29, %v2196_v51  ;;  %v4851_v20 = vmul.f32 %v4744_v30, %v2198_v8 }
 0x341   :  { %1937 = vbcast.lane.b32.xlu1 %v4714_v63, 264  ;;  %1949 = vbcast.lane.b32.xlu0 %v4714_v63, 288  ;;  %v4814_v0 = vpop.eup %2901  ;;  %5686 = vst [vmem:[#allocation87_spill] sm:$0xff] %v4840_v52  ;;  %2919 = vrsqrt.f32 %v1047_v31  ;;  %v4856_v15 = vmul.f32 %v4750_v2, %v2197_v59  ;;  %v4859_v52 = vmul.f32 %v4759_v7, %v2199_v38  ;;  %v5692_v38 = vld [vmem:[#allocation73_spill] sm:$0xff] }
 0x342   :  { %5683 = vst [vmem:[#allocation82_spill] sm:$0xff] %v4814_v0  ;;  %v4828_v42 = vpop.eup %2903  ;;  %5687 = vst [vmem:[#allocation42_spill] sm:$0xff] %v4848_v18  ;;  %v4862_v33 = vmul.f32 %v4756_v61, %v2200_v6  ;;  %v4867_v8 = vmul.f32 %v4775_v34, %v2201_v28  ;;  %v4870_v31 = vmul.f32 %v4767_v3, %v2202_v43  ;;  %v5693_v59 = vsub.f32 0.0, %v5692_v38 }
 0x343   :  { %v4842_v26 = vpop.eup %2905  ;;  %5688 = vst [vmem:[#allocation86_spill] sm:$0xff] %v4851_v20  ;;  %v5696_v28 = vsub.f32 0.0, %v5631_v44  ;;  %v5698_v38 = vsub.f32 0.0, %v5632_v23  ;;  %v5704_v23 = vsub.f32 0.0, %v3994_v32  ;;  %v5708_v32 = vsub.f32 0.0, %v4032_v57 }
 0x344   :  { %v4853_v50 = vpop.eup %2907  ;;  %5689 = vst [vmem:[#allocation36_spill] sm:$0xff] %v4862_v33  ;;  %5691 = vst [vmem:[#allocation47_spill] sm:$0xff] %v4870_v31  ;;  %v4878_v6 = vmul.f32 %v4786_v49, %v5693_v59  ;;  %v5694_v33 = vsub.f32 0.0, %v5629_v41  ;;  %v5699_v41 = vsub.f32 0.0, %v5634_v16  ;;  %v5706_v16 = vsub.f32 0.0, %v4063_v13 }
 0x345   :  { %1945 = vbcast.lane.b32.xlu1 %v4714_v63, 280  ;;  %1957 = vbcast.lane.b32.xlu0 %v4714_v63, 304  ;;  %v4864_v48 = vpop.eup %2909  ;;  %v4888_v43 = vmul.f32 %v4793_v9, %v5696_v28  ;;  %v4897_v59 = vmul.f32 %v4800_v4, %v5698_v38  ;;  %v5701_v28 = vsub.f32 0.0, %v5635_v47  ;;  %v4917_v38 = vmul.f32 %v4842_v26, %v5704_v23  ;;  %v2939_v23 = vld [vmem:[#allocation2 + $0x10] sm:$0xff]  ;;  %v2942_v9 = vld [vmem:[#allocation2 + $0x8] sm:$0xff] }
 0x346   :  { %5690 = vst [vmem:[#allocation54_spill] sm:$0xff] %v4864_v48  ;;  %v4883_v61 = vmul.f32 %v4780_v11, %v5694_v33  ;;  %v4890_v20 = vpop.eup %2911  ;;  %v4902_v33 = vmul.f32 %v4814_v0, %v5699_v41  ;;  %v4922_v41 = vmul.f32 %v4864_v48, %v5706_v16  ;;  %v4940_v57 = vmul.f32 0.00390625, %v4809_v24 }
 0x347   :  { %5697 = vst [vmem:[#allocation30_spill] sm:$0xff] %v4888_v43  ;;  %v4907_v43 = vmul.f32 %v4828_v42, %v5701_v28  ;;  %5705 = vst [vmem:[#allocation27_spill] sm:$0xff] %v4917_v38 }
 0x348   :  { %5695 = vst [vmem:[#allocation21_spill] sm:$0xff] %v4883_v61  ;;  %5700 = vst [vmem:[#allocation31_spill] sm:$0xff] %v4902_v33  ;;  %v4932_v13 = vpop.eup %2913 }
 0x349   :  { %1953 = vbcast.lane.b32.xlu1 %v4714_v63, 296  ;;  %1965 = vbcast.lane.b32.xlu0 %v4714_v63, 320  ;;  %5702 = vst [vmem:[#allocation26_spill] sm:$0xff] %v4907_v43  ;;  %5707 = vst [vmem:[#allocation20_spill] sm:$0xff] %v4922_v41 }
 0x34d   :  { %1961 = vbcast.lane.b32.xlu1 %v4714_v63, 312  ;;  %1973 = vbcast.lane.b32.xlu0 %v4714_v63, 336 }
 0x34f   :  { %v1737_v35 = vpop.permute.xlu1 %1736  ;;  %v1733_v56 = vpop.permute.xlu0 %1732 }
 0x350   :  { %v1996_v51 = vsub.f32 1.0, %v1737_v35  ;;  %v1995_v18 = vsub.f32 1.0, %v1733_v56 }
 0x351   :  { %1969 = vbcast.lane.b32.xlu1 %v4714_v63, 328  ;;  %1981 = vbcast.lane.b32.xlu0 %v4714_v63, 352 }
 0x352   :  { %v2060_v31 = vmul.f32 %v4696_v21, %v1996_v51  ;;  %v2059_v3 = vmul.f32 %v4699_v17, %v1995_v18  ;;  %v5703_v21 = vsub.f32 0.0, %v5637_v36  ;;  %v2316_v36 = vmul.f32 %v2252_v12, %v1996_v51 }
 0x353   :  { %v1741_v44 = vpop.permute.xlu1 %1740  ;;  %v1749_v61 = vpop.permute.xlu0 %1748  ;;  %v2315_v43 = vmul.f32 %v2251_v19, %v1995_v18  ;;  %v4937_v18 = vmul.f32 0.00390625, %v4807_v55 }
 0x354   :  { %v4912_v17 = vmul.f32 %v4853_v50, %v5703_v21  ;;  %v2124_v33 = vadd.f32 %v2060_v31, %v1737_v35  ;;  %v2123_v47 = vadd.f32 %v2059_v3, %v1733_v56  ;;  %v1997_v0 = vsub.f32 1.0, %v1741_v44  ;;  %v2940_v56 = vld [vmem:[#allocation2 + $0x18] sm:$0xff]  ;;  %v2941_v31 = vld [vmem:[#allocation2] sm:$0xff]  ;;  %v4934_v19 = vpop.eup %2915 }
 0x355   :  { %v1999_v28 = vsub.f32 1.0, %v1749_v61  ;;  %1977 = vbcast.lane.b32.xlu1 %v4714_v63, 344  ;;  %1989 = vbcast.lane.b32.xlu0 %v4714_v63, 368  ;;  %v4930_v21 = vmul.f32 %v4890_v20, %v5708_v32 }
 0x356   :  { %v2381_v35 = vmul.f32 %v2939_v23, %v2124_v33  ;;  %v2382_v3 = vmul.f32 %v2940_v56, %v2124_v33  ;;  %v2379_v16 = vmul.f32 %v2941_v31, %v2123_v47  ;;  %v2380_v12 = vmul.f32 %v2942_v9, %v2123_v47 }
 0x357   :  { %v2061_v51 = vmul.f32 %v4708_v5, %v1997_v0  ;;  %v2063_v32 = vmul.f32 %v4719_v54, %v1999_v28  ;;  %v1745_v22 = vpop.permute.xlu1 %1744  ;;  %v1757_v23 = vpop.permute.xlu0 %1756  ;;  %v2317_v5 = vmul.f32 %v4820_v25, %v1997_v0  ;;  %v2319_v55 = vmul.f32 %v4834_v45, %v1999_v28  ;;  %v2946_v25 = vld [vmem:[#allocation2 + $0x48] sm:$0xff] }
 0x358   :  { %v2509_v41 = vadd.f32 %v2381_v35, %v2316_v36  ;;  %v2510_v33 = vadd.f32 %v2382_v3, %v2316_v36  ;;  %v2507_v56 = vadd.f32 %v2379_v16, %v2315_v43  ;;  %v2508_v31 = vadd.f32 %v2380_v12, %v2315_v43  ;;  %v2944_v35 = vld [vmem:[#allocation2 + $0x28] sm:$0xff]  ;;  %v2945_v16 = vld [vmem:[#allocation2 + $0x40] sm:$0xff] }
 0x359   :  { %v2125_v48 = vadd.f32 %v2061_v51, %v1741_v44  ;;  %v2127_v9 = vadd.f32 %v2063_v32, %v1749_v61  ;;  %v1998_v47 = vsub.f32 1.0, %v1745_v22  ;;  %v2001_v38 = vsub.f32 1.0, %v1757_v23  ;;  %1985 = vbcast.lane.b32.xlu1 %v4714_v63, 360  ;;  %v4957_v44 = vpop.eup %2917  ;;  %v5711_v51 = vld [vmem:[#allocation83_spill] sm:$0xff] }
 0x35a   :  { %2637 = vst [vmem:[#allocation8 + $0x10] sm:$0xff] %v2509_v41  ;;  %2638 = vst [vmem:[#allocation8 + $0x18] sm:$0xff] %v2510_v33  ;;  %v5709_v54 = vsub.f32 0.0, %v5665_v10  ;;  %v5710_v43 = vsub.f32 0.0, %v5664_v60  ;;  %v2943_v41 = vld [vmem:[#allocation2 + $0x20] sm:$0xff]  ;;  %v4959_v12 = vpop.eup %2919  ;;  %v951_v60 = vsub.f32 %v4937_v18, %v4805_v1  ;;  %v950_v32 = vsub.f32 %v4940_v57, %v5711_v51  ;;  %v5712_v57 = vld [vmem:[#allocation13_spill] sm:$0xff] }
 0x35b   :  { %2635 = vst [vmem:[#allocation8] sm:$0xff] %v2507_v56  ;;  %2636 = vst [vmem:[#allocation8 + $0x8] sm:$0xff] %v2508_v31  ;;  %v2383_v36 = vmul.f32 %v2943_v41, %v2125_v48  ;;  %v2384_v3 = vmul.f32 %v2944_v35, %v2125_v48  ;;  %v2387_v0 = vmul.f32 %v2945_v16, %v2127_v9  ;;  %v1753_v28 = vpop.permute.xlu1 %1752  ;;  %v1765_v10 = vpop.permute.xlu0 %1764 }
 0x35c   :  { %v4950_v24 = vmul.f32 %v4934_v19, %v5709_v54  ;;  %v4955_v61 = vmul.f32 %v4932_v13, %v5710_v43  ;;  %v2388_v45 = vmul.f32 %v2946_v25, %v2127_v9  ;;  %v2062_v33 = vmul.f32 %v4705_v14, %v1998_v47  ;;  %v2949_v25 = vld [vmem:[#allocation2 + $0x60] sm:$0xff] }
 0x35d   :  { %v2065_v56 = vmul.f32 %v4728_v58, %v2001_v38  ;;  %v2511_v31 = vadd.f32 %v2383_v36, %v2317_v5  ;;  %v2512_v48 = vadd.f32 %v2384_v3, %v2317_v5  ;;  %v2515_v54 = vadd.f32 %v2387_v0, %v2319_v55  ;;  %1993 = vbcast.lane.b32.xlu1 %v4714_v63, 376  ;;  %v2948_v3 = vld [vmem:[#allocation2 + $0x38] sm:$0xff] }
 0x35e   :  { %v2516_v43 = vadd.f32 %v2388_v45, %v2319_v55  ;;  %v2126_v9 = vadd.f32 %v2062_v33, %v1745_v22  ;;  %v2000_v35 = vsub.f32 1.0, %v1753_v28  ;;  %v2003_v16 = vsub.f32 1.0, %v1765_v10 }
 0x35f   :  { %v2129_v41 = vadd.f32 %v2065_v56, %v1757_v23  ;;  %2639 = vst [vmem:[#allocation8 + $0x20] sm:$0xff] %v2511_v31  ;;  %2640 = vst [vmem:[#allocation8 + $0x28] sm:$0xff] %v2512_v48  ;;  %v2318_v1 = vmul.f32 %v4823_v39, %v1998_v47  ;;  %v2321_v14 = vmul.f32 %v4837_v53, %v2001_v38  ;;  %v1761_v18 = vpop.permute.xlu1 %1760  ;;  %v1773_v58 = vpop.permute.xlu0 %1772  ;;  %v5713_v5 = vsub.f32 0.0, %v5712_v57  ;;  %v2947_v23 = vld [vmem:[#allocation2 + $0x30] sm:$0xff]  ;;  %v2950_v47 = vld [vmem:[#allocation2 + $0x68] sm:$0xff] }
 0x360   :  { %2643 = vst [vmem:[#allocation8 + $0x40] sm:$0xff] %v2515_v54  ;;  %2644 = vst [vmem:[#allocation8 + $0x48] sm:$0xff] %v2516_v43  ;;  %v5714_v63 = vsub.f32 0.0, %v5669_v37  ;;  %v2385_v36 = vmul.f32 %v2947_v23, %v2126_v9  ;;  %v2386_v0 = vmul.f32 %v2948_v3, %v2126_v9  ;;  %v4980_v38 = vmax.f32 %v951_v60, 0.0  ;;  %v5715_v60 = vld [vmem:[#allocation78_spill] sm:$0xff]  ;;  %v2954_v3 = vld [vmem:[#allocation2 + $0x88] sm:$0xff] }
 0x361   :  { %v4973_v55 = vmul.f32 %v4957_v44, %v5713_v5  ;;  %v2391_v39 = vmul.f32 %v2949_v25, %v2129_v41  ;;  %v2392_v53 = vmul.f32 %v2950_v47, %v2129_v41  ;;  %v4982_v45 = vmax.f32 %v950_v32, 0.0  ;;  %v2951_v23 = vld [vmem:[#allocation2 + $0x50] sm:$0xff] }
 0x362   :  { %v4978_v22 = vmul.f32 %v4959_v12, %v5714_v63  ;;  %v2064_v51 = vmul.f32 %v4716_v46, %v2000_v35  ;;  %v2067_v33 = vmul.f32 %v4739_v62, %v2003_v16  ;;  %v2513_v37 = vadd.f32 %v2385_v36, %v2318_v1  ;;  %v2952_v36 = vld [vmem:[#allocation2 + $0x58] sm:$0xff] }
 0x363   :  { %v2514_v56 = vadd.f32 %v2386_v0, %v2318_v1  ;;  %v2519_v31 = vadd.f32 %v2391_v39, %v2321_v14  ;;  %v2520_v48 = vadd.f32 %v2392_v53, %v2321_v14  ;;  %v2002_v57 = vsub.f32 1.0, %v1761_v18  ;;  %v1769_v5 = vpop.permute.xlu1 %1768  ;;  %v1781_v63 = vpop.permute.xlu0 %1780  ;;  %v5716_v39 = vld [vmem:[#allocation87_spill] sm:$0xff] }
 0x364   :  { %v2128_v54 = vadd.f32 %v2064_v51, %v1753_v28  ;;  %v2131_v43 = vadd.f32 %v2067_v33, %v1765_v10  ;;  %v2005_v9 = vsub.f32 1.0, %v1773_v58  ;;  %2641 = vst [vmem:[#allocation8 + $0x30] sm:$0xff] %v2513_v37  ;;  %v2320_v32 = vmul.f32 %v5715_v60, %v2000_v35  ;;  %v2953_v28 = vld [vmem:[#allocation2 + $0x80] sm:$0xff]  ;;  %v5717_v60 = vld [vmem:[#allocation42_spill] sm:$0xff] }
 0x365   :  { %2642 = vst [vmem:[#allocation8 + $0x38] sm:$0xff] %v2514_v56  ;;  %2647 = vst [vmem:[#allocation8 + $0x60] sm:$0xff] %v2519_v31  ;;  %v2323_v46 = vmul.f32 %v4845_v27, %v2003_v16  ;;  %v2004_v41 = vsub.f32 1.0, %v1769_v5  ;;  %v2007_v62 = vsub.f32 1.0, %v1781_v63  ;;  %v2066_v25 = vmul.f32 %v4725_v40, %v2002_v57 }
 0x366   :  { %2648 = vst [vmem:[#allocation8 + $0x68] sm:$0xff] %v2520_v48  ;;  %v2389_v1 = vmul.f32 %v2951_v23, %v2128_v54  ;;  %v2390_v14 = vmul.f32 %v2952_v36, %v2128_v54  ;;  %v2395_v10 = vmul.f32 %v2953_v28, %v2131_v43  ;;  %v2396_v0 = vmul.f32 %v2954_v3, %v2131_v43  ;;  %v5718_v28 = vld [vmem:[#allocation86_spill] sm:$0xff] }
 0x367   :  { %v2322_v47 = vmul.f32 %v5716_v39, %v2002_v57  ;;  %v2069_v53 = vmul.f32 %v4750_v2, %v2005_v9  ;;  %v2325_v35 = vmul.f32 %v4856_v15, %v2005_v9  ;;  %v1777_v37 = vpop.permute.xlu1 %1776  ;;  %v1789_v56 = vpop.permute.xlu0 %1788  ;;  %v2130_v31 = vadd.f32 %v2066_v25, %v1761_v18  ;;  %v2955_v9 = vld [vmem:[#allocation2 + $0x70] sm:$0xff]  ;;  %v2957_v18 = vld [vmem:[#allocation2 + $0xa0] sm:$0xff] }
 0x368   :  { %v2517_v51 = vadd.f32 %v2389_v1, %v2320_v32  ;;  %v2518_v27 = vadd.f32 %v2390_v14, %v2320_v32  ;;  %v2523_v16 = vadd.f32 %v2395_v10, %v2323_v46  ;;  %v2524_v33 = vadd.f32 %v2396_v0, %v2323_v46  ;;  %v2956_v46 = vld [vmem:[#allocation2 + $0x78] sm:$0xff]  ;;  %v2958_v1 = vld [vmem:[#allocation2 + $0xa8] sm:$0xff]  ;;  %v2959_v39 = vld [vmem:[#allocation2 + $0x90] sm:$0xff] }
 0x369   :  { %v2133_v48 = vadd.f32 %v2069_v53, %v1773_v58  ;;  %v2068_v54 = vmul.f32 %v4732_v29, %v2004_v41  ;;  %v2324_v43 = vmul.f32 %v5717_v60, %v2004_v41  ;;  %v2071_v40 = vmul.f32 %v4759_v7, %v2007_v62 }
 0x36a   :  { %2645 = vst [vmem:[#allocation8 + $0x50] sm:$0xff] %v2517_v51  ;;  %2646 = vst [vmem:[#allocation8 + $0x58] sm:$0xff] %v2518_v27  ;;  %v2327_v2 = vmul.f32 %v4859_v52, %v2007_v62  ;;  %v2006_v15 = vsub.f32 1.0, %v1777_v37  ;;  %v2009_v57 = vsub.f32 1.0, %v1789_v56  ;;  %v2393_v32 = vmul.f32 %v2955_v9, %v2130_v31  ;;  %v2960_v51 = vld [vmem:[#allocation2 + $0x98] sm:$0xff] }
 0x36b   :  { %2651 = vst [vmem:[#allocation8 + $0x80] sm:$0xff] %v2523_v16  ;;  %2652 = vst [vmem:[#allocation8 + $0x88] sm:$0xff] %v2524_v33  ;;  %v2394_v23 = vmul.f32 %v2956_v46, %v2130_v31  ;;  %v2399_v58 = vmul.f32 %v2957_v18, %v2133_v48  ;;  %v2400_v29 = vmul.f32 %v2958_v1, %v2133_v48  ;;  %v1785_v3 = vpop.permute.xlu1 %1784  ;;  %v4998_v7 = vpop.permute.xlu0 %1866  ;;  %v2961_v16 = vld [vmem:[#allocation2 + $0xc0] sm:$0xff]  ;;  %v2962_v31 = vld [vmem:[#allocation2 + $0xc8] sm:$0xff] }
 0x36c   :  { %v2132_v36 = vadd.f32 %v2068_v54, %v1769_v5  ;;  %v2135_v41 = vadd.f32 %v2071_v40, %v1781_v63  ;;  %v2070_v14 = vmul.f32 %v4744_v30, %v2006_v15  ;;  %v2326_v10 = vmul.f32 %v5718_v28, %v2006_v15  ;;  %v5719_v1 = vld [vmem:[#allocation76_spill] sm:$0xff]  ;;  %v2966_v28 = vld [vmem:[#allocation2 + $0xe8] sm:$0xff] }
 0x36d   :  { %v2521_v52 = vadd.f32 %v2393_v32, %v2322_v47  ;;  %v2522_v62 = vadd.f32 %v2394_v23, %v2322_v47  ;;  %v2527_v0 = vadd.f32 %v2399_v58, %v2325_v35  ;;  %v2528_v25 = vadd.f32 %v2400_v29, %v2325_v35  ;;  %v2963_v32 = vld [vmem:[#allocation2 + $0xb0] sm:$0xff]  ;;  %v2964_v23 = vld [vmem:[#allocation2 + $0xb8] sm:$0xff] }
 0x36e   :  { %v2397_v53 = vmul.f32 %v2959_v39, %v2132_v36  ;;  %v2398_v27 = vmul.f32 %v2960_v51, %v2132_v36  ;;  %v2403_v33 = vmul.f32 %v2961_v16, %v2135_v41  ;;  %v2404_v5 = vmul.f32 %v2962_v31, %v2135_v41  ;;  %v2965_v41 = vld [vmem:[#allocation2 + $0xe0] sm:$0xff] }
 0x36f   :  { %2649 = vst [vmem:[#allocation8 + $0x70] sm:$0xff] %v2521_v52  ;;  %2650 = vst [vmem:[#allocation8 + $0x78] sm:$0xff] %v2522_v62  ;;  %v2134_v30 = vadd.f32 %v2070_v14, %v1777_v37  ;;  %v2073_v63 = vmul.f32 %v4775_v34, %v2009_v57  ;;  %v2329_v48 = vmul.f32 %v4867_v8, %v2009_v57  ;;  %v2008_v47 = vsub.f32 1.0, %v1785_v3  ;;  %v1793_v15 = vpop.permute.xlu1 %1792  ;;  %v1875_v9 = vpop.permute.xlu0 %1874  ;;  %v5720_v34 = vld [vmem:[#allocation36_spill] sm:$0xff] }
 0x370   :  { %2655 = vst [vmem:[#allocation8 + $0xa0] sm:$0xff] %v2527_v0  ;;  %2656 = vst [vmem:[#allocation8 + $0xa8] sm:$0xff] %v2528_v25  ;;  %v2525_v54 = vadd.f32 %v2397_v53, %v2324_v43  ;;  %v2526_v35 = vadd.f32 %v2398_v27, %v2324_v43  ;;  %v2531_v60 = vadd.f32 %v2403_v33, %v2327_v2  ;;  %v2027_v37 = vsub.f32 1.0, %v4998_v7  ;;  %v5722_v25 = vld [vmem:[#allocation38_spill] sm:$0xff]  ;;  %v5723_v53 = vld [vmem:[#allocation77_spill] sm:$0xff] }
 0x371   :  { %v2532_v40 = vadd.f32 %v2404_v5, %v2327_v2  ;;  %v2401_v46 = vmul.f32 %v2963_v32, %v2134_v30  ;;  %v2402_v18 = vmul.f32 %v2964_v23, %v2134_v30  ;;  %v2137_v58 = vadd.f32 %v2073_v63, %v1789_v56  ;;  %v5721_v56 = vld [vmem:[#allocation43_spill] sm:$0xff] }
 0x372   :  { %v2072_v29 = vmul.f32 %v5719_v1, %v2008_v47  ;;  %2653 = vst [vmem:[#allocation8 + $0x90] sm:$0xff] %v2525_v54  ;;  %2654 = vst [vmem:[#allocation8 + $0x98] sm:$0xff] %v2526_v35  ;;  %v2328_v8 = vmul.f32 %v5720_v34, %v2008_v47  ;;  %v2010_v43 = vsub.f32 1.0, %v1793_v15  ;;  %v2029_v57 = vsub.f32 1.0, %v1875_v9  ;;  %v5724_v5 = vld [vmem:[#allocation47_spill] sm:$0xff]  ;;  %v2967_v47 = vld [vmem:[#allocation2 + $0xd0] sm:$0xff] }
 0x373   :  { %2659 = vst [vmem:[#allocation8 + $0xc0] sm:$0xff] %v2531_v60  ;;  %2660 = vst [vmem:[#allocation8 + $0xc8] sm:$0xff] %v2532_v40  ;;  %v2529_v2 = vadd.f32 %v2401_v46, %v2326_v10  ;;  %v2530_v36 = vadd.f32 %v2402_v18, %v2326_v10  ;;  %v2407_v14 = vmul.f32 %v2965_v41, %v2137_v58  ;;  %v1871_v27 = vpop.permute.xlu1 %1870  ;;  %v5008_v16 = vpop.permute.xlu0 %1882  ;;  %v5725_v30 = vld [vmem:[#allocation55_spill] sm:$0xff]  ;;  %v5726_v46 = vld [vmem:[#allocation49_spill] sm:$0xff] }
 0x374   :  { %v2408_v52 = vmul.f32 %v2966_v28, %v2137_v58  ;;  %v2136_v62 = vadd.f32 %v2072_v29, %v1785_v3  ;;  %v2091_v0 = vmul.f32 %v5721_v56, %v2027_v37  ;;  %v2347_v39 = vmul.f32 %v5722_v25, %v2027_v37  ;;  %v2968_v3 = vld [vmem:[#allocation2 + $0xd8] sm:$0xff]  ;;  %v2969_v29 = vld [vmem:[#allocation2 + $0x200] sm:$0xff]  ;;  %v2970_v37 = vld [vmem:[#allocation2 + $0x208] sm:$0xff] }
 0x375   :  { %v2074_v51 = vmul.f32 %v5723_v53, %v2010_v43  ;;  %2657 = vst [vmem:[#allocation8 + $0xb0] sm:$0xff] %v2529_v2  ;;  %2658 = vst [vmem:[#allocation8 + $0xb8] sm:$0xff] %v2530_v36  ;;  %v2535_v33 = vadd.f32 %v2407_v14, %v2329_v48  ;;  %v2330_v10 = vmul.f32 %v5724_v5, %v2010_v43  ;;  %v2028_v18 = vsub.f32 1.0, %v1871_v27  ;;  %v2971_v41 = vld [vmem:[#allocation2 + $0xf0] sm:$0xff]  ;;  %v2973_v28 = vld [vmem:[#allocation2 + $0x220] sm:$0xff] }
 0x376   :  { %v2536_v31 = vadd.f32 %v2408_v52, %v2329_v48  ;;  %v2093_v63 = vmul.f32 %v5725_v30, %v2029_v57  ;;  %v2405_v54 = vmul.f32 %v2967_v47, %v2136_v62  ;;  %v2406_v35 = vmul.f32 %v2968_v3, %v2136_v62  ;;  %v5728_v30 = vld [vmem:[#allocation44_spill] sm:$0xff]  ;;  %v5729_v47 = vld [vmem:[#allocation67_spill] sm:$0xff] }
 0x377   :  { %v2155_v60 = vadd.f32 %v2091_v0, %v4998_v7  ;;  %v2138_v40 = vadd.f32 %v2074_v51, %v1793_v15  ;;  %2663 = vst [vmem:[#allocation8 + $0xe0] sm:$0xff] %v2535_v33  ;;  %v2349_v23 = vmul.f32 %v5726_v46, %v2029_v57  ;;  %v2031_v58 = vsub.f32 1.0, %v5008_v16  ;;  %v1879_v2 = vpop.permute.xlu1 %1878  ;;  %v1891_v36 = vpop.permute.xlu0 %1890  ;;  %v2972_v7 = vld [vmem:[#allocation2 + $0xf8] sm:$0xff]  ;;  %v5727_v0 = vld [vmem:[#allocation29_spill] sm:$0xff]  ;;  %v2975_v46 = vld [vmem:[#allocation2 + $0x210] sm:$0xff] }
 0x378   :  { %2664 = vst [vmem:[#allocation8 + $0xe8] sm:$0xff] %v2536_v31  ;;  %v2157_v32 = vadd.f32 %v2093_v63, %v1875_v9  ;;  %v2533_v48 = vadd.f32 %v2405_v54, %v2328_v8  ;;  %v2534_v1 = vadd.f32 %v2406_v35, %v2328_v8  ;;  %v2974_v9 = vld [vmem:[#allocation2 + $0x228] sm:$0xff]  ;;  %v5016_v57 = vadd.f32 1e-05, %v4980_v38 }
 0x379   :  { %v2443_v34 = vmul.f32 %v2969_v29, %v2155_v60  ;;  %v2444_v43 = vmul.f32 %v2970_v37, %v2155_v60  ;;  %v2409_v14 = vmul.f32 %v2971_v41, %v2138_v40  ;;  %v2410_v15 = vmul.f32 %v2972_v7, %v2138_v40 }
 0x37a   :  { %v2447_v52 = vmul.f32 %v2973_v28, %v2157_v32  ;;  %v2448_v62 = vmul.f32 %v2974_v9, %v2157_v32  ;;  %2661 = vst [vmem:[#allocation8 + $0xd0] sm:$0xff] %v2533_v48  ;;  %2662 = vst [vmem:[#allocation8 + $0xd8] sm:$0xff] %v2534_v1  ;;  %v2092_v25 = vmul.f32 %v5727_v0, %v2028_v18  ;;  %v2030_v3 = vsub.f32 1.0, %v1879_v2  ;;  %v2976_v48 = vld [vmem:[#allocation2 + $0x218] sm:$0xff]  ;;  %v2977_v9 = vld [vmem:[#allocation2 + $0x240] sm:$0xff] }
 0x37b   :  { %v2571_v8 = vadd.f32 %v2443_v34, %v2347_v39  ;;  %v2572_v56 = vadd.f32 %v2444_v43, %v2347_v39  ;;  %v2537_v53 = vadd.f32 %v2409_v14, %v2330_v10  ;;  %v2538_v51 = vadd.f32 %v2410_v15, %v2330_v10  ;;  %v1887_v38 = vpop.permute.xlu1 %1886  ;;  %v1899_v35 = vpop.permute.xlu0 %1898  ;;  %v5730_v39 = vld [vmem:[#allocation61_spill] sm:$0xff]  ;;  %v5731_v1 = vld [vmem:[#allocation39_spill] sm:$0xff]  ;;  %v5732_v34 = vld [vmem:[#allocation56_spill] sm:$0xff] }
 0x37c   :  { %v2575_v33 = vadd.f32 %v2447_v52, %v2349_v23  ;;  %v2576_v31 = vadd.f32 %v2448_v62, %v2349_v23  ;;  %v2156_v5 = vadd.f32 %v2092_v25, %v1871_v27  ;;  %v2348_v63 = vmul.f32 %v5728_v30, %v2028_v18  ;;  %v5733_v43 = vld [vmem:[#allocation65_spill] sm:$0xff]  ;;  %v5734_v14 = vld [vmem:[#allocation79_spill] sm:$0xff]  ;;  %v5735_v15 = vld [vmem:[#allocation50_spill] sm:$0xff] }
 0x37d   :  { %2699 = vst [vmem:[#allocation8 + $0x200] sm:$0xff] %v2571_v8  ;;  %2700 = vst [vmem:[#allocation8 + $0x208] sm:$0xff] %v2572_v56  ;;  %v2095_v54 = vmul.f32 %v5729_v47, %v2031_v58  ;;  %v2351_v60 = vmul.f32 %v5730_v39, %v2031_v58  ;;  %v2033_v40 = vsub.f32 1.0, %v1891_v36  ;;  %v2032_v10 = vsub.f32 1.0, %v1887_v38  ;;  %v2978_v8 = vld [vmem:[#allocation2 + $0x248] sm:$0xff]  ;;  %v2979_v39 = vld [vmem:[#allocation2 + $0x230] sm:$0xff] }
 0x37e   :  { %2665 = vst [vmem:[#allocation8 + $0xf0] sm:$0xff] %v2537_v53  ;;  %2666 = vst [vmem:[#allocation8 + $0xf8] sm:$0xff] %v2538_v51  ;;  %v2035_v32 = vsub.f32 1.0, %v1899_v35  ;;  %v2445_v23 = vmul.f32 %v2975_v46, %v2156_v5  ;;  %v2446_v27 = vmul.f32 %v2976_v48, %v2156_v5  ;;  %v2094_v29 = vmul.f32 %v5731_v1, %v2030_v3  ;;  %v5737_v47 = vld [vmem:[#allocation85_spill] sm:$0xff]  ;;  %v2980_v46 = vld [vmem:[#allocation2 + $0x238] sm:$0xff] }
 0x37f   :  { %2703 = vst [vmem:[#allocation8 + $0x220] sm:$0xff] %v2575_v33  ;;  %2704 = vst [vmem:[#allocation8 + $0x228] sm:$0xff] %v2576_v31  ;;  %v2159_v18 = vadd.f32 %v2095_v54, %v5008_v16  ;;  %v2350_v37 = vmul.f32 %v5732_v34, %v2030_v3  ;;  %v2097_v41 = vmul.f32 %v5733_v43, %v2033_v40  ;;  %v1895_v0 = vpop.permute.xlu1 %1894  ;;  %v5028_v25 = vpop.permute.xlu0 %1906  ;;  %v5736_v33 = vld [vmem:[#allocation68_spill] sm:$0xff]  ;;  %v5738_v3 = vld [vmem:[#allocation53_spill] sm:$0xff]  ;;  %2921 = vrsqrt.f32 %v5016_v57 }
 0x380   :  { %v2353_v7 = vmul.f32 %v5734_v14, %v2033_v40  ;;  %v2096_v28 = vmul.f32 %v5735_v15, %v2032_v10  ;;  %v2573_v58 = vadd.f32 %v2445_v23, %v2348_v63  ;;  %v2574_v52 = vadd.f32 %v2446_v27, %v2348_v63  ;;  %v2981_v48 = vld [vmem:[#allocation2 + $0x260] sm:$0xff]  ;;  %v5754_v57 = vld [vmem:[#allocation94_spill] sm:$0xff] }
 0x381   :  { %v2451_v62 = vmul.f32 %v2977_v9, %v2159_v18  ;;  %v2452_v56 = vmul.f32 %v2978_v8, %v2159_v18  ;;  %v2158_v16 = vadd.f32 %v2094_v29, %v1879_v2  ;;  %v2161_v53 = vadd.f32 %v2097_v41, %v1891_v36  ;;  %v2982_v18 = vld [vmem:[#allocation2 + $0x268] sm:$0xff]  ;;  %v2983_v36 = vld [vmem:[#allocation2 + $0x250] sm:$0xff] }
 0x382   :  { %v2160_v51 = vadd.f32 %v2096_v28, %v1887_v38  ;;  %v2352_v31 = vmul.f32 %v5736_v33, %v2032_v10  ;;  %2701 = vst [vmem:[#allocation8 + $0x210] sm:$0xff] %v2573_v58  ;;  %2702 = vst [vmem:[#allocation8 + $0x218] sm:$0xff] %v2574_v52  ;;  %v2099_v54 = vmul.f32 %v5737_v47, %v2035_v32  ;;  %v2984_v10 = vld [vmem:[#allocation2 + $0x258] sm:$0xff]  ;;  %v2985_v52 = vld [vmem:[#allocation2 + $0x280] sm:$0xff] }
 0x383   :  { %v2579_v5 = vadd.f32 %v2451_v62, %v2351_v60  ;;  %v2580_v30 = vadd.f32 %v2452_v56, %v2351_v60  ;;  %v2355_v63 = vmul.f32 %v5738_v3, %v2035_v32  ;;  %v2449_v40 = vmul.f32 %v2979_v39, %v2158_v16  ;;  %v1903_v34 = vpop.permute.xlu1 %1902  ;;  %v1915_v43 = vpop.permute.xlu0 %1914  ;;  %v2986_v62 = vld [vmem:[#allocation2 + $0x288] sm:$0xff]  ;;  %v5742_v39 = vld [vmem:[#allocation84_spill] sm:$0xff] }
 0x384   :  { %v2450_v23 = vmul.f32 %v2980_v46, %v2158_v16  ;;  %v2455_v27 = vmul.f32 %v2981_v48, %v2161_v53  ;;  %v2456_v2 = vmul.f32 %v2982_v18, %v2161_v53  ;;  %v2453_v38 = vmul.f32 %v2983_v36, %v2160_v51  ;;  %v5740_v33 = vld [vmem:[#allocation81_spill] sm:$0xff]  ;;  %v5744_v48 = vld [vmem:[#allocation48_spill] sm:$0xff]  ;;  %v5746_v36 = vld [vmem:[#allocation91_spill] sm:$0xff] }
 0x385   :  { %2707 = vst [vmem:[#allocation8 + $0x240] sm:$0xff] %v2579_v5  ;;  %2708 = vst [vmem:[#allocation8 + $0x248] sm:$0xff] %v2580_v30  ;;  %v2454_v1 = vmul.f32 %v2984_v10, %v2160_v51  ;;  %v2163_v29 = vadd.f32 %v2099_v54, %v1899_v35  ;;  %v2034_v60 = vsub.f32 1.0, %v1895_v0  ;;  %v2577_v41 = vadd.f32 %v2449_v40, %v2350_v37  ;;  %v5739_v35 = vld [vmem:[#allocation62_spill] sm:$0xff]  ;;  %v5743_v46 = vld [vmem:[#allocation89_spill] sm:$0xff] }
 0x386   :  { %v2578_v32 = vadd.f32 %v2450_v23, %v2350_v37  ;;  %v2583_v14 = vadd.f32 %v2455_v27, %v2353_v7  ;;  %v2584_v15 = vadd.f32 %v2456_v2, %v2353_v7  ;;  %v2581_v28 = vadd.f32 %v2453_v38, %v2352_v31  ;;  %v5741_v54 = vld [vmem:[#allocation74_spill] sm:$0xff]  ;;  %v5745_v18 = vld [vmem:[#allocation37_spill] sm:$0xff] }
 0x387   :  { %v2582_v58 = vadd.f32 %v2454_v1, %v2352_v31  ;;  %v2459_v9 = vmul.f32 %v2985_v52, %v2163_v29  ;;  %v2460_v8 = vmul.f32 %v2986_v62, %v2163_v29  ;;  %v5034_v56 = vadd.f32 1e-05, %v4982_v45  ;;  %2705 = vst [vmem:[#allocation8 + $0x230] sm:$0xff] %v2577_v41  ;;  %v1911_v30 = vpop.permute.xlu1 %1910  ;;  %v1923_v47 = vpop.permute.xlu0 %1922  ;;  %v2987_v10 = vld [vmem:[#allocation2 + $0x270] sm:$0xff]  ;;  %v2988_v29 = vld [vmem:[#allocation2 + $0x278] sm:$0xff] }
 0x388   :  { %2706 = vst [vmem:[#allocation8 + $0x238] sm:$0xff] %v2578_v32  ;;  %2711 = vst [vmem:[#allocation8 + $0x260] sm:$0xff] %v2583_v14  ;;  %v2098_v16 = vmul.f32 %v5739_v35, %v2034_v60  ;;  %v2037_v53 = vsub.f32 1.0, %v5028_v25  ;;  %v2036_v37 = vsub.f32 1.0, %v1903_v34  ;;  %v2354_v31 = vmul.f32 %v5740_v33, %v2034_v60  ;;  %v5747_v14 = vld [vmem:[#allocation72_spill] sm:$0xff] }
 0x389   :  { %2712 = vst [vmem:[#allocation8 + $0x268] sm:$0xff] %v2584_v15  ;;  %2709 = vst [vmem:[#allocation8 + $0x250] sm:$0xff] %v2581_v28  ;;  %v2587_v7 = vadd.f32 %v2459_v9, %v2355_v63  ;;  %v2588_v51 = vadd.f32 %v2460_v8, %v2355_v63  ;;  %v2039_v5 = vsub.f32 1.0, %v1915_v43  ;;  %v2038_v38 = vsub.f32 1.0, %v1911_v30  ;;  %v5748_v28 = vld [vmem:[#allocation80_spill] sm:$0xff] }
 0x38a   :  { %2710 = vst [vmem:[#allocation8 + $0x258] sm:$0xff] %v2582_v58  ;;  %v2162_v45 = vadd.f32 %v2098_v16, %v1895_v0  ;;  %v2101_v3 = vmul.f32 %v5741_v54, %v2037_v53  ;;  %v2357_v40 = vmul.f32 %v5742_v39, %v2037_v53  ;;  %v2100_v23 = vmul.f32 %v5743_v46, %v2036_v37  ;;  %v2989_v16 = vld [vmem:[#allocation2 + $0x2a0] sm:$0xff] }
 0x38b   :  { %2715 = vst [vmem:[#allocation8 + $0x280] sm:$0xff] %v2587_v7  ;;  %2716 = vst [vmem:[#allocation8 + $0x288] sm:$0xff] %v2588_v51  ;;  %v2356_v27 = vmul.f32 %v5744_v48, %v2036_v37  ;;  %v2103_v2 = vmul.f32 %v5745_v18, %v2039_v5  ;;  %v2359_v63 = vmul.f32 %v5746_v36, %v2039_v5  ;;  %v2041_v52 = vsub.f32 1.0, %v1923_v47  ;;  %v1919_v9 = vpop.permute.xlu1 %1918  ;;  %v1800_v62 = vpop.permute.xlu0 %1799  ;;  %v2990_v37 = vld [vmem:[#allocation2 + $0x2a8] sm:$0xff]  ;;  %v2991_v51 = vld [vmem:[#allocation2 + $0x290] sm:$0xff] }
 0x38c   :  { %v2457_v1 = vmul.f32 %v2987_v10, %v2162_v45  ;;  %v2458_v60 = vmul.f32 %v2988_v29, %v2162_v45  ;;  %v2165_v0 = vadd.f32 %v2101_v3, %v5028_v25  ;;  %v2164_v41 = vadd.f32 %v2100_v23, %v1903_v34  ;;  %v2992_v5 = vld [vmem:[#allocation2 + $0x298] sm:$0xff]  ;;  %v2993_v25 = vld [vmem:[#allocation2 + $0x2c0] sm:$0xff]  ;;  %v5749_v23 = vld [vmem:[#allocation93_spill] sm:$0xff] }
 0x38d   :  { %v2167_v32 = vadd.f32 %v2103_v2, %v1915_v43  ;;  %v2102_v15 = vmul.f32 %v5747_v14, %v2038_v38  ;;  %v2358_v58 = vmul.f32 %v5748_v28, %v2038_v38  ;;  %v2994_v43 = vld [vmem:[#allocation2 + $0x2c8] sm:$0xff]  ;;  %v2105_v48 = vmul.f32 %v5749_v23, %v2041_v52 }
 0x38e   :  { %v2585_v8 = vadd.f32 %v2457_v1, %v2354_v31  ;;  %v2586_v35 = vadd.f32 %v2458_v60, %v2354_v31  ;;  %v2463_v53 = vmul.f32 %v2989_v16, %v2165_v0  ;;  %v2464_v7 = vmul.f32 %v2990_v37, %v2165_v0  ;;  %v2995_v1 = vld [vmem:[#allocation2 + $0x2b0] sm:$0xff]  ;;  %v2996_v60 = vld [vmem:[#allocation2 + $0x2b8] sm:$0xff]  ;;  %v2998_v16 = vld [vmem:[#allocation2 + $0x2e8] sm:$0xff] }
 0x38f   :  { %v2461_v33 = vmul.f32 %v2991_v51, %v2164_v41  ;;  %v2462_v45 = vmul.f32 %v2992_v5, %v2164_v41  ;;  %v2467_v34 = vmul.f32 %v2993_v25, %v2167_v32  ;;  %v2468_v54 = vmul.f32 %v2994_v43, %v2167_v32  ;;  %v1927_v38 = vpop.permute.xlu1 %1926  ;;  %v1808_v10 = vpop.permute.xlu0 %1807  ;;  %v5750_v32 = vld [vmem:[#allocation95_spill] sm:$0xff]  ;;  %v5751_v37 = vld [vmem:[#allocation88_spill] sm:$0xff] }
 0x390   :  { %2713 = vst [vmem:[#allocation8 + $0x270] sm:$0xff] %v2585_v8  ;;  %2714 = vst [vmem:[#allocation8 + $0x278] sm:$0xff] %v2586_v35  ;;  %v2591_v3 = vadd.f32 %v2463_v53, %v2357_v40  ;;  %v2592_v39 = vadd.f32 %v2464_v7, %v2357_v40  ;;  %v2166_v46 = vadd.f32 %v2102_v15, %v1911_v30  ;;  %v2040_v30 = vsub.f32 1.0, %v1919_v9  ;;  %v2997_v8 = vld [vmem:[#allocation2 + $0x2e0] sm:$0xff]  ;;  %v5752_v7 = vld [vmem:[#allocation90_spill] sm:$0xff] }
 0x391   :  { %v2589_v31 = vadd.f32 %v2461_v33, %v2356_v27  ;;  %v2590_v18 = vadd.f32 %v2462_v45, %v2356_v27  ;;  %v2595_v2 = vadd.f32 %v2467_v34, %v2359_v63  ;;  %v2596_v36 = vadd.f32 %v2468_v54, %v2359_v63  ;;  %v5753_v34 = vld [vmem:[#allocation92_spill] sm:$0xff] }
 0x392   :  { %2719 = vst [vmem:[#allocation8 + $0x2a0] sm:$0xff] %v2591_v3  ;;  %2720 = vst [vmem:[#allocation8 + $0x2a8] sm:$0xff] %v2592_v39  ;;  %v2465_v29 = vmul.f32 %v2995_v1, %v2166_v46  ;;  %v2466_v0 = vmul.f32 %v2996_v60, %v2166_v46  ;;  %v2169_v41 = vadd.f32 %v2105_v48, %v1923_v47  ;;  %v2011_v40 = vsub.f32 1.0, %v1800_v62  ;;  %v3001_v1 = vld [vmem:[#allocation2 + $0x100] sm:$0xff] }
 0x393   :  { %v2361_v14 = vmul.f32 %v5750_v32, %v2041_v52  ;;  %2717 = vst [vmem:[#allocation8 + $0x290] sm:$0xff] %v2589_v31  ;;  %2718 = vst [vmem:[#allocation8 + $0x298] sm:$0xff] %v2590_v18  ;;  %v2042_v27 = vsub.f32 1.0, %v1927_v38  ;;  %v2013_v15 = vsub.f32 1.0, %v1808_v10  ;;  %v2104_v47 = vmul.f32 %v5751_v37, %v2040_v30  ;;  %v1804_v33 = vpop.permute.xlu1 %1803  ;;  %v5054_v5 = vpop.permute.xlu0 %1815  ;;  %v2999_v18 = vld [vmem:[#allocation2 + $0x2d0] sm:$0xff]  ;;  %v3004_v32 = vld [vmem:[#allocation2 + $0x2f8] sm:$0xff] }
 0x394   :  { %2723 = vst [vmem:[#allocation8 + $0x2c0] sm:$0xff] %v2595_v2  ;;  %2724 = vst [vmem:[#allocation8 + $0x2c8] sm:$0xff] %v2596_v36  ;;  %v2593_v63 = vadd.f32 %v2465_v29, %v2358_v58  ;;  %v2594_v28 = vadd.f32 %v2466_v0, %v2358_v58  ;;  %v2471_v35 = vmul.f32 %v2997_v8, %v2169_v41  ;;  %v2012_v48 = vsub.f32 1.0, %v1804_v33  ;;  %v3000_v36 = vld [vmem:[#allocation2 + $0x2d8] sm:$0xff]  ;;  %v3005_v8 = vld [vmem:[#allocation2 + $0x120] sm:$0xff] }
 0x395   :  { %v2472_v53 = vmul.f32 %v2998_v16, %v2169_v41  ;;  %v2360_v52 = vmul.f32 %v5752_v7, %v2040_v30  ;;  %v2075_v51 = vmul.f32 %v4786_v49, %v2011_v40  ;;  %v2331_v58 = vmul.f32 %v4878_v6, %v2011_v40  ;;  %v3003_v41 = vld [vmem:[#allocation2 + $0x2f0] sm:$0xff]  ;;  %v3006_v16 = vld [vmem:[#allocation2 + $0x128] sm:$0xff] }
 0x396   :  { %2721 = vst [vmem:[#allocation8 + $0x2b0] sm:$0xff] %v2593_v63  ;;  %2722 = vst [vmem:[#allocation8 + $0x2b8] sm:$0xff] %v2594_v28  ;;  %v2599_v45 = vadd.f32 %v2471_v35, %v2361_v14  ;;  %v2106_v43 = vmul.f32 %v5753_v34, %v2042_v27  ;;  %v2168_v54 = vadd.f32 %v2104_v47, %v1919_v9  ;;  %v2015_v31 = vsub.f32 1.0, %v5054_v5  ;;  %v3002_v9 = vld [vmem:[#allocation2 + $0x108] sm:$0xff]  ;;  %v3007_v34 = vld [vmem:[#allocation2 + $0x110] sm:$0xff] }
 0x397   :  { %v2600_v25 = vadd.f32 %v2472_v53, %v2361_v14  ;;  %v2139_v3 = vadd.f32 %v2075_v51, %v1800_v62  ;;  %v2362_v39 = vmul.f32 %v5754_v57, %v2042_v27  ;;  %v2077_v46 = vmul.f32 %v4800_v4, %v2013_v15  ;;  %v1812_v60 = vpop.permute.xlu1 %1811  ;;  %v1824_v0 = vpop.permute.xlu0 %1823  ;;  %v5756_v57 = vld [vmem:[#allocation26_spill] sm:$0xff] }
 0x398   :  { %2727 = vst [vmem:[#allocation8 + $0x2e0] sm:$0xff] %v2599_v45  ;;  %v2170_v49 = vadd.f32 %v2106_v43, %v1927_v38  ;;  %v2333_v23 = vmul.f32 %v4897_v59, %v2013_v15  ;;  %v2469_v2 = vmul.f32 %v2999_v18, %v2168_v54  ;;  %v2470_v6 = vmul.f32 %v3000_v36, %v2168_v54  ;;  %v3008_v43 = vld [vmem:[#allocation2 + $0x118] sm:$0xff]  ;;  %v3009_v36 = vld [vmem:[#allocation2 + $0x140] sm:$0xff] }
 0x399   :  { %2728 = vst [vmem:[#allocation8 + $0x2e8] sm:$0xff] %v2600_v25  ;;  %v2411_v29 = vmul.f32 %v3001_v1, %v2139_v3  ;;  %v2412_v62 = vmul.f32 %v3002_v9, %v2139_v3  ;;  %v2141_v38 = vadd.f32 %v2077_v46, %v1808_v10  ;;  %v2076_v59 = vmul.f32 %v4780_v11, %v2012_v48  ;;  %v5755_v10 = vld [vmem:[#allocation21_spill] sm:$0xff] }
 0x39a   :  { %v2473_v4 = vmul.f32 %v3003_v41, %v2170_v49  ;;  %v2474_v14 = vmul.f32 %v3004_v32, %v2170_v49  ;;  %v2597_v30 = vadd.f32 %v2469_v2, %v2360_v52  ;;  %v2598_v40 = vadd.f32 %v2470_v6, %v2360_v52  ;;  %v5758_v49 = vld [vmem:[#allocation30_spill] sm:$0xff]  ;;  %v3010_v1 = vld [vmem:[#allocation2 + $0x148] sm:$0xff] }
 0x39b   :  { %v2539_v27 = vadd.f32 %v2411_v29, %v2331_v58  ;;  %v2540_v15 = vadd.f32 %v2412_v62, %v2331_v58  ;;  %v2415_v35 = vmul.f32 %v3005_v8, %v2141_v38  ;;  %v2416_v53 = vmul.f32 %v3006_v16, %v2141_v38  ;;  %v1820_v7 = vpop.permute.xlu1 %1819  ;;  %v5066_v52 = vpop.permute.xlu0 %1831  ;;  %v5759_v32 = vld [vmem:[#allocation82_spill] sm:$0xff] }
 0x39c   :  { %v2601_v63 = vadd.f32 %v2473_v4, %v2362_v39  ;;  %v2602_v28 = vadd.f32 %v2474_v14, %v2362_v39  ;;  %2923 = vrsqrt.f32 %v5034_v56  ;;  %2725 = vst [vmem:[#allocation8 + $0x2d0] sm:$0xff] %v2597_v30  ;;  %2726 = vst [vmem:[#allocation8 + $0x2d8] sm:$0xff] %v2598_v40  ;;  %v2140_v37 = vadd.f32 %v2076_v59, %v1804_v33  ;;  %v5757_v39 = vld [vmem:[#allocation75_spill] sm:$0xff]  ;;  %v3011_v40 = vld [vmem:[#allocation2 + $0x130] sm:$0xff] }
 0x39d   :  { %2667 = vst [vmem:[#allocation8 + $0x100] sm:$0xff] %v2539_v27  ;;  %2668 = vst [vmem:[#allocation8 + $0x108] sm:$0xff] %v2540_v15  ;;  %v2332_v47 = vmul.f32 %v5755_v10, %v2012_v48  ;;  %v2079_v11 = vmul.f32 %v4828_v42, %v2015_v31  ;;  %v2543_v51 = vadd.f32 %v2415_v35, %v2333_v23  ;;  %v2014_v25 = vsub.f32 1.0, %v1812_v60  ;;  %v3012_v15 = vld [vmem:[#allocation2 + $0x138] sm:$0xff]  ;;  %v3014_v35 = vld [vmem:[#allocation2 + $0x168] sm:$0xff] }
 0x39e   :  { %2729 = vst [vmem:[#allocation8 + $0x2f0] sm:$0xff] %v2601_v63  ;;  %2730 = vst [vmem:[#allocation8 + $0x2f8] sm:$0xff] %v2602_v28  ;;  %v2544_v45 = vadd.f32 %v2416_v53, %v2333_v23  ;;  %v2017_v58 = vsub.f32 1.0, %v1824_v0  ;;  %v2413_v56 = vmul.f32 %v3007_v34, %v2140_v37  ;;  %v2414_v54 = vmul.f32 %v3008_v43, %v2140_v37  ;;  %v3013_v28 = vld [vmem:[#allocation2 + $0x160] sm:$0xff] }
 0x39f   :  { %v2143_v3 = vadd.f32 %v2079_v11, %v5054_v5  ;;  %v2016_v33 = vsub.f32 1.0, %v1820_v7  ;;  %2671 = vst [vmem:[#allocation8 + $0x120] sm:$0xff] %v2543_v51  ;;  %v2335_v42 = vmul.f32 %v5756_v57, %v2015_v31  ;;  %v2078_v46 = vmul.f32 %v5757_v39, %v2014_v25  ;;  %v1828_v9 = vpop.permute.xlu1 %1827  ;;  %v5073_v62 = vpop.permute.xlu0 %1839  ;;  %v3017_v39 = vld [vmem:[#allocation2 + $0x180] sm:$0xff] }
 0x3a0   :  { %2672 = vst [vmem:[#allocation8 + $0x128] sm:$0xff] %v2544_v45  ;;  %v2334_v48 = vmul.f32 %v5758_v49, %v2014_v25  ;;  %v2081_v18 = vmul.f32 %v4853_v50, %v2017_v58  ;;  %v2541_v23 = vadd.f32 %v2413_v56, %v2332_v47  ;;  %v2542_v2 = vadd.f32 %v2414_v54, %v2332_v47  ;;  %v5075_v5 = vpop.eup %2921  ;;  %v3016_v56 = vld [vmem:[#allocation2 + $0x158] sm:$0xff]  ;;  %v3018_v49 = vld [vmem:[#allocation2 + $0x188] sm:$0xff] }
 0x3a1   :  { %v2419_v6 = vmul.f32 %v3009_v36, %v2143_v3  ;;  %v2420_v29 = vmul.f32 %v3010_v1, %v2143_v3  ;;  %v2142_v41 = vadd.f32 %v2078_v46, %v1812_v60  ;;  %v2337_v31 = vmul.f32 %v4912_v17, %v2017_v58  ;;  %v3015_v58 = vld [vmem:[#allocation2 + $0x150] sm:$0xff]  ;;  %v3020_v1 = vld [vmem:[#allocation2 + $0x178] sm:$0xff] }
 0x3a2   :  { %v2145_v4 = vadd.f32 %v2081_v18, %v1824_v0  ;;  %v2080_v14 = vmul.f32 %v5759_v32, %v2016_v33  ;;  %2669 = vst [vmem:[#allocation8 + $0x110] sm:$0xff] %v2541_v23  ;;  %2670 = vst [vmem:[#allocation8 + $0x118] sm:$0xff] %v2542_v2  ;;  %v2019_v59 = vsub.f32 1.0, %v5066_v52  ;;  %v2018_v30 = vsub.f32 1.0, %v1828_v9  ;;  %v5760_v0 = vld [vmem:[#allocation31_spill] sm:$0xff]  ;;  %v5762_v32 = vld [vmem:[#allocation54_spill] sm:$0xff] }
 0x3a3   :  { %v2547_v50 = vadd.f32 %v2419_v6, %v2335_v42  ;;  %v2548_v38 = vadd.f32 %v2420_v29, %v2335_v42  ;;  %v2417_v27 = vmul.f32 %v3011_v40, %v2142_v41  ;;  %v2418_v63 = vmul.f32 %v3012_v15, %v2142_v41  ;;  %v1836_v10 = vpop.permute.xlu1 %1835  ;;  %v5083_v47 = vpop.permute.xlu0 %1847  ;;  %v5761_v2 = vld [vmem:[#allocation27_spill] sm:$0xff]  ;;  %v3019_v6 = vld [vmem:[#allocation2 + $0x170] sm:$0xff]  ;;  %v5763_v40 = vld [vmem:[#allocation25_spill] sm:$0xff] }
 0x3a4   :  { %v2423_v8 = vmul.f32 %v3013_v28, %v2145_v4  ;;  %v2424_v60 = vmul.f32 %v3014_v35, %v2145_v4  ;;  %v2144_v17 = vadd.f32 %v2080_v14, %v1820_v7  ;;  %v2336_v16 = vmul.f32 %v5760_v0, %v2016_v33  ;;  %v5764_v15 = vld [vmem:[#allocation20_spill] sm:$0xff] }
 0x3a5   :  { %2675 = vst [vmem:[#allocation8 + $0x140] sm:$0xff] %v2547_v50  ;;  %2676 = vst [vmem:[#allocation8 + $0x148] sm:$0xff] %v2548_v38  ;;  %v2083_v53 = vmul.f32 %v4890_v20, %v2019_v59  ;;  %v2082_v37 = vmul.f32 %v4842_v26, %v2018_v30  ;;  %v2545_v11 = vadd.f32 %v2417_v27, %v2334_v48  ;;  %v2021_v20 = vsub.f32 1.0, %v5073_v62 }
 0x3a6   :  { %v2546_v51 = vadd.f32 %v2418_v63, %v2334_v48  ;;  %v2551_v45 = vadd.f32 %v2423_v8, %v2337_v31  ;;  %v2552_v25 = vadd.f32 %v2424_v60, %v2337_v31  ;;  %v2421_v34 = vmul.f32 %v3015_v58, %v2144_v17 }
 0x3a7   :  { %v2422_v43 = vmul.f32 %v3016_v56, %v2144_v17  ;;  %v2147_v54 = vadd.f32 %v2083_v53, %v5066_v52  ;;  %v2146_v7 = vadd.f32 %v2082_v37, %v1828_v9  ;;  %2673 = vst [vmem:[#allocation8 + $0x130] sm:$0xff] %v2545_v11  ;;  %v2339_v26 = vmul.f32 %v4930_v21, %v2019_v59  ;;  %v1844_v18 = vpop.permute.xlu1 %1843  ;;  %v5089_v52 = vpop.permute.xlu0 %1855  ;;  %v3022_v17 = vld [vmem:[#allocation2 + $0x1a8] sm:$0xff]  ;;  %v3023_v53 = vld [vmem:[#allocation2 + $0x190] sm:$0xff]  ;;  %v3025_v56 = vld [vmem:[#allocation2 + $0x1c0] sm:$0xff] }
 0x3a8   :  { %2674 = vst [vmem:[#allocation8 + $0x138] sm:$0xff] %v2546_v51  ;;  %2679 = vst [vmem:[#allocation8 + $0x160] sm:$0xff] %v2551_v45  ;;  %v2020_v3 = vsub.f32 1.0, %v1836_v10  ;;  %v2023_v33 = vsub.f32 1.0, %v5083_v47  ;;  %v2549_v57 = vadd.f32 %v2421_v34, %v2336_v16  ;;  %v2338_v36 = vmul.f32 %v5761_v2, %v2018_v30  ;;  %v5765_v51 = vld [vmem:[#allocation32_spill] sm:$0xff] }
 0x3a9   :  { %2680 = vst [vmem:[#allocation8 + $0x168] sm:$0xff] %v2552_v25  ;;  %v2550_v42 = vadd.f32 %v2422_v43, %v2336_v16  ;;  %v2427_v46 = vmul.f32 %v3017_v39, %v2147_v54  ;;  %v2428_v48 = vmul.f32 %v3018_v49, %v2147_v54  ;;  %v5091_v23 = vpop.eup %2923  ;;  %v2425_v21 = vmul.f32 %v3019_v6, %v2146_v7  ;;  %v3026_v54 = vld [vmem:[#allocation2 + $0x1c8] sm:$0xff] }
 0x3aa   :  { %v2426_v29 = vmul.f32 %v3020_v1, %v2146_v7  ;;  %v2085_v9 = vmul.f32 %v4934_v19, %v2021_v20  ;;  %2677 = vst [vmem:[#allocation8 + $0x150] sm:$0xff] %v2549_v57  ;;  %v2341_v31 = vmul.f32 %v4950_v24, %v2021_v20  ;;  %v2084_v14 = vmul.f32 %v5762_v32, %v2020_v3  ;;  %v3021_v24 = vld [vmem:[#allocation2 + $0x1a0] sm:$0xff]  ;;  %v5766_v57 = vld [vmem:[#allocation33_spill] sm:$0xff] }
 0x3ab   :  { %2678 = vst [vmem:[#allocation8 + $0x158] sm:$0xff] %v2550_v42  ;;  %v2555_v41 = vadd.f32 %v2427_v46, %v2339_v26  ;;  %v2556_v4 = vadd.f32 %v2428_v48, %v2339_v26  ;;  %v2553_v50 = vadd.f32 %v2425_v21, %v2338_v36  ;;  %v2087_v30 = vmul.f32 %v5763_v40, %v2023_v33  ;;  %v1852_v8 = vpop.permute.xlu1 %1851  ;;  %v5101_v35 = vpop.permute.xlu0 %1933  ;;  %v3027_v48 = vld [vmem:[#allocation2 + $0x1b0] sm:$0xff]  ;;  %v5767_v21 = vld [vmem:[#allocation28_spill] sm:$0xff] }
 0x3ac   :  { %v2554_v38 = vadd.f32 %v2426_v29, %v2338_v36  ;;  %v2149_v59 = vadd.f32 %v2085_v9, %v5073_v62  ;;  %v2148_v27 = vadd.f32 %v2084_v14, %v1836_v10  ;;  %v2340_v63 = vmul.f32 %v5764_v15, %v2020_v3  ;;  %v3024_v10 = vld [vmem:[#allocation2 + $0x198] sm:$0xff]  ;;  %v3030_v14 = vld [vmem:[#allocation2 + $0x1e8] sm:$0xff]  ;;  %v3031_v40 = vld [vmem:[#allocation2 + $0x1d0] sm:$0xff] }
 0x3ad   :  { %2683 = vst [vmem:[#allocation8 + $0x180] sm:$0xff] %v2555_v41  ;;  %2684 = vst [vmem:[#allocation8 + $0x188] sm:$0xff] %v2556_v4  ;;  %v2022_v19 = vsub.f32 1.0, %v1844_v18  ;;  %v2025_v28 = vsub.f32 1.0, %v5089_v52  ;;  %v2151_v62 = vadd.f32 %v2087_v30, %v5083_v47  ;;  %v2024_v16 = vsub.f32 1.0, %v1852_v8  ;;  %v3028_v36 = vld [vmem:[#allocation2 + $0x1b8] sm:$0xff] }
 0x3ae   :  { %2681 = vst [vmem:[#allocation8 + $0x170] sm:$0xff] %v2553_v50  ;;  %2682 = vst [vmem:[#allocation8 + $0x178] sm:$0xff] %v2554_v38  ;;  %v2431_v60 = vmul.f32 %v3021_v24, %v2149_v59  ;;  %v2432_v0 = vmul.f32 %v3022_v17, %v2149_v59  ;;  %v2429_v37 = vmul.f32 %v3023_v53, %v2148_v27  ;;  %v2043_v9 = vsub.f32 1.0, %v5101_v35  ;;  %v5769_v24 = vld [vmem:[#allocation99_spill] sm:$0xff] }
 0x3af   :  { %v2430_v11 = vmul.f32 %v3024_v10, %v2148_v27  ;;  %v2343_v45 = vmul.f32 %v5765_v51, %v2023_v33  ;;  %v2086_v25 = vmul.f32 %v4932_v13, %v2022_v19  ;;  %v2435_v43 = vmul.f32 %v3025_v56, %v2151_v62  ;;  %v1860_v42 = vpop.permute.xlu1 %1859  ;;  %v5107_v39 = vpop.permute.xlu0 %1941  ;;  %v3032_v27 = vld [vmem:[#allocation2 + $0x1d8] sm:$0xff] }
 0x3b0   :  { %v2559_v58 = vadd.f32 %v2431_v60, %v2341_v31  ;;  %v2560_v34 = vadd.f32 %v2432_v0, %v2341_v31  ;;  %v2436_v7 = vmul.f32 %v3026_v54, %v2151_v62  ;;  %v2557_v26 = vadd.f32 %v2429_v37, %v2340_v63  ;;  %v3029_v31 = vld [vmem:[#allocation2 + $0x1e0] sm:$0xff]  ;;  %v5770_v37 = vld [vmem:[#allocation101_spill] sm:$0xff]  ;;  %v3035_v54 = vld [vmem:[#allocation2 + $0x1f0] sm:$0xff] }
 0x3b1   :  { %v2558_v20 = vadd.f32 %v2430_v11, %v2340_v63  ;;  %v2150_v3 = vadd.f32 %v2086_v25, %v1844_v18  ;;  %v2089_v47 = vmul.f32 %v5766_v57, %v2025_v28  ;;  %v2563_v46 = vadd.f32 %v2435_v43, %v2343_v45  ;;  %v5768_v63 = vld [vmem:[#allocation97_spill] sm:$0xff]  ;;  %v5772_v57 = vld [vmem:[#allocation96_spill] sm:$0xff] }
 0x3b2   :  { %2687 = vst [vmem:[#allocation8 + $0x1a0] sm:$0xff] %v2559_v58  ;;  %2688 = vst [vmem:[#allocation8 + $0x1a8] sm:$0xff] %v2560_v34  ;;  %v2564_v33 = vadd.f32 %v2436_v7, %v2343_v45  ;;  %v2342_v13 = vmul.f32 %v4955_v61, %v2022_v19  ;;  %v2088_v49 = vmul.f32 %v4957_v44, %v2024_v16  ;;  %v2026_v41 = vsub.f32 1.0, %v1860_v42  ;;  %v3034_v34 = vld [vmem:[#allocation2 + $0x308] sm:$0xff] }
 0x3b3   :  { %2685 = vst [vmem:[#allocation8 + $0x190] sm:$0xff] %v2557_v26  ;;  %2686 = vst [vmem:[#allocation8 + $0x198] sm:$0xff] %v2558_v20  ;;  %v2433_v2 = vmul.f32 %v3027_v48, %v2150_v3  ;;  %v2434_v6 = vmul.f32 %v3028_v36, %v2150_v3  ;;  %v2153_v18 = vadd.f32 %v2089_v47, %v5089_v52  ;;  %v2045_v61 = vsub.f32 1.0, %v5107_v39  ;;  %v1938_v38 = vpop.permute.xlu1 %1937  ;;  %v5115_v59 = vpop.permute.xlu0 %1949  ;;  %v3036_v26 = vld [vmem:[#allocation2 + $0x1f8] sm:$0xff] }
 0x3b4   :  { %v2345_v1 = vmul.f32 %v5767_v21, %v2025_v28  ;;  %2691 = vst [vmem:[#allocation8 + $0x1c0] sm:$0xff] %v2563_v46  ;;  %2692 = vst [vmem:[#allocation8 + $0x1c8] sm:$0xff] %v2564_v33  ;;  %v2152_v29 = vadd.f32 %v2088_v49, %v1852_v8  ;;  %v2344_v52 = vmul.f32 %v4973_v55, %v2024_v16  ;;  %v2044_v11 = vsub.f32 1.0, %v1938_v38  ;;  %v3037_v33 = vld [vmem:[#allocation2 + $0x320] sm:$0xff]  ;;  %v3038_v49 = vld [vmem:[#allocation2 + $0x328] sm:$0xff] }
 0x3b5   :  { %v2561_v4 = vadd.f32 %v2433_v2, %v2342_v13  ;;  %v2562_v44 = vadd.f32 %v2434_v6, %v2342_v13  ;;  %v2439_v32 = vmul.f32 %v3029_v31, %v2153_v18  ;;  %v2440_v50 = vmul.f32 %v3030_v14, %v2153_v18  ;;  %v5773_v18 = vld [vmem:[#allocation105_spill] sm:$0xff]  ;;  %v3039_v31 = vld [vmem:[#allocation2 + $0x310] sm:$0xff]  ;;  %v3040_v14 = vld [vmem:[#allocation2 + $0x318] sm:$0xff] }
 0x3b6   :  { %v2437_v30 = vmul.f32 %v3031_v40, %v2152_v29  ;;  %v2438_v15 = vmul.f32 %v3032_v27, %v2152_v29  ;;  %v2107_v19 = vmul.f32 %v5768_v63, %v2043_v9  ;;  %v2363_v60 = vmul.f32 %v5769_v24, %v2043_v9 }
 0x3b7   :  { %2689 = vst [vmem:[#allocation8 + $0x1b0] sm:$0xff] %v2561_v4  ;;  %2690 = vst [vmem:[#allocation8 + $0x1b8] sm:$0xff] %v2562_v44  ;;  %v2567_v28 = vadd.f32 %v2439_v32, %v2345_v1  ;;  %v2568_v8 = vadd.f32 %v2440_v50, %v2345_v1  ;;  %v2090_v17 = vmul.f32 %v4959_v12, %v2026_v41  ;;  %v2047_v51 = vsub.f32 1.0, %v5115_v59  ;;  %v1946_v45 = vpop.permute.xlu1 %1945  ;;  %v5125_v25 = vpop.permute.xlu0 %1957  ;;  %v3033_v12 = vld [vmem:[#allocation2 + $0x300] sm:$0xff] }
 0x3b8   :  { %v2565_v0 = vadd.f32 %v2437_v30, %v2344_v52  ;;  %v2566_v62 = vadd.f32 %v2438_v15, %v2344_v52  ;;  %v2171_v53 = vadd.f32 %v2107_v19, %v5101_v35  ;;  %v2109_v55 = vmul.f32 %v5770_v37, %v2045_v61  ;;  %v5775_v4 = vld [vmem:[#allocation100_spill] sm:$0xff]  ;;  %v5776_v52 = vld [vmem:[#allocation107_spill] sm:$0xff]  ;;  %v3043_v37 = vld [vmem:[#allocation2 + $0x330] sm:$0xff] }
 0x3b9   :  { %2695 = vst [vmem:[#allocation8 + $0x1e0] sm:$0xff] %v2567_v28  ;;  %2696 = vst [vmem:[#allocation8 + $0x1e8] sm:$0xff] %v2568_v8  ;;  %v2154_v16 = vadd.f32 %v2090_v17, %v1860_v42  ;;  %v2346_v10 = vmul.f32 %v4978_v22, %v2026_v41  ;;  %v2046_v43 = vsub.f32 1.0, %v1946_v45  ;;  %v5771_v22 = vld [vmem:[#allocation103_spill] sm:$0xff]  ;;  %v2108_v47 = vmul.f32 %v5772_v57, %v2044_v11  ;;  %v5774_v41 = vld [vmem:[#allocation98_spill] sm:$0xff] }
 0x3ba   :  { %2693 = vst [vmem:[#allocation8 + $0x1d0] sm:$0xff] %v2565_v0  ;;  %2694 = vst [vmem:[#allocation8 + $0x1d8] sm:$0xff] %v2566_v62  ;;  %v2475_v58 = vmul.f32 %v3033_v12, %v2171_v53  ;;  %v2476_v56 = vmul.f32 %v3034_v34, %v2171_v53  ;;  %v2173_v35 = vadd.f32 %v2109_v55, %v5107_v39  ;;  %v2049_v27 = vsub.f32 1.0, %v5125_v25  ;;  %v3041_v8 = vld [vmem:[#allocation2 + $0x340] sm:$0xff] }
 0x3bb   :  { %v2441_v7 = vmul.f32 %v3035_v54, %v2154_v16  ;;  %v2442_v20 = vmul.f32 %v3036_v26, %v2154_v16  ;;  %v2365_v3 = vmul.f32 %v5771_v22, %v2045_v61  ;;  %v2172_v6 = vadd.f32 %v2108_v47, %v1938_v38  ;;  %v1954_v21 = vpop.permute.xlu1 %1953  ;;  %v5131_v1 = vpop.permute.xlu0 %1965  ;;  %v3044_v16 = vld [vmem:[#allocation2 + $0x338] sm:$0xff] }
 0x3bc   :  { %v2603_v42 = vadd.f32 %v2475_v58, %v2363_v60  ;;  %v2604_v46 = vadd.f32 %v2476_v56, %v2363_v60  ;;  %v2479_v13 = vmul.f32 %v3037_v33, %v2173_v35  ;;  %v2480_v48 = vmul.f32 %v3038_v49, %v2173_v35  ;;  %v3042_v60 = vld [vmem:[#allocation2 + $0x348] sm:$0xff]  ;;  %v5779_v58 = vld [vmem:[#allocation111_spill] sm:$0xff]  ;;  %v5780_v56 = vld [vmem:[#allocation104_spill] sm:$0xff] }
 0x3bd   :  { %v2569_v2 = vadd.f32 %v2441_v7, %v2346_v10  ;;  %v2570_v36 = vadd.f32 %v2442_v20, %v2346_v10  ;;  %v2111_v39 = vmul.f32 %v5773_v18, %v2047_v51  ;;  %v2364_v61 = vmul.f32 %v5774_v41, %v2044_v11  ;;  %v5778_v11 = vld [vmem:[#allocation109_spill] sm:$0xff]  ;;  %v5784_v41 = vld [vmem:[#allocation108_spill] sm:$0xff] }
 0x3be   :  { %2731 = vst [vmem:[#allocation8 + $0x300] sm:$0xff] %v2603_v42  ;;  %2732 = vst [vmem:[#allocation8 + $0x308] sm:$0xff] %v2604_v46  ;;  %v2607_v29 = vadd.f32 %v2479_v13, %v2365_v3  ;;  %v2608_v9 = vadd.f32 %v2480_v48, %v2365_v3  ;;  %v2110_v44 = vmul.f32 %v5775_v4, %v2046_v43  ;;  %v2048_v15 = vsub.f32 1.0, %v1954_v21  ;;  %v5781_v20 = vld [vmem:[#allocation113_spill] sm:$0xff]  ;;  %v5782_v3 = vld [vmem:[#allocation106_spill] sm:$0xff] }
 0x3bf   :  { %2697 = vst [vmem:[#allocation8 + $0x1f0] sm:$0xff] %v2569_v2  ;;  %2698 = vst [vmem:[#allocation8 + $0x1f8] sm:$0xff] %v2570_v36  ;;  %v2477_v32 = vmul.f32 %v3039_v31, %v2172_v6  ;;  %v2478_v50 = vmul.f32 %v3040_v14, %v2172_v6  ;;  %v2175_v38 = vadd.f32 %v2111_v39, %v5115_v59  ;;  %v2051_v63 = vsub.f32 1.0, %v5131_v1  ;;  %v1962_v0 = vpop.permute.xlu1 %1961  ;;  %v5139_v62 = vpop.permute.xlu0 %1973  ;;  %v5777_v59 = vld [vmem:[#allocation102_spill] sm:$0xff]  ;;  %v3045_v13 = vld [vmem:[#allocation2 + $0x360] sm:$0xff] }
 0x3c0   :  { %v2367_v40 = vmul.f32 %v5776_v52, %v2047_v51  ;;  %2735 = vst [vmem:[#allocation8 + $0x320] sm:$0xff] %v2607_v29  ;;  %2736 = vst [vmem:[#allocation8 + $0x328] sm:$0xff] %v2608_v9  ;;  %v2174_v30 = vadd.f32 %v2110_v44, %v1946_v45  ;;  %v2366_v53 = vmul.f32 %v5777_v59, %v2046_v43  ;;  %v2050_v47 = vsub.f32 1.0, %v1962_v0  ;;  %v3046_v48 = vld [vmem:[#allocation2 + $0x368] sm:$0xff]  ;;  %v3047_v6 = vld [vmem:[#allocation2 + $0x350] sm:$0xff] }
 0x3c1   :  { %v2605_v19 = vadd.f32 %v2477_v32, %v2364_v61  ;;  %v2606_v28 = vadd.f32 %v2478_v50, %v2364_v61  ;;  %v2483_v24 = vmul.f32 %v3041_v8, %v2175_v38  ;;  %v2484_v17 = vmul.f32 %v3042_v60, %v2175_v38  ;;  %v3048_v39 = vld [vmem:[#allocation2 + $0x358] sm:$0xff]  ;;  %v3049_v31 = vld [vmem:[#allocation2 + $0x380] sm:$0xff]  ;;  %v3050_v14 = vld [vmem:[#allocation2 + $0x388] sm:$0xff] }
 0x3c2   :  { %v2481_v55 = vmul.f32 %v3043_v37, %v2174_v30  ;;  %v2482_v10 = vmul.f32 %v3044_v16, %v2174_v30  ;;  %v2113_v51 = vmul.f32 %v5778_v11, %v2049_v27  ;;  %v2369_v34 = vmul.f32 %v5779_v58, %v2049_v27  ;;  %v5783_v29 = vld [vmem:[#allocation115_spill] sm:$0xff]  ;;  %v5785_v30 = vld [vmem:[#allocation117_spill] sm:$0xff] }
 0x3c3   :  { %2733 = vst [vmem:[#allocation8 + $0x310] sm:$0xff] %v2605_v19  ;;  %2734 = vst [vmem:[#allocation8 + $0x318] sm:$0xff] %v2606_v28  ;;  %v2611_v45 = vadd.f32 %v2483_v24, %v2367_v40  ;;  %v2612_v12 = vadd.f32 %v2484_v17, %v2367_v40  ;;  %v2112_v35 = vmul.f32 %v5780_v56, %v2048_v15  ;;  %v2053_v42 = vsub.f32 1.0, %v5139_v62  ;;  %v1970_v46 = vpop.permute.xlu1 %1969  ;;  %v5149_v33 = vpop.permute.xlu0 %1981  ;;  %v5786_v28 = vld [vmem:[#allocation110_spill] sm:$0xff]  ;;  %v5787_v24 = vld [vmem:[#allocation112_spill] sm:$0xff] }
 0x3c4   :  { %v2609_v54 = vadd.f32 %v2481_v55, %v2366_v53  ;;  %v2610_v7 = vadd.f32 %v2482_v10, %v2366_v53  ;;  %v2177_v26 = vadd.f32 %v2113_v51, %v5125_v25  ;;  %v2115_v43 = vmul.f32 %v5781_v20, %v2051_v63  ;;  %v3051_v17 = vld [vmem:[#allocation2 + $0x370] sm:$0xff]  ;;  %v3052_v53 = vld [vmem:[#allocation2 + $0x378] sm:$0xff] }
 0x3c5   :  { %2739 = vst [vmem:[#allocation8 + $0x340] sm:$0xff] %v2611_v45  ;;  %2740 = vst [vmem:[#allocation8 + $0x348] sm:$0xff] %v2612_v12  ;;  %v2176_v22 = vadd.f32 %v2112_v35, %v1954_v21  ;;  %v2368_v57 = vmul.f32 %v5782_v3, %v2048_v15  ;;  %v2052_v36 = vsub.f32 1.0, %v1970_v46  ;;  %v2371_v9 = vmul.f32 %v5783_v29, %v2051_v63  ;;  %v5788_v55 = vld [vmem:[#allocation119_spill] sm:$0xff]  ;;  %v3054_v35 = vld [vmem:[#allocation2 + $0x3a8] sm:$0xff] }
 0x3c6   :  { %2737 = vst [vmem:[#allocation8 + $0x330] sm:$0xff] %v2609_v54  ;;  %2738 = vst [vmem:[#allocation8 + $0x338] sm:$0xff] %v2610_v7  ;;  %v2487_v49 = vmul.f32 %v3045_v13, %v2177_v26  ;;  %v2488_v2 = vmul.f32 %v3046_v48, %v2177_v26  ;;  %v2179_v25 = vadd.f32 %v2115_v43, %v5131_v1  ;;  %v2055_v11 = vsub.f32 1.0, %v5149_v33  ;;  %v5789_v26 = vld [vmem:[#allocation114_spill] sm:$0xff]  ;;  %v5791_v13 = vld [vmem:[#allocation116_spill] sm:$0xff] }
 0x3c7   :  { %v2485_v18 = vmul.f32 %v3047_v6, %v2176_v22  ;;  %v2486_v21 = vmul.f32 %v3048_v39, %v2176_v22  ;;  %v2114_v61 = vmul.f32 %v5784_v41, %v2050_v47  ;;  %v2117_v1 = vmul.f32 %v5785_v30, %v2053_v42  ;;  %v1978_v27 = vpop.permute.xlu1 %1977  ;;  %v5155_v15 = vpop.permute.xlu0 %1989  ;;  %v3056_v22 = vld [vmem:[#allocation2 + $0x398] sm:$0xff]  ;;  %v5792_v48 = vld [vmem:[#allocation18_spill] sm:$0xff] }
 0x3c8   :  { %v2615_v4 = vadd.f32 %v2487_v49, %v2369_v34  ;;  %v2616_v44 = vadd.f32 %v2488_v2, %v2369_v34  ;;  %v2491_v32 = vmul.f32 %v3049_v31, %v2179_v25  ;;  %v2492_v50 = vmul.f32 %v3050_v14, %v2179_v25  ;;  %v3053_v34 = vld [vmem:[#allocation2 + $0x3a0] sm:$0xff]  ;;  %v5795_v41 = vld [vmem:[#allocation118_spill] sm:$0xff]  ;;  %v3058_v14 = vld [vmem:[#allocation2 + $0x3c8] sm:$0xff] }
 0x3c9   :  { %v2613_v38 = vadd.f32 %v2485_v18, %v2368_v57  ;;  %v2614_v52 = vadd.f32 %v2486_v21, %v2368_v57  ;;  %v2178_v40 = vadd.f32 %v2114_v61, %v1962_v0  ;;  %v2370_v8 = vmul.f32 %v5786_v28, %v2050_v47  ;;  %v5790_v57 = vld [vmem:[#allocation121_spill] sm:$0xff]  ;;  %v5794_v21 = vld [vmem:[#allocation123_spill] sm:$0xff]  ;;  %v3057_v31 = vld [vmem:[#allocation2 + $0x3c0] sm:$0xff] }
 0x3ca   :  { %2743 = vst [vmem:[#allocation8 + $0x360] sm:$0xff] %v2615_v4  ;;  %2744 = vst [vmem:[#allocation8 + $0x368] sm:$0xff] %v2616_v44  ;;  %v2619_v19 = vadd.f32 %v2491_v32, %v2371_v9  ;;  %v2620_v63 = vadd.f32 %v2492_v50, %v2371_v9  ;;  %v2116_v60 = vmul.f32 %v5787_v24, %v2052_v36  ;;  %v2054_v51 = vsub.f32 1.0, %v1978_v27 }
 0x3cb   :  { %2741 = vst [vmem:[#allocation8 + $0x350] sm:$0xff] %v2613_v38  ;;  %2742 = vst [vmem:[#allocation8 + $0x358] sm:$0xff] %v2614_v52  ;;  %v2489_v59 = vmul.f32 %v3051_v17, %v2178_v40  ;;  %v2490_v37 = vmul.f32 %v3052_v53, %v2178_v40  ;;  %v2181_v0 = vadd.f32 %v2117_v1, %v5139_v62  ;;  %v2057_v45 = vsub.f32 1.0, %v5155_v15  ;;  %v1986_v7 = vpop.permute.xlu1 %1985  ;;  %v3055_v62 = vld [vmem:[#allocation2 + $0x390] sm:$0xff]  ;;  %v3060_v40 = vld [vmem:[#allocation2 + $0x3b8] sm:$0xff] }
 0x3cc   :  { %v2373_v16 = vmul.f32 %v5788_v55, %v2053_v42  ;;  %2747 = vst [vmem:[#allocation8 + $0x380] sm:$0xff] %v2619_v19  ;;  %2748 = vst [vmem:[#allocation8 + $0x388] sm:$0xff] %v2620_v63  ;;  %v2180_v10 = vadd.f32 %v2116_v60, %v1970_v46  ;;  %v2372_v20 = vmul.f32 %v5789_v26, %v2052_v36  ;;  %v5793_v2 = vsub.f32 0.0, %v5792_v48  ;;  %v3059_v52 = vld [vmem:[#allocation2 + $0x3b0] sm:$0xff]  ;;  %v5796_v19 = vld [vmem:[#allocation120_spill] sm:$0xff] }
 0x3cd   :  { %v2617_v12 = vadd.f32 %v2489_v59, %v2370_v8  ;;  %v2618_v58 = vadd.f32 %v2490_v37, %v2370_v8  ;;  %v2495_v56 = vmul.f32 %v3053_v34, %v2181_v0  ;;  %v2496_v54 = vmul.f32 %v3054_v35, %v2181_v0  ;;  %v3061_v8 = vld [vmem:[#allocation2 + $0x3e0] sm:$0xff]  ;;  %v3062_v60 = vld [vmem:[#allocation2 + $0x3e8] sm:$0xff]  ;;  %v3064_v34 = vld [vmem:[#allocation2 + $0x3d8] sm:$0xff] }
 0x3ce   :  { %v2493_v43 = vmul.f32 %v3055_v62, %v2180_v10  ;;  %v2494_v3 = vmul.f32 %v3056_v22, %v2180_v10  ;;  %v2119_v47 = vmul.f32 %v5790_v57, %v2055_v11  ;;  %v2118_v49 = vmul.f32 %v5791_v13, %v2054_v51 }
 0x3cf   :  { %2745 = vst [vmem:[#allocation8 + $0x370] sm:$0xff] %v2617_v12  ;;  %2746 = vst [vmem:[#allocation8 + $0x378] sm:$0xff] %v2618_v58  ;;  %v2623_v42 = vadd.f32 %v2495_v56, %v2373_v16  ;;  %v2624_v46 = vadd.f32 %v2496_v54, %v2373_v16  ;;  %v2313_v25 = vmul.f32 %v5091_v23, %v5793_v2  ;;  %v2056_v4 = vsub.f32 1.0, %v1986_v7  ;;  %v1994_v44 = vpop.permute.xlu1 %1993  ;;  %v5797_v16 = vld [vmem:[#allocation23_spill] sm:$0xff]  ;;  %v3063_v12 = vld [vmem:[#allocation2 + $0x3d0] sm:$0xff] }
 0x3d0   :  { %v2621_v6 = vadd.f32 %v2493_v43, %v2372_v20  ;;  %v2622_v18 = vadd.f32 %v2494_v3, %v2372_v20  ;;  %v2183_v36 = vadd.f32 %v2119_v47, %v5149_v33  ;;  %v2121_v39 = vmul.f32 %v5091_v23, %v2057_v45  ;;  %v3065_v20 = vld [vmem:[#allocation2 + $0x3f0] sm:$0xff]  ;;  %v3066_v43 = vld [vmem:[#allocation2 + $0x3f8] sm:$0xff] }
 0x3d1   :  { %2751 = vst [vmem:[#allocation8 + $0x3a0] sm:$0xff] %v2623_v42  ;;  %2752 = vst [vmem:[#allocation8 + $0x3a8] sm:$0xff] %v2624_v46  ;;  %v2375_v29 = vmul.f32 %v5794_v21, %v2055_v11  ;;  %v2182_v9 = vadd.f32 %v2118_v49, %v1978_v27  ;;  %v2374_v61 = vmul.f32 %v5795_v41, %v2054_v51  ;;  %v2058_v33 = vsub.f32 1.0, %v1994_v44  ;;  %v5799_v51 = vld [vmem:[#allocation122_spill] sm:$0xff] }
 0x3d2   :  { %2749 = vst [vmem:[#allocation8 + $0x390] sm:$0xff] %v2621_v6  ;;  %2750 = vst [vmem:[#allocation8 + $0x398] sm:$0xff] %v2622_v18  ;;  %v2499_v32 = vmul.f32 %v3057_v31, %v2183_v36  ;;  %v2500_v50 = vmul.f32 %v3058_v14, %v2183_v36  ;;  %v2185_v38 = vadd.f32 %v2121_v39, %v5155_v15  ;;  %v5798_v10 = vsub.f32 0.0, %v5797_v16 }
 0x3d3   :  { %v2497_v23 = vmul.f32 %v3059_v52, %v2182_v9  ;;  %v2498_v30 = vmul.f32 %v3060_v40, %v2182_v9  ;;  %v2377_v1 = vmul.f32 %v2313_v25, %v2057_v45  ;;  %v2120_v27 = vmul.f32 %v5796_v19, %v2056_v4 }
 0x3d4   :  { %v2627_v63 = vadd.f32 %v2499_v32, %v2375_v29  ;;  %v2628_v28 = vadd.f32 %v2500_v50, %v2375_v29  ;;  %v2503_v24 = vmul.f32 %v3061_v8, %v2185_v38  ;;  %v2504_v17 = vmul.f32 %v3062_v60, %v2185_v38 }
 0x3d5   :  { %v2625_v59 = vadd.f32 %v2497_v23, %v2374_v61  ;;  %v2626_v53 = vadd.f32 %v2498_v30, %v2374_v61  ;;  %v2184_v37 = vadd.f32 %v2120_v27, %v1986_v7  ;;  %v2122_v0 = vmul.f32 %v5075_v5, %v2058_v33 }
 0x3d6   :  { %2755 = vst [vmem:[#allocation8 + $0x3c0] sm:$0xff] %v2627_v63  ;;  %2756 = vst [vmem:[#allocation8 + $0x3c8] sm:$0xff] %v2628_v28  ;;  %v2631_v15 = vadd.f32 %v2503_v24, %v2377_v1  ;;  %v2632_v55 = vadd.f32 %v2504_v17, %v2377_v1  ;;  %v2314_v11 = vmul.f32 %v5075_v5, %v5798_v10 }
 0x3d7   :  { %2753 = vst [vmem:[#allocation8 + $0x3b0] sm:$0xff] %v2625_v59  ;;  %2754 = vst [vmem:[#allocation8 + $0x3b8] sm:$0xff] %v2626_v53  ;;  %v2376_v45 = vmul.f32 %v5799_v51, %v2056_v4  ;;  %v2501_v58 = vmul.f32 %v3063_v12, %v2184_v37  ;;  %v2502_v56 = vmul.f32 %v3064_v34, %v2184_v37 }
 0x3d8   :  { %v2186_v35 = vadd.f32 %v2122_v0, %v1994_v44  ;;  %2759 = vst [vmem:[#allocation8 + $0x3e0] sm:$0xff] %v2631_v15  ;;  %2760 = vst [vmem:[#allocation8 + $0x3e8] sm:$0xff] %v2632_v55  ;;  %v2378_v54 = vmul.f32 %v2314_v11, %v2058_v33 }
 0x3d9   :  { %v2629_v7 = vadd.f32 %v2501_v58, %v2376_v45  ;;  %v2630_v26 = vadd.f32 %v2502_v56, %v2376_v45 }
 0x3da   :  { %v2505_v62 = vmul.f32 %v3065_v20, %v2186_v35  ;;  %v2506_v5 = vmul.f32 %v3066_v43, %v2186_v35 }
 0x3db   :  { %2757 = vst [vmem:[#allocation8 + $0x3d0] sm:$0xff] %v2629_v7  ;;  %2758 = vst [vmem:[#allocation8 + $0x3d8] sm:$0xff] %v2630_v26 }
 0x3dc   :  { %v2633_v22 = vadd.f32 %v2505_v62, %v2378_v54  ;;  %v2634_v3 = vadd.f32 %v2506_v5, %v2378_v54 }
 0x3de   :  { %2761 = vst [vmem:[#allocation8 + $0x3f0] sm:$0xff] %v2633_v22  ;;  %2762 = vst [vmem:[#allocation8 + $0x3f8] sm:$0xff] %v2634_v3 }
 0x3df   :  { %3138 = shalt.err (!%p3135_p5)
}
 0x3e0   :  { %2774 = dma.vmem_to_hbm [thread:$0]  %s2769_s2, 16384, %s5189_s3, [#allocation4], %s3155_s17, %s3155_s17, %s3156_s18  }
 0x3e1   :  { %3151 = dma.done.wait [#allocation4], 16384  }
 0x3e2   :  { %3152 = vsyncadd [#allocation4], 4294950912 }
 0x3e3   :  { %2778 = vsyncpa [#allocation3], 1 }
 0x3e4   :  { %2779 = vsyncpa [#allocation6], 1 }
 0x3e5   :  { %2780 = vsyncpa [#allocation4], 1 }

</bundles_post_ra>
